<compile_context>
chip_gen: v6e
topology: v6e:2x2x1
jax: 0.10.0
libtpu: 0.0.40
codegen_flags: <defaults>
</compile_context>

<pallas_src>
import jax
import jax.numpy as jnp
from jax.experimental import pallas as pl
from jax.experimental.pallas import tpu as pltpu

EPS = 1e-3


def _fused_kernel(x_ref, w1_ref, gamma_ref, beta_ref, w2_ref, o_ref):
    # x_ref:     (240, M)   channels-major activations (free view of NCHW for N=1)
    # w1_ref:    (72, 240)
    # gamma_ref: (72, 1)
    # beta_ref:  (72, 1)
    # w2_ref:    (432, 72)
    # o_ref:     (432, M)
    x = x_ref[...]
    w1 = w1_ref[...]

    # 1x1 conv #1 as matmul (MXU): h[c, m] = sum_k w1[c, k] * x[k, m]
    h = jnp.dot(w1, x, preferred_element_type=jnp.float32)        # (72, M) f32

    # BatchNorm2d training-mode batch statistics over N*H*W (biased variance),
    # computed in a single pass over h: var = E[h^2] - mean^2.
    m = h.shape[1]
    inv_m = 1.0 / m
    sum_h = jnp.sum(h, axis=1, keepdims=True)                     # (72, 1)
    sum_h2 = jnp.sum(h * h, axis=1, keepdims=True)                # (72, 1)
    mean = sum_h * inv_m
    var = sum_h2 * inv_m - mean * mean
    inv_std = jax.lax.rsqrt(var + EPS)                            # EUP
    s = gamma_ref[...] * inv_std                                  # (72, 1)
    b = beta_ref[...] - mean * s                                  # (72, 1)

    # Normalize + affine folded into ONE scale+shift pass (lane broadcast of (72,1)).
    y = h * s + b                                                 # (72, M)

    # 1x1 conv #2 as matmul (MXU)
    o_ref[...] = jnp.dot(w2_ref[...], y, preferred_element_type=jnp.float32)  # (432, M)


def fused_conv_bn_conv(x_nchw, w1_oihw, gamma, beta, w2_oihw):
    """x_nchw: (N, 240, H, W) float32 -> (N, 432, H, W) float32."""
    n, cin, hgt, wdt = x_nchw.shape
    c_mid = w1_oihw.shape[0]   # 72
    c_out = w2_oihw.shape[0]   # 432
    m = n * hgt * wdt

    # (C, M) activation layout.  For N=1 this is a pure reshape (no data movement).
    if n == 1:
        x_cm = x_nchw.reshape(cin, m)
    else:
        x_cm = jnp.transpose(x_nchw, (1, 0, 2, 3)).reshape(cin, m)

    # Conv weights (Cout, Cin, 1, 1) -> 2-D, already in the orientation the kernel uses.
    w1_2d = w1_oihw.reshape(c_mid, cin)        # (72, 240)
    w2_2d = w2_oihw.reshape(c_out, c_mid)      # (432, 72)
    gamma_c = gamma.reshape(c_mid, 1)
    beta_c = beta.reshape(c_mid, 1)

    out_cm = pl.pallas_call(
        _fused_kernel,
        out_shape=jax.ShapeDtypeStruct((c_out, m), jnp.float32),
        grid=(1,),
        in_specs=[
            pl.BlockSpec((cin, m), lambda i: (0, 0)),
            pl.BlockSpec((c_mid, cin), lambda i: (0, 0)),
            pl.BlockSpec((c_mid, 1), lambda i: (0, 0)),
            pl.BlockSpec((c_mid, 1), lambda i: (0, 0)),
            pl.BlockSpec((c_out, c_mid), lambda i: (0, 0)),
        ],
        out_specs=pl.BlockSpec((c_out, m), lambda i: (0, 0)),
        compiler_params=pltpu.CompilerParams(
            dimension_semantics=("arbitrary",),
        ),
    )(x_cm, w1_2d, gamma_c, beta_c, w2_2d)

    # (Cout, M) -> NCHW.  For N=1 this is again a pure reshape.
    if n == 1:
        return out_cm.reshape(1, c_out, hgt, wdt)
    return jnp.transpose(out_cm.reshape(c_out, n, hgt, wdt), (1, 0, 2, 3))


def _reference(x_nchw, w1_oihw, gamma, beta, w2_oihw):
    """Pure-JAX reference mirroring PyTorch training-mode forward."""
    n, cin, hgt, wdt = x_nchw.shape
    c_mid = w1_oihw.shape[0]
    c_out = w2_oihw.shape[0]
    x2d = jnp.transpose(x_nchw, (0, 2, 3, 1)).reshape(-1, cin)
    h1 = x2d @ jnp.transpose(w1_oihw.reshape(c_mid, cin))
    mean = jnp.mean(h1, axis=0, keepdims=True)
    var = jnp.mean((h1 - mean) ** 2, axis=0, keepdims=True)
    y = (h1 - mean) / jnp.sqrt(var + EPS) * gamma.reshape(1, -1) + beta.reshape(1, -1)
    o = y @ jnp.transpose(w2_oihw.reshape(c_out, c_mid))
    return jnp.transpose(o.reshape(n, hgt, wdt, c_out), (0, 3, 1, 2))


if __name__ == "__main__":
    key = jax.random.PRNGKey(0)
    k_x, k_w1, k_g, k_b, k_w2 = jax.random.split(key, 5)

    # Input shape matching the module: [1, 240, 28, 28]
    N, CIN, H, W = 1, 240, 28, 28
    CMID, COUT = 72, 432

    x = jax.random.normal(k_x, (N, CIN, H, W), dtype=jnp.float32)

    # Deterministic synthetic parameters (shapes from the module's __init__)
    w1 = jax.random.normal(k_w1, (CMID, CIN, 1, 1), dtype=jnp.float32) * 0.05
    gamma = 1.0 + 0.1 * jax.random.normal(k_g, (CMID,), dtype=jnp.float32)
    beta = 0.1 * jax.random.normal(k_b, (CMID,), dtype=jnp.float32)
    w2 = jax.random.normal(k_w2, (COUT, CMID, 1, 1), dtype=jnp.float32) * 0.05

    out = fused_conv_bn_conv(x, w1, gamma, beta, w2)
    out = jax.block_until_ready(out)

    ref = _reference(x, w1, gamma, beta, w2)
    assert out.shape == (N, COUT, H, W), out.shape
    assert jnp.allclose(out, ref, atol=1e-3, rtol=1e-3), "mismatch vs reference"

    print("KERNEL_OK")
</pallas_src>

<mosaic_0001>
module attributes {stable_mosaic.version = 11 : i64} {
  func.func @_fused_kernel(%arg0: i32, %arg1: memref<240x784xf32, #tpu.memory_space<vmem>>, %arg2: memref<72x240xf32, #tpu.memory_space<vmem>>, %arg3: memref<72x1xf32, #tpu.memory_space<vmem>>, %arg4: memref<72x1xf32, #tpu.memory_space<vmem>>, %arg5: memref<432x72xf32, #tpu.memory_space<vmem>>, %arg6: memref<432x784xf32, #tpu.memory_space<vmem>>) attributes {dimension_semantics = [#tpu.dimension_semantics<arbitrary>], iteration_bounds = array<i64: 1>, scalar_prefetch = 0 : i64, scratch_operands = 0 : i64, tpu.core_type = #tpu.core_type<tc>, window_params = [{pipeline_mode = #tpu.pipeline_mode<synchronous>, transform_indices = @transform_0, window_bounds = array<i64: 240, 784>}, {pipeline_mode = #tpu.pipeline_mode<synchronous>, transform_indices = @transform_1, window_bounds = array<i64: 72, 240>}, {pipeline_mode = #tpu.pipeline_mode<synchronous>, transform_indices = @transform_2, window_bounds = array<i64: 72, 1>}, {pipeline_mode = #tpu.pipeline_mode<synchronous>, transform_indices = @transform_3, window_bounds = array<i64: 72, 1>}, {pipeline_mode = #tpu.pipeline_mode<synchronous>, transform_indices = @transform_4, window_bounds = array<i64: 432, 72>}, {pipeline_mode = #tpu.pipeline_mode<synchronous>, transform_indices = @transform_5, window_bounds = array<i64: 432, 784>}]} {
    %c0 = arith.constant 0 : index
    %c0_0 = arith.constant 0 : index
    %0 = vector.load %arg1[%c0, %c0_0] : memref<240x784xf32, #tpu.memory_space<vmem>>, vector<240x784xf32>
    %c0_1 = arith.constant 0 : index
    %c0_2 = arith.constant 0 : index
    %1 = vector.load %arg2[%c0_1, %c0_2] : memref<72x240xf32, #tpu.memory_space<vmem>>, vector<72x240xf32>
    %cst = arith.constant dense<0.000000e+00> : vector<72x784xf32>
    %2 = tpu.matmul %1, %0, %cst {dimension_numbers = #tpu.dot_dimension_numbers<[1], [0], [0], [1], [0, 0, 1, 1], [], []>} : vector<72x240xf32>, vector<240x784xf32>, vector<72x784xf32> -> vector<72x784xf32>
    %cst_3 = arith.constant dense<0.000000e+00> : vector<72xf32>
    %3 = vector.multi_reduction <add>, %2, %cst_3 [1] : vector<72x784xf32> to vector<72xf32>
    %4 = vector.shape_cast %3 : vector<72xf32> to vector<72x1xf32>
    %5 = arith.mulf %2, %2 : vector<72x784xf32>
    %cst_4 = arith.constant dense<0.000000e+00> : vector<72xf32>
    %6 = vector.multi_reduction <add>, %5, %cst_4 [1] : vector<72x784xf32> to vector<72xf32>
    %7 = vector.shape_cast %6 : vector<72xf32> to vector<72x1xf32>
    %cst_5 = arith.constant 0.00127551018 : f32
    %8 = vector.broadcast %cst_5 : f32 to vector<72x1xf32>
    %9 = arith.mulf %4, %8 : vector<72x1xf32>
    %cst_6 = arith.constant 0.00127551018 : f32
    %10 = vector.broadcast %cst_6 : f32 to vector<72x1xf32>
    %11 = arith.mulf %7, %10 : vector<72x1xf32>
    %12 = arith.mulf %9, %9 : vector<72x1xf32>
    %13 = arith.subf %11, %12 : vector<72x1xf32>
    %cst_7 = arith.constant 1.000000e-03 : f32
    %14 = vector.broadcast %cst_7 : f32 to vector<72x1xf32>
    %15 = arith.addf %13, %14 : vector<72x1xf32>
    %16 = math.rsqrt %15 : vector<72x1xf32>
    %c0_8 = arith.constant 0 : index
    %c0_9 = arith.constant 0 : index
    %17 = vector.load %arg3[%c0_8, %c0_9] : memref<72x1xf32, #tpu.memory_space<vmem>>, vector<72x1xf32>
    %18 = arith.mulf %17, %16 : vector<72x1xf32>
    %c0_10 = arith.constant 0 : index
    %c0_11 = arith.constant 0 : index
    %19 = vector.load %arg4[%c0_10, %c0_11] : memref<72x1xf32, #tpu.memory_space<vmem>>, vector<72x1xf32>
    %20 = arith.mulf %9, %18 : vector<72x1xf32>
    %21 = arith.subf %19, %20 : vector<72x1xf32>
    %22 = vector.broadcast %18 : vector<72x1xf32> to vector<72x784xf32>
    %23 = arith.mulf %2, %22 : vector<72x784xf32>
    %24 = vector.broadcast %21 : vector<72x1xf32> to vector<72x784xf32>
    %25 = arith.addf %23, %24 : vector<72x784xf32>
    %c0_12 = arith.constant 0 : index
    %c0_13 = arith.constant 0 : index
    %26 = vector.load %arg5[%c0_12, %c0_13] : memref<432x72xf32, #tpu.memory_space<vmem>>, vector<432x72xf32>
    %cst_14 = arith.constant dense<0.000000e+00> : vector<432x784xf32>
    %27 = tpu.matmul %26, %25, %cst_14 {dimension_numbers = #tpu.dot_dimension_numbers<[1], [0], [0], [1], [0, 0, 1, 1], [], []>} : vector<432x72xf32>, vector<72x784xf32>, vector<432x784xf32> -> vector<432x784xf32>
    %c0_15 = arith.constant 0 : index
    %c0_16 = arith.constant 0 : index
    %28 = vector.load %arg6[%c0_15, %c0_16] : memref<432x784xf32, #tpu.memory_space<vmem>>, vector<432x784xf32>
    tpu.vector_store %arg6[%c0_15, %c0_16], %27 {strides = array<i32>} : memref<432x784xf32, #tpu.memory_space<vmem>>, vector<432x784xf32>,
    return
  }
  func.func @transform_0(%arg0: i32) -> (i32, i32) {
    %c0_i32 = arith.constant 0 : i32
    %c0_i32_0 = arith.constant 0 : i32
    %c0_i32_1 = arith.constant 0 : i32
    return %c0_i32, %c0_i32_0 : i32, i32
  }
  func.func @transform_1(%arg0: i32) -> (i32, i32) {
    %c0_i32 = arith.constant 0 : i32
    %c0_i32_0 = arith.constant 0 : i32
    %c0_i32_1 = arith.constant 0 : i32
    return %c0_i32, %c0_i32_0 : i32, i32
  }
  func.func @transform_2(%arg0: i32) -> (i32, i32) {
    %c0_i32 = arith.constant 0 : i32
    %c0_i32_0 = arith.constant 0 : i32
    %c0_i32_1 = arith.constant 0 : i32
    return %c0_i32, %c0_i32_0 : i32, i32
  }
  func.func @transform_3(%arg0: i32) -> (i32, i32) {
    %c0_i32 = arith.constant 0 : i32
    %c0_i32_0 = arith.constant 0 : i32
    %c0_i32_1 = arith.constant 0 : i32
    return %c0_i32, %c0_i32_0 : i32, i32
  }
  func.func @transform_4(%arg0: i32) -> (i32, i32) {
    %c0_i32 = arith.constant 0 : i32
    %c0_i32_0 = arith.constant 0 : i32
    %c0_i32_1 = arith.constant 0 : i32
    return %c0_i32, %c0_i32_0 : i32, i32
  }
  func.func @transform_5(%arg0: i32) -> (i32, i32) {
    %c0_i32 = arith.constant 0 : i32
    %c0_i32_0 = arith.constant 0 : i32
    %c0_i32_1 = arith.constant 0 : i32
    return %c0_i32, %c0_i32_0 : i32, i32
  }
}

</mosaic_0001>

<bundles_post_ra>
// kernel: tpu_custom_call.1
= control target key start
LH: loop header
LB: loop body
LE: loop exit
PB: predicated region body
PF: predicated region fallthrough
CT: control target
= control target key end

     0   :  { %vm249_vm0 = vcmask 916480   ;;  %s6439_s0 = inlined_call_operand.vmem [shape: f32[240,784], index: 0, kind: input, shape index: {}]   ;;  %s6440_s1 = inlined_call_operand.vmem [shape: f32[72,240], index: 1, kind: input, shape index: {}]   ;;  %s6441_s2 = inlined_call_operand.vmem [shape: f32[72,1], index: 2, kind: input, shape index: {}]   ;;  %s6442_s3 = inlined_call_operand.vmem [shape: f32[72,1], index: 3, kind: input, shape index: {}]   ;;  %s6443_s4 = inlined_call_operand.vmem [shape: f32[432,72], index: 4, kind: input, shape index: {}]   ;;  %s6444_s5 = inlined_call_operand.hbm [shape: f32[432,784], index: 5, kind: output, shape index: {}]  }
   0x1   :  { %v127_v0 = vld [vmem:[%s6439_s0 + $0x350] sm:$0xff]  ;;  %v126_v1 = vld [vmem:[%s6439_s0 + $0x348] sm:$0xff]  ;;  %v129_v2 = vld [vmem:[%s6439_s0 + $0x360] sm:$0xff] }
   0x2   :  { %277 = vmatprep.subr.mxu0 %v127_v0  ;;  %396 = vmatprep.subr.mxu1 %v129_v2  ;;  %v120_v3 = vld [vmem:[%s6439_s0 + $0x318] sm:$0xff]  ;;  %v119_v5 = vld [vmem:[%s6439_s0 + $0x310] sm:$0xff]  ;;  %v122_v6 = vld [vmem:[%s6439_s0 + $0x328] sm:$0xff] }
   0x3   :  { %v128_v4 = vld [vmem:[%s6439_s0 + $0x358] sm:$0xff]  ;;  %278 = vmatpush1.msra.mxu0 %v126_v1  ;;  %v113_v7 = vld [vmem:[%s6439_s0 + $0x2e0] sm:$0xff]  ;;  %v115_v10 = vld [vmem:[%s6439_s0 + $0x2f0] sm:$0xff] }
   0x4   :  { %397 = vmatpush1.msra.mxu1 %v128_v4  ;;  %v121_v8 = vld [vmem:[%s6439_s0 + $0x320] sm:$0xff]  ;;  %279 = vmatprep.subr.mxu0 %v120_v3  ;;  %v112_v9 = vld [vmem:[%s6439_s0 + $0x2d8] sm:$0xff]  ;;  %v106_v11 = vld [vmem:[%s6439_s0 + $0x2a8] sm:$0xff] }
   0x5   :  { %398 = vmatprep.subr.mxu1 %v122_v6  ;;  %280 = vmatpush1.msra.mxu0 %v119_v5  ;;  %v114_v12 = vld [vmem:[%s6439_s0 + $0x2e8] sm:$0xff]  ;;  %v108_v13 = vld [vmem:[%s6439_s0 + $0x2b8] sm:$0xff]  ;;  %v105_v14 = vld [vmem:[%s6439_s0 + $0x2a0] sm:$0xff] }
   0x6   :  { %399 = vmatpush1.msra.mxu1 %v121_v8  ;;  %281 = vmatprep.subr.mxu0 %v113_v7  ;;  %v107_v15 = vld [vmem:[%s6439_s0 + $0x2b0] sm:$0xff]  ;;  %v101_v17 = vld [vmem:[%s6439_s0 + $0x280] sm:$0xff]  ;;  %v98_v18 = vld [vmem:[%s6439_s0 + $0x268] sm:$0xff] }
   0x7   :  { %400 = vmatprep.subr.mxu1 %v115_v10  ;;  %282 = vmatpush1.msra.mxu0 %v112_v9  ;;  %v99_v16 = vld [vmem:[%s6439_s0 + $0x270] sm:$0xff]  ;;  %v100_v19 = vld [vmem:[%s6439_s0 + $0x278] sm:$0xff]  ;;  %v94_v21 = vld [vmem:[%s6439_s0 + $0x248] sm:$0xff] }
   0x8   :  { %401 = vmatpush1.msra.mxu1 %v114_v12  ;;  %283 = vmatprep.subr.mxu0 %v106_v11  ;;  %v92_v20 = vld [vmem:[%s6439_s0 + $0x238] sm:$0xff]  ;;  %v91_v22 = vld [vmem:[%s6439_s0 + $0x230] sm:$0xff]  ;;  %v93_v23 = vld [vmem:[%s6439_s0 + $0x240] sm:$0xff] }
   0x9   :  { %402 = vmatprep.subr.mxu1 %v108_v13  ;;  %284 = vmatpush1.msra.mxu0 %v105_v14  ;;  %v85_v24 = vld [vmem:[%s6439_s0 + $0x200] sm:$0xff]  ;;  %v87_v25 = vld [vmem:[%s6439_s0 + $0x210] sm:$0xff]  ;;  %v84_v26 = vld [vmem:[%s6439_s0 + $0x1f8] sm:$0xff] }
   0xa   :  { %403 = vmatpush1.msra.mxu1 %v107_v15  ;;  %285 = vmatprep.subr.mxu0 %v99_v16  ;;  %v86_v27 = vld [vmem:[%s6439_s0 + $0x208] sm:$0xff]  ;;  %v80_v29 = vld [vmem:[%s6439_s0 + $0x1d8] sm:$0xff]  ;;  %v77_v30 = vld [vmem:[%s6439_s0 + $0x1c0] sm:$0xff] }
   0xb   :  { %404 = vmatprep.subr.mxu1 %v101_v17  ;;  %286 = vmatpush1.msra.mxu0 %v98_v18  ;;  %v78_v28 = vld [vmem:[%s6439_s0 + $0x1c8] sm:$0xff]  ;;  %v79_v31 = vld [vmem:[%s6439_s0 + $0x1d0] sm:$0xff]  ;;  %v73_v33 = vld [vmem:[%s6439_s0 + $0x1a0] sm:$0xff] }
   0xc   :  { %405 = vmatpush1.msra.mxu1 %v100_v19  ;;  %287 = vmatprep.subr.mxu0 %v92_v20  ;;  %v71_v32 = vld [vmem:[%s6439_s0 + $0x190] sm:$0xff]  ;;  %v70_v34 = vld [vmem:[%s6439_s0 + $0x188] sm:$0xff]  ;;  %v72_v35 = vld [vmem:[%s6439_s0 + $0x198] sm:$0xff] }
   0xd   :  { %406 = vmatprep.subr.mxu1 %v94_v21  ;;  %288 = vmatpush1.msra.mxu0 %v91_v22  ;;  %v64_v36 = vld [vmem:[%s6439_s0 + $0x158] sm:$0xff]  ;;  %v66_v37 = vld [vmem:[%s6439_s0 + $0x168] sm:$0xff]  ;;  %v63_v38 = vld [vmem:[%s6439_s0 + $0x150] sm:$0xff] }
   0xe   :  { %407 = vmatpush1.msra.mxu1 %v93_v23  ;;  %289 = vmatprep.subr.mxu0 %v85_v24  ;;  %v65_v39 = vld [vmem:[%s6439_s0 + $0x160] sm:$0xff]  ;;  %v59_v41 = vld [vmem:[%s6439_s0 + $0x130] sm:$0xff]  ;;  %v56_v42 = vld [vmem:[%s6439_s0 + $0x118] sm:$0xff] }
   0xf   :  { %408 = vmatprep.subr.mxu1 %v87_v25  ;;  %290 = vmatpush1.msra.mxu0 %v84_v26  ;;  %v57_v40 = vld [vmem:[%s6439_s0 + $0x120] sm:$0xff]  ;;  %v58_v43 = vld [vmem:[%s6439_s0 + $0x128] sm:$0xff]  ;;  %v52_v45 = vld [vmem:[%s6439_s0 + $0xf8] sm:$0xff] }
  0x10   :  { %409 = vmatpush1.msra.mxu1 %v86_v27  ;;  %291 = vmatprep.subr.mxu0 %v78_v28  ;;  %v50_v44 = vld [vmem:[%s6439_s0 + $0xe8] sm:$0xff]  ;;  %v49_v46 = vld [vmem:[%s6439_s0 + $0xe0] sm:$0xff]  ;;  %v51_v47 = vld [vmem:[%s6439_s0 + $0xf0] sm:$0xff] }
  0x11   :  { %410 = vmatprep.subr.mxu1 %v80_v29  ;;  %292 = vmatpush1.msra.mxu0 %v77_v30  ;;  %v43_v48 = vld [vmem:[%s6439_s0 + $0xb0] sm:$0xff]  ;;  %v45_v49 = vld [vmem:[%s6439_s0 + $0xc0] sm:$0xff]  ;;  %v42_v50 = vld [vmem:[%s6439_s0 + $0xa8] sm:$0xff] }
  0x12   :  { %411 = vmatpush1.msra.mxu1 %v79_v31  ;;  %293 = vmatprep.subr.mxu0 %v71_v32  ;;  %v44_v51 = vld [vmem:[%s6439_s0 + $0xb8] sm:$0xff]  ;;  %v38_v53 = vld [vmem:[%s6439_s0 + $0x88] sm:$0xff]  ;;  %v35_v54 = vld [vmem:[%s6439_s0 + $0x70] sm:$0xff] }
  0x13   :  { %412 = vmatprep.subr.mxu1 %v73_v33  ;;  %294 = vmatpush1.msra.mxu0 %v70_v34  ;;  %v36_v52 = vld [vmem:[%s6439_s0 + $0x78] sm:$0xff]  ;;  %v37_v55 = vld [vmem:[%s6439_s0 + $0x80] sm:$0xff]  ;;  %v31_v57 = vld [vmem:[%s6439_s0 + $0x50] sm:$0xff] }
  0x14   :  { %413 = vmatpush1.msra.mxu1 %v72_v35  ;;  %295 = vmatprep.subr.mxu0 %v64_v36  ;;  %v29_v56 = vld [vmem:[%s6439_s0 + $0x40] sm:$0xff]  ;;  %v28_v58 = vld [vmem:[%s6439_s0 + $0x38] sm:$0xff]  ;;  %v30_v59 = vld [vmem:[%s6439_s0 + $0x48] sm:$0xff] }
  0x15   :  { %414 = vmatprep.subr.mxu1 %v66_v37  ;;  %296 = vmatpush1.msra.mxu0 %v63_v38  ;;  %v22_v60 = vld [vmem:[%s6439_s0 + $0x8] sm:$0xff]  ;;  %v24_v61 = vld [vmem:[%s6439_s0 + $0x18] sm:$0xff]  ;;  %v21_v62 = vld [vmem:[%s6439_s0] sm:$0xff] }
  0x16   :  { %415 = vmatpush1.msra.mxu1 %v65_v39  ;;  %297 = vmatprep.subr.mxu0 %v57_v40  ;;  %v23_v63 = vld [vmem:[%s6439_s0 + $0x10] sm:$0xff]  ;;  %v225_v0 = vld [vmem:[%s6439_s0 + $0x660] sm:$0xff]  ;;  %v224_v2 = vld [vmem:[%s6439_s0 + $0x658] sm:$0xff] }
  0x17   :  { %416 = vmatprep.subr.mxu1 %v59_v41  ;;  %298 = vmatpush1.msra.mxu0 %v56_v42  ;;  %v227_v1 = vld [vmem:[%s6439_s0 + $0x670] sm:$0xff]  ;;  %v226_v3 = vld [vmem:[%s6439_s0 + $0x668] sm:$0xff]  ;;  %v220_v5 = vld [vmem:[%s6439_s0 + $0x638] sm:$0xff] }
  0x18   :  { %417 = vmatpush1.msra.mxu1 %v58_v43  ;;  %299 = vmatprep.subr.mxu0 %v50_v44  ;;  %v218_v4 = vld [vmem:[%s6439_s0 + $0x628] sm:$0xff]  ;;  %v217_v6 = vld [vmem:[%s6439_s0 + $0x620] sm:$0xff]  ;;  %v219_v7 = vld [vmem:[%s6439_s0 + $0x630] sm:$0xff] }
  0x19   :  { %418 = vmatprep.subr.mxu1 %v52_v45  ;;  %300 = vmatpush1.msra.mxu0 %v49_v46  ;;  %v211_v8 = vld [vmem:[%s6439_s0 + $0x5f0] sm:$0xff]  ;;  %v213_v9 = vld [vmem:[%s6439_s0 + $0x600] sm:$0xff]  ;;  %v210_v10 = vld [vmem:[%s6439_s0 + $0x5e8] sm:$0xff] }
  0x1a   :  { %419 = vmatpush1.msra.mxu1 %v51_v47  ;;  %301 = vmatprep.subr.mxu0 %v43_v48  ;;  %v212_v11 = vld [vmem:[%s6439_s0 + $0x5f8] sm:$0xff]  ;;  %v206_v13 = vld [vmem:[%s6439_s0 + $0x5c8] sm:$0xff]  ;;  %v203_v14 = vld [vmem:[%s6439_s0 + $0x5b0] sm:$0xff] }
  0x1b   :  { %420 = vmatprep.subr.mxu1 %v45_v49  ;;  %302 = vmatpush1.msra.mxu0 %v42_v50  ;;  %v204_v12 = vld [vmem:[%s6439_s0 + $0x5b8] sm:$0xff]  ;;  %v205_v15 = vld [vmem:[%s6439_s0 + $0x5c0] sm:$0xff]  ;;  %v199_v17 = vld [vmem:[%s6439_s0 + $0x590] sm:$0xff] }
  0x1c   :  { %421 = vmatpush1.msra.mxu1 %v44_v51  ;;  %303 = vmatprep.subr.mxu0 %v36_v52  ;;  %v197_v16 = vld [vmem:[%s6439_s0 + $0x580] sm:$0xff]  ;;  %v196_v18 = vld [vmem:[%s6439_s0 + $0x578] sm:$0xff]  ;;  %v198_v19 = vld [vmem:[%s6439_s0 + $0x588] sm:$0xff] }
  0x1d   :  { %422 = vmatprep.subr.mxu1 %v38_v53  ;;  %304 = vmatpush1.msra.mxu0 %v35_v54  ;;  %v190_v20 = vld [vmem:[%s6439_s0 + $0x548] sm:$0xff]  ;;  %v192_v21 = vld [vmem:[%s6439_s0 + $0x558] sm:$0xff]  ;;  %v189_v22 = vld [vmem:[%s6439_s0 + $0x540] sm:$0xff] }
  0x1e   :  { %423 = vmatpush1.msra.mxu1 %v37_v55  ;;  %305 = vmatprep.subr.mxu0 %v29_v56  ;;  %v191_v23 = vld [vmem:[%s6439_s0 + $0x550] sm:$0xff]  ;;  %v185_v25 = vld [vmem:[%s6439_s0 + $0x520] sm:$0xff]  ;;  %v182_v26 = vld [vmem:[%s6439_s0 + $0x508] sm:$0xff] }
  0x1f   :  { %424 = vmatprep.subr.mxu1 %v31_v57  ;;  %306 = vmatpush1.msra.mxu0 %v28_v58  ;;  %v183_v24 = vld [vmem:[%s6439_s0 + $0x510] sm:$0xff]  ;;  %v184_v27 = vld [vmem:[%s6439_s0 + $0x518] sm:$0xff]  ;;  %v178_v29 = vld [vmem:[%s6439_s0 + $0x4e8] sm:$0xff] }
  0x20   :  { %425 = vmatpush1.msra.mxu1 %v30_v59  ;;  %307 = vmatprep.subr.mxu0 %v22_v60  ;;  %v176_v28 = vld [vmem:[%s6439_s0 + $0x4d8] sm:$0xff]  ;;  %v175_v30 = vld [vmem:[%s6439_s0 + $0x4d0] sm:$0xff]  ;;  %v177_v31 = vld [vmem:[%s6439_s0 + $0x4e0] sm:$0xff] }
  0x21   :  { %426 = vmatprep.subr.mxu1 %v24_v61  ;;  %308 = vmatpush1.msra.mxu0 %v21_v62  ;;  %v169_v32 = vld [vmem:[%s6439_s0 + $0x4a0] sm:$0xff]  ;;  %v171_v33 = vld [vmem:[%s6439_s0 + $0x4b0] sm:$0xff]  ;;  %v168_v34 = vld [vmem:[%s6439_s0 + $0x498] sm:$0xff] }
  0x22   :  { %427 = vmatpush1.msra.mxu1 %v23_v63  ;;  %313 = vmatprep.subr.mxu0 %v225_v0  ;;  %v170_v35 = vld [vmem:[%s6439_s0 + $0x4a8] sm:$0xff]  ;;  %v164_v37 = vld [vmem:[%s6439_s0 + $0x478] sm:$0xff]  ;;  %v161_v38 = vld [vmem:[%s6439_s0 + $0x460] sm:$0xff]  ;;  %v6445_v63 = vmov 0.0  }
  0x23   :  { %432 = vmatprep.subr.mxu1 %v227_v1  ;;  %314 = vmatpush2.msra.mxu0 %v224_v2  ;;  %v162_v36 = vld [vmem:[%s6439_s0 + $0x468] sm:$0xff]  ;;  %v163_v39 = vld [vmem:[%s6439_s0 + $0x470] sm:$0xff]  ;;  %v157_v41 = vld [vmem:[%s6439_s0 + $0x440] sm:$0xff] }
  0x24   :  { %433 = vmatpush2.msra.mxu1 %v226_v3  ;;  %315 = vmatprep.subr.mxu0 %v218_v4  ;;  %v155_v40 = vld [vmem:[%s6439_s0 + $0x430] sm:$0xff]  ;;  %v154_v42 = vld [vmem:[%s6439_s0 + $0x428] sm:$0xff]  ;;  %v156_v43 = vld [vmem:[%s6439_s0 + $0x438] sm:$0xff] }
  0x25   :  { %434 = vmatprep.subr.mxu1 %v220_v5  ;;  %316 = vmatpush2.msra.mxu0 %v217_v6  ;;  %v148_v44 = vld [vmem:[%s6439_s0 + $0x3f8] sm:$0xff]  ;;  %v150_v45 = vld [vmem:[%s6439_s0 + $0x408] sm:$0xff]  ;;  %v147_v46 = vld [vmem:[%s6439_s0 + $0x3f0] sm:$0xff] }
  0x26   :  { %435 = vmatpush2.msra.mxu1 %v219_v7  ;;  %317 = vmatprep.subr.mxu0 %v211_v8  ;;  %v149_v47 = vld [vmem:[%s6439_s0 + $0x400] sm:$0xff]  ;;  %v143_v49 = vld [vmem:[%s6439_s0 + $0x3d0] sm:$0xff]  ;;  %v140_v50 = vld [vmem:[%s6439_s0 + $0x3b8] sm:$0xff] }
  0x27   :  { %436 = vmatprep.subr.mxu1 %v213_v9  ;;  %318 = vmatpush2.msra.mxu0 %v210_v10  ;;  %v141_v48 = vld [vmem:[%s6439_s0 + $0x3c0] sm:$0xff]  ;;  %v142_v51 = vld [vmem:[%s6439_s0 + $0x3c8] sm:$0xff]  ;;  %v136_v55 = vld [vmem:[%s6439_s0 + $0x398] sm:$0xff] }
  0x28   :  { %437 = vmatpush2.msra.mxu1 %v212_v11  ;;  %319 = vmatprep.subr.mxu0 %v204_v12  ;;  %v134_v52 = vld [vmem:[%s6439_s0 + $0x388] sm:$0xff]  ;;  %v133_v54 = vld [vmem:[%s6439_s0 + $0x380] sm:$0xff]  ;;  %v135_v57 = vld [vmem:[%s6439_s0 + $0x390] sm:$0xff] }
  0x29   :  { %438 = vmatprep.subr.mxu1 %v206_v13  ;;  %320 = vmatpush2.msra.mxu0 %v203_v14  ;;  %v4280_v53 = vld [vmem:[%s6440_s1 + $0x8] sm:$0xff]  ;;  %v4291_v56 = vld [vmem:[%s6440_s1] sm:$0xff]  ;;  %v131_v58 = vld [vmem:[%s6439_s0 + $0x370] sm:$0xff] }
  0x2a   :  { %439 = vmatpush2.msra.mxu1 %v205_v15  ;;  %321 = vmatprep.subr.mxu0 %v197_v16  ;;  %v130_v59 = vld [vmem:[%s6439_s0 + $0x368] sm:$0xff]  ;;  %v124_v60 = vld [vmem:[%s6439_s0 + $0x338] sm:$0xff]  ;;  %v123_v62 = vld [vmem:[%s6439_s0 + $0x330] sm:$0xff] }
  0x2b   :  { %440 = vmatprep.subr.mxu1 %v199_v17  ;;  %322 = vmatpush2.msra.mxu0 %v196_v18  ;;  %v132_v61 = vld [vmem:[%s6439_s0 + $0x378] sm:$0xff]  ;;  %v117_v0 = vld [vmem:[%s6439_s0 + $0x300] sm:$0xff]  ;;  %v110_v3 = vld [vmem:[%s6439_s0 + $0x2c8] sm:$0xff] }
  0x2c   :  { %441 = vmatpush2.msra.mxu1 %v198_v19  ;;  %323 = vmatprep.subr.mxu0 %v190_v20  ;;  %v125_v1 = vld [vmem:[%s6439_s0 + $0x340] sm:$0xff]  ;;  %v116_v2 = vld [vmem:[%s6439_s0 + $0x2f8] sm:$0xff]  ;;  %v118_v4 = vld [vmem:[%s6439_s0 + $0x308] sm:$0xff] }
  0x2d   :  { %442 = vmatprep.subr.mxu1 %v192_v21  ;;  %324 = vmatpush2.msra.mxu0 %v189_v22  ;;  %v109_v5 = vld [vmem:[%s6439_s0 + $0x2c0] sm:$0xff]  ;;  %v103_v6 = vld [vmem:[%s6439_s0 + $0x290] sm:$0xff]  ;;  %v102_v8 = vld [vmem:[%s6439_s0 + $0x288] sm:$0xff] }
  0x2e   :  { %443 = vmatpush2.msra.mxu1 %v191_v23  ;;  %325 = vmatprep.subr.mxu0 %v183_v24  ;;  %v111_v7 = vld [vmem:[%s6439_s0 + $0x2d0] sm:$0xff]  ;;  %v96_v9 = vld [vmem:[%s6439_s0 + $0x258] sm:$0xff]  ;;  %v89_v12 = vld [vmem:[%s6439_s0 + $0x220] sm:$0xff] }
  0x2f   :  { %444 = vmatprep.subr.mxu1 %v185_v25  ;;  %326 = vmatpush2.msra.mxu0 %v182_v26  ;;  %v104_v10 = vld [vmem:[%s6439_s0 + $0x298] sm:$0xff]  ;;  %v95_v11 = vld [vmem:[%s6439_s0 + $0x250] sm:$0xff]  ;;  %v97_v13 = vld [vmem:[%s6439_s0 + $0x260] sm:$0xff] }
  0x30   :  { %445 = vmatpush2.msra.mxu1 %v184_v27  ;;  %327 = vmatprep.subr.mxu0 %v176_v28  ;;  %v88_v14 = vld [vmem:[%s6439_s0 + $0x218] sm:$0xff]  ;;  %v82_v15 = vld [vmem:[%s6439_s0 + $0x1e8] sm:$0xff]  ;;  %v81_v17 = vld [vmem:[%s6439_s0 + $0x1e0] sm:$0xff] }
  0x31   :  { %446 = vmatprep.subr.mxu1 %v178_v29  ;;  %328 = vmatpush2.msra.mxu0 %v175_v30  ;;  %v90_v16 = vld [vmem:[%s6439_s0 + $0x228] sm:$0xff]  ;;  %v75_v18 = vld [vmem:[%s6439_s0 + $0x1b0] sm:$0xff] }
  0x32   :  { %447 = vmatpush2.msra.mxu1 %v177_v31  ;;  %329 = vmatprep.subr.mxu0 %v169_v32  ;;  %v83_v19 = vld [vmem:[%s6439_s0 + $0x1f0] sm:$0xff]  ;;  %v74_v20 = vld [vmem:[%s6439_s0 + $0x1a8] sm:$0xff] }
  0x33   :  { %448 = vmatprep.subr.mxu1 %v171_v33  ;;  %330 = vmatpush2.msra.mxu0 %v168_v34 }
  0x34   :  { %449 = vmatpush2.msra.mxu1 %v170_v35  ;;  %331 = vmatprep.subr.mxu0 %v162_v36 }
  0x35   :  { %450 = vmatprep.subr.mxu1 %v164_v37  ;;  %332 = vmatpush2.msra.mxu0 %v161_v38 }
  0x36   :  { %451 = vmatpush2.msra.mxu1 %v163_v39  ;;  %333 = vmatprep.subr.mxu0 %v155_v40 }
  0x37   :  { %452 = vmatprep.subr.mxu1 %v157_v41  ;;  %334 = vmatpush2.msra.mxu0 %v154_v42 }
  0x38   :  { %453 = vmatpush2.msra.mxu1 %v156_v43  ;;  %335 = vmatprep.subr.mxu0 %v148_v44 }
  0x39   :  { %454 = vmatprep.subr.mxu1 %v150_v45  ;;  %336 = vmatpush2.msra.mxu0 %v147_v46 }
  0x3a   :  { %455 = vmatpush2.msra.mxu1 %v149_v47  ;;  %337 = vmatprep.subr.mxu0 %v141_v48 }
  0x3b   :  { %456 = vmatprep.subr.mxu1 %v143_v49  ;;  %338 = vmatpush2.msra.mxu0 %v140_v50 }
  0x3c   :  { %457 = vmatpush2.msra.mxu1 %v142_v51  ;;  %339 = vmatprep.subr.mxu0 %v134_v52 }
  0x3d   :  { %3398 = vmatprep.mubr.msk.f32.mxu0 %vm249_vm0, %v4280_v53  ;;  %340 = vmatpush2.msra.mxu0 %v133_v54 }
  0x3e   :  { %458 = vmatprep.subr.mxu1 %v136_v55  ;;  %342 = vmatmul.mubr.f32.vlgmr.msra.gmra.mxu0 %v4291_v56 }
  0x3f   :  { %459 = vmatpush2.msra.mxu1 %v135_v57  ;;  %515 = vmatprep.subr.mxu0 %v131_v58 }
  0x40   :  { %3407 = vmatprep.mubr.msk.f32.mxu1 %vm249_vm0, %v4280_v53  ;;  %516 = vmatpush1.msra.mxu0 %v130_v59 }
  0x41   :  { %634 = vmatprep.subr.mxu1 %v6445_v63  ;;  %461 = vmatmul.mubr.f32.vlgmr.msra.gmra.mxu1 %v4291_v56 }
  0x42   :  { %517 = vmatprep.subr.mxu0 %v124_v60  ;;  %635 = vmatpush1.msra.mxu1 %v132_v61 }
  0x43   :  { %518 = vmatpush1.msra.mxu0 %v123_v62  ;;  %636 = vmatprep.subr.mxu1 %v6445_v63 }
  0x44   :  { %519 = vmatprep.subr.mxu0 %v117_v0  ;;  %637 = vmatpush1.msra.mxu1 %v125_v1 }
  0x45   :  { %520 = vmatpush1.msra.mxu0 %v116_v2  ;;  %638 = vmatprep.subr.mxu1 %v6445_v63 }
  0x46   :  { %521 = vmatprep.subr.mxu0 %v110_v3  ;;  %639 = vmatpush1.msra.mxu1 %v118_v4 }
  0x47   :  { %522 = vmatpush1.msra.mxu0 %v109_v5  ;;  %640 = vmatprep.subr.mxu1 %v6445_v63 }
  0x48   :  { %523 = vmatprep.subr.mxu0 %v103_v6  ;;  %641 = vmatpush1.msra.mxu1 %v111_v7 }
  0x49   :  { %524 = vmatpush1.msra.mxu0 %v102_v8  ;;  %642 = vmatprep.subr.mxu1 %v6445_v63 }
  0x4a   :  { %525 = vmatprep.subr.mxu0 %v96_v9  ;;  %643 = vmatpush1.msra.mxu1 %v104_v10 }
  0x4b   :  { %526 = vmatpush1.msra.mxu0 %v95_v11  ;;  %644 = vmatprep.subr.mxu1 %v6445_v63 }
  0x4c   :  { %527 = vmatprep.subr.mxu0 %v89_v12  ;;  %645 = vmatpush1.msra.mxu1 %v97_v13 }
  0x4d   :  { %528 = vmatpush1.msra.mxu0 %v88_v14  ;;  %646 = vmatprep.subr.mxu1 %v6445_v63 }
  0x4e   :  { %529 = vmatprep.subr.mxu0 %v82_v15 }
  0x4f   :  { %10 = vsyncpa [#allocation3], 0  ;;  %647 = vmatpush1.msra.mxu1 %v90_v16  ;;  %530 = vmatpush1.msra.mxu0 %v81_v17  ;;  %v68_v21 = vld [vmem:[%s6439_s0 + $0x178] sm:$0xff]  ;;  %v67_v23 = vld [vmem:[%s6439_s0 + $0x170] sm:$0xff]  ;;  %vm749_vm1 = vcmask 130048   ;;  %vm1339_vm2 = vcmask 588800  }
  0x50   :  { %648 = vmatprep.subr.mxu1 %v6445_v63  ;;  %531 = vmatprep.subr.mxu0 %v75_v18  ;;  %v76_v22 = vld [vmem:[%s6439_s0 + $0x1b8] sm:$0xff]  ;;  %v61_v24 = vld [vmem:[%s6439_s0 + $0x140] sm:$0xff]  ;;  %v54_v27 = vld [vmem:[%s6439_s0 + $0x108] sm:$0xff] }
  0x51   :  { %649 = vmatpush1.msra.mxu1 %v83_v19  ;;  %532 = vmatpush1.msra.mxu0 %v74_v20  ;;  %v69_v25 = vld [vmem:[%s6439_s0 + $0x180] sm:$0xff]  ;;  %v60_v26 = vld [vmem:[%s6439_s0 + $0x138] sm:$0xff]  ;;  %v62_v28 = vld [vmem:[%s6439_s0 + $0x148] sm:$0xff] }
  0x52   :  { %650 = vmatprep.subr.mxu1 %v6445_v63  ;;  %533 = vmatprep.subr.mxu0 %v68_v21  ;;  %v53_v29 = vld [vmem:[%s6439_s0 + $0x100] sm:$0xff]  ;;  %v4420_v30 = vld [vmem:[%s6440_s1 + $0x18] sm:$0xff]  ;;  %v47_v31 = vld [vmem:[%s6439_s0 + $0xd0] sm:$0xff] }
  0x53   :  { %651 = vmatpush1.msra.mxu1 %v76_v22  ;;  %534 = vmatpush1.msra.mxu0 %v67_v23  ;;  %v55_v32 = vld [vmem:[%s6439_s0 + $0x110] sm:$0xff]  ;;  %v46_v34 = vld [vmem:[%s6439_s0 + $0xc8] sm:$0xff]  ;;  %v48_v35 = vld [vmem:[%s6439_s0 + $0xd8] sm:$0xff] }
  0x54   :  { %652 = vmatprep.subr.mxu1 %v6445_v63  ;;  %535 = vmatprep.subr.mxu0 %v61_v24  ;;  %v4432_v33 = vld [vmem:[%s6440_s1 + $0x10] sm:$0xff]  ;;  %v40_v36 = vld [vmem:[%s6439_s0 + $0x98] sm:$0xff]  ;;  %v4454_v38 = vld [vmem:[%s6440_s1 + $0x28] sm:$0xff] }
  0x55   :  { %653 = vmatpush1.msra.mxu1 %v69_v25  ;;  %536 = vmatpush1.msra.mxu0 %v60_v26  ;;  %v39_v37 = vld [vmem:[%s6439_s0 + $0x90] sm:$0xff]  ;;  %v33_v39 = vld [vmem:[%s6439_s0 + $0x60] sm:$0xff]  ;;  %v32_v42 = vld [vmem:[%s6439_s0 + $0x58] sm:$0xff] }
  0x56   :  { %654 = vmatprep.subr.mxu1 %v6445_v63  ;;  %537 = vmatprep.subr.mxu0 %v54_v27  ;;  %v41_v40 = vld [vmem:[%s6439_s0 + $0xa0] sm:$0xff]  ;;  %v26_v43 = vld [vmem:[%s6439_s0 + $0x28] sm:$0xff]  ;;  %v4489_v46 = vld [vmem:[%s6440_s1 + $0x38] sm:$0xff] }
  0x57   :  { %655 = vmatpush1.msra.mxu1 %v62_v28  ;;  %538 = vmatpush1.msra.mxu0 %v53_v29  ;;  %v4466_v41 = vld [vmem:[%s6440_s1 + $0x20] sm:$0xff]  ;;  %v34_v44 = vld [vmem:[%s6439_s0 + $0x68] sm:$0xff]  ;;  %v27_v48 = vld [vmem:[%s6439_s0 + $0x30] sm:$0xff] }
  0x58   :  { %656 = vmatprep.subr.mxu1 %v6445_v63  ;;  %3399 = vmatprep.mubr.msk.f32.mxu0 %vm249_vm0, %v4420_v30  ;;  %v25_v45 = vld [vmem:[%s6439_s0 + $0x20] sm:$0xff]  ;;  %v4501_v49 = vld [vmem:[%s6440_s1 + $0x30] sm:$0xff]  ;;  %v228_v50 = vld [vmem:[%s6439_s0 + $0x678] sm:$0xff] }
  0x59   :  { %539 = vmatprep.subr.mxu0 %v47_v31  ;;  %657 = vmatpush1.msra.mxu1 %v55_v32  ;;  %v229_v47 = vld [vmem:[%s6439_s0 + $0x680] sm:$0xff]  ;;  %v222_v51 = vld [vmem:[%s6439_s0 + $0x648] sm:$0xff]  ;;  %v215_v57 = vld [vmem:[%s6439_s0 + $0x610] sm:$0xff] }
  0x5a   :  { %348 = vmatmul.mubr.f32.gmra.mxu0 %v4432_v33  ;;  %658 = vmatprep.subr.mxu1 %v6445_v63  ;;  %v230_v52 = vld [vmem:[%s6439_s0 + $0x688] sm:$0xff]  ;;  %v221_v54 = vld [vmem:[%s6439_s0 + $0x640] sm:$0xff]  ;;  %v223_v58 = vld [vmem:[%s6439_s0 + $0x650] sm:$0xff] }
  0x5b   :  { %540 = vmatpush1.msra.mxu0 %v46_v34  ;;  %659 = vmatpush1.msra.mxu1 %v48_v35  ;;  %v4525_v55 = vld [vmem:[%s6440_s1 + $0x48] sm:$0xff]  ;;  %v4537_v59 = vld [vmem:[%s6440_s1 + $0x40] sm:$0xff]  ;;  %v208_v61 = vld [vmem:[%s6439_s0 + $0x5d8] sm:$0xff] }
  0x5c   :  { %541 = vmatprep.subr.mxu0 %v40_v36  ;;  %660 = vmatprep.subr.mxu1 %v6445_v63  ;;  %v214_v60 = vld [vmem:[%s6439_s0 + $0x608] sm:$0xff]  ;;  %v216_v62 = vld [vmem:[%s6439_s0 + $0x618] sm:$0xff]  ;;  %v207_v0 = vld [vmem:[%s6439_s0 + $0x5d0] sm:$0xff] }
  0x5d   :  { %542 = vmatpush1.msra.mxu0 %v39_v37  ;;  %3400 = vmatprep.mubr.msk.f32.mxu0 %vm249_vm0, %v4454_v38  ;;  %v4561_v1 = vld [vmem:[%s6440_s1 + $0x58] sm:$0xff]  ;;  %v201_v2 = vld [vmem:[%s6439_s0 + $0x5a0] sm:$0xff]  ;;  %v4573_v4 = vld [vmem:[%s6440_s1 + $0x50] sm:$0xff] }
  0x5e   :  { %3408 = vmatprep.mubr.msk.f32.mxu1 %vm249_vm0, %v4420_v30  ;;  %543 = vmatprep.subr.mxu0 %v33_v39  ;;  %v209_v3 = vld [vmem:[%s6439_s0 + $0x5e0] sm:$0xff]  ;;  %v200_v5 = vld [vmem:[%s6439_s0 + $0x598] sm:$0xff]  ;;  %v194_v6 = vld [vmem:[%s6439_s0 + $0x568] sm:$0xff] }
  0x5f   :  { %661 = vmatpush1.msra.mxu1 %v41_v40  ;;  %354 = vmatmul.mubr.f32.gmra.mxu0 %v4466_v41  ;;  %v202_v7 = vld [vmem:[%s6439_s0 + $0x5a8] sm:$0xff]  ;;  %v193_v8 = vld [vmem:[%s6439_s0 + $0x560] sm:$0xff]  ;;  %v187_v10 = vld [vmem:[%s6439_s0 + $0x530] sm:$0xff] }
  0x60   :  { %467 = vmatmul.mubr.f32.gmra.mxu1 %v4432_v33  ;;  %544 = vmatpush1.msra.mxu0 %v32_v42  ;;  %v4597_v9 = vld [vmem:[%s6440_s1 + $0x68] sm:$0xff]  ;;  %v195_v11 = vld [vmem:[%s6439_s0 + $0x570] sm:$0xff]  ;;  %v4609_v12 = vld [vmem:[%s6440_s1 + $0x60] sm:$0xff] }
  0x61   :  { %662 = vmatprep.subr.mxu1 %v6445_v63  ;;  %545 = vmatprep.subr.mxu0 %v26_v43  ;;  %v186_v13 = vld [vmem:[%s6439_s0 + $0x528] sm:$0xff]  ;;  %v180_v14 = vld [vmem:[%s6439_s0 + $0x4f8] sm:$0xff]  ;;  %v179_v16 = vld [vmem:[%s6439_s0 + $0x4f0] sm:$0xff] }
  0x62   :  { %663 = vmatpush1.msra.mxu1 %v34_v44  ;;  %546 = vmatpush1.msra.mxu0 %v25_v45  ;;  %v188_v15 = vld [vmem:[%s6439_s0 + $0x538] sm:$0xff]  ;;  %v173_v18 = vld [vmem:[%s6439_s0 + $0x4c0] sm:$0xff]  ;;  %v4645_v20 = vld [vmem:[%s6440_s1 + $0x70] sm:$0xff] }
  0x63   :  { %664 = vmatprep.subr.mxu1 %v6445_v63  ;;  %3401 = vmatprep.mubr.msk.f32.mxu0 %vm249_vm0, %v4489_v46  ;;  %v4633_v17 = vld [vmem:[%s6440_s1 + $0x78] sm:$0xff]  ;;  %v181_v19 = vld [vmem:[%s6439_s0 + $0x500] sm:$0xff]  ;;  %v166_v22 = vld [vmem:[%s6439_s0 + $0x488] sm:$0xff] }
  0x64   :  { %3409 = vmatprep.mubr.msk.f32.mxu1 %vm249_vm0, %v4454_v38  ;;  %551 = vmatprep.subr.mxu0 %v229_v47  ;;  %v172_v21 = vld [vmem:[%s6439_s0 + $0x4b8] sm:$0xff]  ;;  %v174_v23 = vld [vmem:[%s6439_s0 + $0x4c8] sm:$0xff]  ;;  %v165_v24 = vld [vmem:[%s6439_s0 + $0x480] sm:$0xff] }
  0x65   :  { %665 = vmatpush1.msra.mxu1 %v27_v48  ;;  %360 = vmatmul.mubr.f32.gmra.mxu0 %v4501_v49  ;;  %v4669_v25 = vld [vmem:[%s6440_s1 + $0x88] sm:$0xff]  ;;  %v159_v26 = vld [vmem:[%s6439_s0 + $0x450] sm:$0xff]  ;;  %v4681_v28 = vld [vmem:[%s6440_s1 + $0x80] sm:$0xff] }
  0x66   :  { %473 = vmatmul.mubr.f32.gmra.mxu1 %v4466_v41  ;;  %552 = vmatpush2.msra.mxu0 %v228_v50  ;;  %v167_v27 = vld [vmem:[%s6439_s0 + $0x490] sm:$0xff]  ;;  %v158_v29 = vld [vmem:[%s6439_s0 + $0x448] sm:$0xff]  ;;  %v152_v31 = vld [vmem:[%s6439_s0 + $0x418] sm:$0xff] }
  0x67   :  { %670 = vmatprep.subr.mxu1 %v6445_v63  ;;  %553 = vmatprep.subr.mxu0 %v222_v51  ;;  %v160_v32 = vld [vmem:[%s6439_s0 + $0x458] sm:$0xff]  ;;  %v151_v34 = vld [vmem:[%s6439_s0 + $0x410] sm:$0xff]  ;;  %v145_v35 = vld [vmem:[%s6439_s0 + $0x3e0] sm:$0xff] }
  0x68   :  { %671 = vmatpush2.msra.mxu1 %v230_v52  ;;  %554 = vmatpush2.msra.mxu0 %v221_v54  ;;  %v153_v36 = vld [vmem:[%s6439_s0 + $0x420] sm:$0xff]  ;;  %v144_v37 = vld [vmem:[%s6439_s0 + $0x3d8] sm:$0xff]  ;;  %v138_v39 = vld [vmem:[%s6439_s0 + $0x3a8] sm:$0xff] }
  0x69   :  { %672 = vmatprep.subr.mxu1 %v6445_v63  ;;  %3402 = vmatprep.mubr.msk.f32.mxu0 %vm249_vm0, %v4525_v55  ;;  %v146_v40 = vld [vmem:[%s6439_s0 + $0x3e8] sm:$0xff]  ;;  %v137_v42 = vld [vmem:[%s6439_s0 + $0x3a0] sm:$0xff]  ;;  %v139_v43 = vld [vmem:[%s6439_s0 + $0x3b0] sm:$0xff] }
  0x6a   :  { %3410 = vmatprep.mubr.msk.f32.mxu1 %vm249_vm0, %v4489_v46  ;;  %555 = vmatprep.subr.mxu0 %v215_v57 }
  0x6b   :  { %673 = vmatpush2.msra.mxu1 %v223_v58  ;;  %366 = vmatmul.mubr.f32.gmra.mxu0 %v4537_v59 }
  0x6c   :  { %479 = vmatmul.mubr.f32.gmra.mxu1 %v4501_v49  ;;  %556 = vmatpush2.msra.mxu0 %v214_v60 }
  0x6d   :  { %674 = vmatprep.subr.mxu1 %v6445_v63  ;;  %557 = vmatprep.subr.mxu0 %v208_v61 }
  0x6e   :  { %675 = vmatpush2.msra.mxu1 %v216_v62  ;;  %558 = vmatpush2.msra.mxu0 %v207_v0 }
  0x6f   :  { %676 = vmatprep.subr.mxu1 %v6445_v63  ;;  %3403 = vmatprep.mubr.msk.f32.mxu0 %vm249_vm0, %v4561_v1 }
  0x70   :  { %3411 = vmatprep.mubr.msk.f32.mxu1 %vm249_vm0, %v4525_v55  ;;  %559 = vmatprep.subr.mxu0 %v201_v2 }
  0x71   :  { %677 = vmatpush2.msra.mxu1 %v209_v3  ;;  %372 = vmatmul.mubr.f32.gmra.mxu0 %v4573_v4 }
  0x72   :  { %485 = vmatmul.mubr.f32.gmra.mxu1 %v4537_v59  ;;  %560 = vmatpush2.msra.mxu0 %v200_v5 }
  0x73   :  { %678 = vmatprep.subr.mxu1 %v6445_v63  ;;  %561 = vmatprep.subr.mxu0 %v194_v6 }
  0x74   :  { %679 = vmatpush2.msra.mxu1 %v202_v7  ;;  %562 = vmatpush2.msra.mxu0 %v193_v8 }
  0x75   :  { %680 = vmatprep.subr.mxu1 %v6445_v63  ;;  %3404 = vmatprep.mubr.msk.f32.mxu0 %vm249_vm0, %v4597_v9 }
  0x76   :  { %3412 = vmatprep.mubr.msk.f32.mxu1 %vm249_vm0, %v4561_v1  ;;  %563 = vmatprep.subr.mxu0 %v187_v10 }
  0x77   :  { %681 = vmatpush2.msra.mxu1 %v195_v11  ;;  %378 = vmatmul.mubr.f32.gmra.mxu0 %v4609_v12 }
  0x78   :  { %491 = vmatmul.mubr.f32.gmra.mxu1 %v4573_v4  ;;  %564 = vmatpush2.msra.mxu0 %v186_v13 }
  0x79   :  { %682 = vmatprep.subr.mxu1 %v6445_v63  ;;  %565 = vmatprep.subr.mxu0 %v180_v14 }
  0x7a   :  { %683 = vmatpush2.msra.mxu1 %v188_v15  ;;  %566 = vmatpush2.msra.mxu0 %v179_v16 }
  0x7b   :  { %684 = vmatprep.subr.mxu1 %v6445_v63  ;;  %3405 = vmatprep.mubr.msk.f32.mxu0 %vm249_vm0, %v4633_v17 }
  0x7c   :  { %3413 = vmatprep.mubr.msk.f32.mxu1 %vm249_vm0, %v4597_v9  ;;  %567 = vmatprep.subr.mxu0 %v173_v18 }
  0x7d   :  { %685 = vmatpush2.msra.mxu1 %v181_v19  ;;  %384 = vmatmul.mubr.f32.gmra.mxu0 %v4645_v20 }
  0x7e   :  { %497 = vmatmul.mubr.f32.gmra.mxu1 %v4609_v12  ;;  %568 = vmatpush2.msra.mxu0 %v172_v21 }
  0x7f   :  { %686 = vmatprep.subr.mxu1 %v6445_v63  ;;  %569 = vmatprep.subr.mxu0 %v166_v22 }
  0x80   :  { %687 = vmatpush2.msra.mxu1 %v174_v23  ;;  %570 = vmatpush2.msra.mxu0 %v165_v24 }
  0x81   :  { %688 = vmatprep.subr.mxu1 %v6445_v63  ;;  %3406 = vmatprep.mubr.msk.f32.mxu0 %vm249_vm0, %v4669_v25 }
  0x82   :  { %3414 = vmatprep.mubr.msk.f32.mxu1 %vm249_vm0, %v4633_v17  ;;  %571 = vmatprep.subr.mxu0 %v159_v26 }
  0x83   :  { %689 = vmatpush2.msra.mxu1 %v167_v27  ;;  %390 = vmatmul.mubr.f32.gmra.mxu0 %v4681_v28 }
  0x84   :  { %503 = vmatmul.mubr.f32.gmra.mxu1 %v4645_v20  ;;  %572 = vmatpush2.msra.mxu0 %v158_v29 }
  0x85   :  { %690 = vmatprep.subr.mxu1 %v6445_v63  ;;  %573 = vmatprep.subr.mxu0 %v152_v31 }
  0x86   :  { %691 = vmatpush2.msra.mxu1 %v160_v32  ;;  %574 = vmatpush2.msra.mxu0 %v151_v34 }
  0x87   :  { %692 = vmatprep.subr.mxu1 %v6445_v63  ;;  %3415 = vmatprep.mubr.msk.f32.mxu1 %vm249_vm0, %v4669_v25 }
  0x88   :  { %575 = vmatprep.subr.mxu0 %v145_v35  ;;  %693 = vmatpush2.msra.mxu1 %v153_v36 }
  0x89   :  { %509 = vmatmul.mubr.f32.gmra.mxu1 %v4681_v28  ;;  %576 = vmatpush2.msra.mxu0 %v144_v37 }
  0x8a   :  { %694 = vmatprep.subr.mxu1 %v6445_v63  ;;  %577 = vmatprep.subr.mxu0 %v138_v39 }
  0x8b   :  { %695 = vmatpush2.msra.mxu1 %v146_v40  ;;  %578 = vmatpush2.msra.mxu0 %v137_v42 }
  0x8c   :  { %3416 = vmatprep.mubr.msk.f32.mxu0 %vm249_vm0, %v4280_v53  ;;  %696 = vmatprep.subr.mxu1 %v6445_v63 }
  0x8d   :  { %580 = vmatmul.mubr.f32.vlgmr.msra.gmra.mxu0 %v4291_v56  ;;  %697 = vmatpush2.msra.mxu1 %v139_v43 }
  0x8e   :  { %3425 = vmatprep.mubr.msk.f32.mxu1 %vm249_vm0, %v4280_v53  ;;  %3417 = vmatprep.mubr.msk.f32.mxu0 %vm249_vm0, %v4420_v30 }
  0x8f   :  { %699 = vmatmul.mubr.f32.vlgmr.msra.gmra.mxu1 %v4291_v56 }
  0x90   :  { %3426 = vmatprep.mubr.msk.f32.mxu1 %vm249_vm0, %v4420_v30 }
  0x91   :  { %586 = vmatmul.mubr.f32.gmra.mxu0 %v4432_v33 }
  0x92   :  { %3418 = vmatprep.mubr.msk.f32.mxu0 %vm249_vm0, %v4454_v38 }
  0x93   :  { %704 = vmatmul.mubr.f32.gmra.mxu1 %v4432_v33 }
  0x94   :  { %3427 = vmatprep.mubr.msk.f32.mxu1 %vm249_vm0, %v4454_v38 }
  0x95   :  { %592 = vmatmul.mubr.f32.gmra.mxu0 %v4466_v41 }
  0x96   :  { %3419 = vmatprep.mubr.msk.f32.mxu0 %vm249_vm0, %v4489_v46 }
  0x97   :  { %709 = vmatmul.mubr.f32.gmra.mxu1 %v4466_v41 }
  0x98   :  { %3428 = vmatprep.mubr.msk.f32.mxu1 %vm249_vm0, %v4489_v46 }
  0x99   :  { %598 = vmatmul.mubr.f32.gmra.mxu0 %v4501_v49 }
  0x9a   :  { %3420 = vmatprep.mubr.msk.f32.mxu0 %vm249_vm0, %v4525_v55 }
  0x9b   :  { %714 = vmatmul.mubr.f32.gmra.mxu1 %v4501_v49 }
  0x9c   :  { %3429 = vmatprep.mubr.msk.f32.mxu1 %vm249_vm0, %v4525_v55 }
  0x9d   :  { %604 = vmatmul.mubr.f32.gmra.mxu0 %v4537_v59 }
  0x9e   :  { %3421 = vmatprep.mubr.msk.f32.mxu0 %vm249_vm0, %v4561_v1 }
  0x9f   :  { %719 = vmatmul.mubr.f32.gmra.mxu1 %v4537_v59 }
  0xa0   :  { %3430 = vmatprep.mubr.msk.f32.mxu1 %vm249_vm0, %v4561_v1 }
  0xa1   :  { %610 = vmatmul.mubr.f32.gmra.mxu0 %v4573_v4 }
  0xa2   :  { %3422 = vmatprep.mubr.msk.f32.mxu0 %vm249_vm0, %v4597_v9 }
  0xa3   :  { %724 = vmatmul.mubr.f32.gmra.mxu1 %v4573_v4 }
  0xa4   :  { %3431 = vmatprep.mubr.msk.f32.mxu1 %vm249_vm0, %v4597_v9 }
  0xa5   :  { %616 = vmatmul.mubr.f32.gmra.mxu0 %v4609_v12 }
  0xa6   :  { %3423 = vmatprep.mubr.msk.f32.mxu0 %vm249_vm0, %v4633_v17 }
  0xa7   :  { %729 = vmatmul.mubr.f32.gmra.mxu1 %v4609_v12 }
  0xa8   :  { %3432 = vmatprep.mubr.msk.f32.mxu1 %vm249_vm0, %v4633_v17 }
  0xa9   :  { %622 = vmatmul.mubr.f32.gmra.mxu0 %v4645_v20 }
  0xaa   :  { %3424 = vmatprep.mubr.msk.f32.mxu0 %vm249_vm0, %v4669_v25 }
  0xab   :  { %734 = vmatmul.mubr.f32.gmra.mxu1 %v4645_v20 }
  0xac   :  { %3433 = vmatprep.mubr.msk.f32.mxu1 %vm249_vm0, %v4669_v25 }
  0xad   :  { %628 = vmatmul.mubr.f32.gmra.mxu0 %v4681_v28 }
  0xae   :  { %1566 = vmatprep.mubr.f32.mxu0 %v6445_v63 }
  0xaf   :  { %739 = vmatmul.mubr.f32.gmra.mxu1 %v4681_v28 }
  0xb0   :  { %1812 = vmatprep.mubr.f32.mxu1 %v6445_v63 }
  0xfe   :  { %v4786_v53 = vpop.f32.mrf.mxu0 }
  0xff   :  { %6477 = vst [vmem:[#allocation5_spill] sm:$0xff] %v4786_v53  ;;  %v826_v13 = vmul.f32 %v4786_v53, %v4786_v53 }
 0x100   :  { %v4788_v56 = vpop.f32.mrf.mxu0 }
 0x101   :  { %6478 = vst [vmem:[#allocation6_spill] sm:$0xff] %v4788_v56  ;;  %v4790_v30 = vpop.f32.mrf.mxu1  ;;  %v827_v14 = vmul.f32 %v4788_v56, %v4788_v56  ;;  %v744_v16 = vadd.f32 %v4788_v56, %v4786_v53 }
 0x102   :  { %6479 = vst [vmem:[#allocation7_spill] sm:$0xff] %v4790_v30  ;;  %v828_v19 = vmul.f32 %v4790_v30, %v4790_v30 }
 0x103   :  { %v4796_v41 = vpop.f32.mrf.mxu1  ;;  %v889_v20 = vadd.f32 %v827_v14, %v826_v13  ;;  %v745_v24 = vadd.f32 %v744_v16, %v4790_v30 }
 0x104   :  { %6482 = vst [vmem:[#allocation10_spill] sm:$0xff] %v4796_v41  ;;  %v829_v39 = vmul.f32 %v4796_v41, %v4796_v41 }
 0x105   :  { %v890_v27 = vadd.f32 %v889_v20, %v828_v19  ;;  %v4905_v14 = vadd.f32 %v745_v24, %v4796_v41 }
 0x11a   :  { %v4792_v33 = vpop.f32.mrf.mxu0 }
 0x11b   :  { %6480 = vst [vmem:[#allocation8_spill] sm:$0xff] %v4792_v33  ;;  %v833_v31 = vmul.f32 %v4792_v33, %v4792_v33 }
 0x11c   :  { %v4794_v38 = vpop.f32.mrf.mxu0 }
 0x11d   :  { %6481 = vst [vmem:[#allocation9_spill] sm:$0xff] %v4794_v38  ;;  %v834_v32 = vmul.f32 %v4794_v38, %v4794_v38  ;;  %v754_v40 = vadd.f32 %v4794_v38, %v4792_v33 }
 0x11f   :  { %v4798_v44 = vpop.f32.mrf.mxu0  ;;  %v4921_v30 = vadd.f32 %v834_v32, %v833_v31 }
 0x120   :  { %6483 = vst [vmem:[#allocation11_spill] sm:$0xff] %v4798_v44  ;;  %v4800_v45 = vpop.f32.mrf.mxu1  ;;  %v4919_v63 = vmul.f32 %v4798_v44, %v4798_v44 }
 0x121   :  { %v4802_v46 = vpop.f32.mrf.mxu0 }
 0x122   :  { %6484 = vst [vmem:[#allocation12_spill] sm:$0xff] %v4802_v46  ;;  %v4804_v47 = vpop.f32.mrf.mxu1  ;;  %v763_v42 = vadd.f32 %v4802_v46, %v4798_v44 }
 0x125   :  { %v4806_v48 = vpop.f32.mrf.mxu0 }
 0x126   :  { %6485 = vst [vmem:[#allocation13_spill] sm:$0xff] %v4806_v48  ;;  %v4808_v49 = vpop.f32.mrf.mxu1  ;;  %v4939_v32 = vmul.f32 %v4806_v48, %v4806_v48 }
 0x127   :  { %v4810_v50 = vpop.f32.mrf.mxu0 }
 0x128   :  { %6486 = vst [vmem:[#allocation14_spill] sm:$0xff] %v4810_v50  ;;  %v4812_v51 = vpop.f32.mrf.mxu1  ;;  %v772_v21 = vadd.f32 %v4810_v50, %v4806_v48 }
 0x12b   :  { %v4814_v52 = vpop.f32.mrf.mxu0 }
 0x12c   :  { %6487 = vst [vmem:[#allocation15_spill] sm:$0xff] %v4814_v52  ;;  %v4816_v54 = vpop.f32.mrf.mxu1 }
 0x12d   :  { %6488 = vst [vmem:[#allocation16_spill] sm:$0xff] %v4816_v54  ;;  %v4818_v55 = vpop.f32.mrf.mxu0  ;;  %v773_v28 = vadd.f32 %v772_v21, %v4816_v54 }
 0x12e   :  { %6489 = vst [vmem:[#allocation17_spill] sm:$0xff] %v4818_v55  ;;  %v4820_v57 = vpop.f32.mrf.mxu1  ;;  %v781_v29 = vadd.f32 %v4818_v55, %v4814_v52 }
 0x131   :  { %v4822_v58 = vpop.f32.mrf.mxu0 }
 0x132   :  { %6490 = vst [vmem:[#allocation18_spill] sm:$0xff] %v4822_v58  ;;  %v4824_v59 = vpop.f32.mrf.mxu1  ;;  %v861_v34 = vmul.f32 %v4822_v58, %v4822_v58 }
 0x133   :  { %6491 = vst [vmem:[#allocation19_spill] sm:$0xff] %v4824_v59  ;;  %v4826_v60 = vpop.f32.mrf.mxu0  ;;  %v782_v20 = vadd.f32 %v781_v29, %v4824_v59  ;;  %v4928_v29 = vadd.f32 %v754_v40, %v4800_v45 }
 0x134   :  { %6492 = vst [vmem:[#allocation20_spill] sm:$0xff] %v4826_v60  ;;  %v4828_v61 = vpop.f32.mrf.mxu1  ;;  %v862_v35 = vmul.f32 %v4826_v60, %v4826_v60  ;;  %v790_v21 = vadd.f32 %v4826_v60, %v4822_v58 }
 0x135   :  { %v783_v38 = vadd.f32 %v782_v20, %v4828_v61 }
 0x136   :  { %v934_v41 = vadd.f32 %v862_v35, %v861_v34 }
 0x137   :  { %v4830_v62 = vpop.f32.mrf.mxu0 }
 0x138   :  { %6493 = vst [vmem:[#allocation21_spill] sm:$0xff] %v4830_v62  ;;  %v4832_v0 = vpop.f32.mrf.mxu1  ;;  %v868_v43 = vmul.f32 %v4830_v62, %v4830_v62 }
 0x139   :  { %6494 = vst [vmem:[#allocation22_spill] sm:$0xff] %v4832_v0  ;;  %v4836_v2 = vpop.f32.mrf.mxu0  ;;  %v863_v24 = vmul.f32 %v4832_v0, %v4832_v0  ;;  %v791_v33 = vadd.f32 %v790_v21, %v4832_v0 }
 0x13a   :  { %v4834_v1 = vpop.f32.mrf.mxu1  ;;  %6496 = vst [vmem:[#allocation24_spill] sm:$0xff] %v4836_v2  ;;  %v869_v13 = vmul.f32 %v4836_v2, %v4836_v2 }
 0x13b   :  { %6495 = vst [vmem:[#allocation23_spill] sm:$0xff] %v4834_v1 }
 0x13c   :  { %v943_v35 = vadd.f32 %v869_v13, %v868_v43  ;;  %v935_v43 = vadd.f32 %v934_v41, %v863_v24  ;;  %v864_v13 = vmul.f32 %v4834_v1, %v4834_v1 }
 0x13d   :  { %v4840_v4 = vpop.f32.mrf.mxu0 }
 0x13e   :  { %v4838_v3 = vpop.f32.mrf.mxu1  ;;  %6498 = vst [vmem:[#allocation26_spill] sm:$0xff] %v4840_v4  ;;  %v875_v20 = vmul.f32 %v4840_v4, %v4840_v4 }
 0x13f   :  { %6497 = vst [vmem:[#allocation25_spill] sm:$0xff] %v4838_v3  ;;  %v4844_v6 = vpop.f32.mrf.mxu0  ;;  %v870_v34 = vmul.f32 %v4838_v3, %v4838_v3 }
 0x140   :  { %v4842_v5 = vpop.f32.mrf.mxu1  ;;  %6500 = vst [vmem:[#allocation28_spill] sm:$0xff] %v4844_v6 }
 0x141   :  { %6499 = vst [vmem:[#allocation27_spill] sm:$0xff] %v4842_v5  ;;  %v944_v60 = vadd.f32 %v943_v35, %v870_v34  ;;  %v871_v41 = vmul.f32 %v4842_v5, %v4842_v5 }
 0x143   :  { %v4850_v9 = vpop.f32.mrf.mxu0 }
 0x144   :  { %v4846_v7 = vpop.f32.mrf.mxu1  ;;  %6502 = vst [vmem:[#allocation30_spill] sm:$0xff] %v4850_v9 }
 0x145   :  { %6501 = vst [vmem:[#allocation29_spill] sm:$0xff] %v4846_v7  ;;  %v4854_v11 = vpop.f32.mrf.mxu0 }
 0x146   :  { %v4848_v8 = vpop.f32.mrf.mxu1 }
 0x149   :  { %v4852_v10 = vpop.f32.mrf.mxu1 }
 0x14b   :  { %v4856_v12 = vpop.f32.mrf.mxu1 }
 0x14d   :  { %v4862_v15 = vpop.f32.mrf.mxu0 }
 0x14f   :  { %v4866_v17 = vpop.f32.mrf.mxu1  ;;  %v4868_v18 = vpop.f32.mrf.mxu0 }
 0x151   :  { %v702_v22 = vpop.f32.mrf.mxu1  ;;  %v4874_v23 = vpop.f32.mrf.mxu0 }
 0x152   :  { %v774_v22 = vadd.f32 %v773_v28, %v4820_v57  ;;  %v799_v28 = vadd.f32 %v4836_v2, %v4830_v62 }
 0x153   :  { %v4877_v25 = vpop.f32.mrf.mxu1  ;;  %v4879_v26 = vpop.f32.mrf.mxu0 }
 0x154   :  { %v800_v21 = vadd.f32 %v799_v28, %v4838_v3  ;;  %v4979_v28 = vmul.f32 %v4810_v50, %v4810_v50  ;;  %v883_v3 = vmul.f32 %v4854_v11, %v4854_v11  ;;  %v936_v50 = vadd.f32 %v935_v43, %v864_v13 }
 0x155   :  { %v707_v36 = vpop.f32.mrf.mxu1  ;;  %v4892_v37 = vpop.f32.mrf.mxu0 }
 0x156   :  { %v4915_v36 = vadd.f32 %v890_v27, %v829_v39  ;;  %v4932_v27 = vmul.f32 %v4802_v46, %v4802_v46  ;;  %v855_v46 = vmul.f32 %v4818_v55, %v4818_v55 }
 0x157   :  { %v4907_v16 = vpop.f32.mrf.mxu1  ;;  %v4909_v19 = vpop.f32.mrf.mxu0 }
 0x158   :  { %6503 = vst [vmem:[#allocation31_spill] sm:$0xff] %v4915_v36  ;;  %v945_v36 = vadd.f32 %v944_v60, %v871_v41 }
 0x159   :  { %v712_v53 = vpop.f32.mrf.mxu1  ;;  %v4925_v56 = vpop.f32.mrf.mxu0 }
 0x15a   :  { %v775_v31 = vadd.f32 %v774_v22, %v4925_v56  ;;  %v4942_v53 = vadd.f32 %v763_v42, %v4808_v49  ;;  %v854_v42 = vmul.f32 %v4814_v52, %v4814_v52  ;;  %v876_v52 = vmul.f32 %v4844_v6, %v4844_v6 }
 0x15b   :  { %v4946_v39 = vpop.f32.mrf.mxu1  ;;  %v4948_v40 = vpop.f32.mrf.mxu0 }
 0x15c   :  { %v776_v22 = vadd.f32 %v775_v31, %v4948_v40  ;;  %v777_v44 = vsel %vm749_vm1, %v4946_v39, 0.0  ;;  %v4985_v35 = vadd.f32 %v855_v46, %v854_v42  ;;  %v877_v42 = vmul.f32 %v4846_v7, %v4846_v7 }
 0x15d   :  { %v717_v48 = vpop.f32.mrf.mxu1  ;;  %v4961_v58 = vpop.f32.mrf.mxu0 }
 0x15e   :  { %6504 = vst [vmem:[#allocation32_spill] sm:$0xff] %v4961_v58  ;;  %v784_v31 = vadd.f32 %v783_v38, %v4961_v58  ;;  %v778_v0 = vadd.f32 %v777_v44, %v776_v22  ;;  %v808_v48 = vadd.f32 %v4844_v6, %v4840_v4  ;;  %v792_v38 = vadd.f32 %v791_v33, %v4834_v1 }
 0x15f   :  { %v4973_v24 = vpop.f32.mrf.mxu1  ;;  %v4975_v55 = vpop.f32.mrf.mxu0  ;;  %v882_v22 = vmul.f32 %v4850_v9, %v4850_v9  ;;  %v801_v1 = vadd.f32 %v800_v21, %v4842_v5  ;;  %v952_v4 = vadd.f32 %v876_v52, %v875_v20  ;;  %v817_v52 = vadd.f32 %v4854_v11, %v4850_v9 }
 0x160   :  { %779 = vadd.xlane.f32.xlu1 %v778_v0  ;;  %v785_v44 = vadd.f32 %v784_v31, %v4975_v55  ;;  %v786_v34 = vsel %vm749_vm1, %v4973_v24, 0.0  ;;  %v809_v46 = vadd.f32 %v808_v48, %v4846_v7  ;;  %v884_v20 = vmul.f32 %v4852_v10, %v4852_v10 }
 0x161   :  { %v722_v62 = vpop.f32.mrf.mxu1  ;;  %v4991_v2 = vpop.f32.mrf.mxu0  ;;  %v878_v5 = vmul.f32 %v4848_v8, %v4848_v8 }
 0x162   :  { %6505 = vst [vmem:[#allocation33_spill] sm:$0xff] %v4991_v2  ;;  %v793_v0 = vadd.f32 %v792_v38, %v4991_v2  ;;  %v865_v33 = vmul.f32 %v4991_v2, %v4991_v2  ;;  %v787_v31 = vadd.f32 %v786_v34, %v785_v44  ;;  %v961_v38 = vadd.f32 %v883_v3, %v882_v22 }
 0x163   :  { %v5000_v6 = vpop.f32.mrf.mxu1  ;;  %v5002_v62 = vpop.f32.mrf.mxu0  ;;  %v810_v3 = vadd.f32 %v809_v46, %v4848_v8 }
 0x164   :  { %6506 = vst [vmem:[#allocation34_spill] sm:$0xff] %v5002_v62  ;;  %788 = vadd.xlane.f32.xlu1 %v787_v31  ;;  %v794_v43 = vadd.f32 %v793_v0, %v5002_v62  ;;  %v795_v13 = vsel %vm749_vm1, %v5000_v6, 0.0  ;;  %v866_v21 = vmul.f32 %v5002_v62, %v5002_v62  ;;  %v867_v48 = vmul.f32 %v5000_v6, %v5000_v6 }
 0x165   :  { %v727_v60 = vpop.f32.mrf.mxu1  ;;  %v5015_v41 = vpop.f32.mrf.mxu0  ;;  %v937_v44 = vadd.f32 %v936_v50, %v865_v33  ;;  %v953_v62 = vadd.f32 %v952_v4, %v877_v42  ;;  %v962_v42 = vadd.f32 %v961_v38, %v884_v20  ;;  %v818_v20 = vadd.f32 %v817_v52, %v4852_v10 }
 0x166   :  { %6507 = vst [vmem:[#allocation35_spill] sm:$0xff] %v5015_v41  ;;  %v802_v34 = vadd.f32 %v801_v1, %v5015_v41  ;;  %v872_v0 = vmul.f32 %v5015_v41, %v5015_v41  ;;  %v796_v31 = vadd.f32 %v795_v13, %v794_v43  ;;  %v939_v2 = vsel %vm749_vm1, %v867_v48, 0.0 }
 0x167   :  { %v5023_v7 = vpop.f32.mrf.mxu1  ;;  %v5025_v9 = vpop.f32.mrf.mxu0  ;;  %v938_v22 = vadd.f32 %v937_v44, %v866_v21  ;;  %v885_v43 = vmul.f32 %v4856_v12, %v4856_v12  ;;  %v856_v41 = vmul.f32 %v4824_v59, %v4824_v59 }
 0x168   :  { %v874_v50 = vmul.f32 %v5023_v7, %v5023_v7  ;;  %797 = vadd.xlane.f32.xlu1 %v796_v31  ;;  %v803_v1 = vadd.f32 %v802_v34, %v5025_v9  ;;  %v804_v33 = vsel %vm749_vm1, %v5023_v7, 0.0  ;;  %v873_v4 = vmul.f32 %v5025_v9, %v5025_v9 }
 0x169   :  { %v732_v13 = vpop.f32.mrf.mxu1  ;;  %v5037_v48 = vpop.f32.mrf.mxu0  ;;  %v940_v46 = vadd.f32 %v939_v2, %v938_v22  ;;  %v946_v21 = vadd.f32 %v945_v36, %v872_v0  ;;  %v954_v36 = vadd.f32 %v953_v62, %v878_v5  ;;  %v907_v0 = vadd.f32 %v4932_v27, %v4919_v63 }
 0x16a   :  { %v811_v60 = vadd.f32 %v810_v3, %v5037_v48  ;;  %v879_v44 = vmul.f32 %v5037_v48, %v5037_v48  ;;  %v805_v34 = vadd.f32 %v804_v33, %v803_v1  ;;  %v948_v31 = vsel %vm749_vm1, %v874_v50, 0.0 }
 0x16b   :  { %941 = vadd.xlane.f32.xlu0 %v940_v46  ;;  %v5046_v38 = vpop.f32.mrf.mxu0  ;;  %v5048_v13 = vpop.f32.mrf.mxu1  ;;  %v947_v2 = vadd.f32 %v946_v21, %v873_v4  ;;  %v916_v3 = vadd.f32 %v4979_v28, %v4939_v32  ;;  %v756_v22 = vadd.f32 %v4928_v29, %v4804_v47  ;;  %v765_v50 = vadd.f32 %v4942_v53, %v4812_v51 }
 0x16c   :  { %806 = vadd.xlane.f32.xlu1 %v805_v34  ;;  %v812_v4 = vadd.f32 %v811_v60, %v5046_v38  ;;  %v880_v5 = vmul.f32 %v5046_v38, %v5046_v38  ;;  %v955_v63 = vadd.f32 %v954_v36, %v879_v44  ;;  %v881_v27 = vmul.f32 %v5048_v13, %v5048_v13 }
 0x16d   :  { %v5058_v52 = vpop.f32.mrf.mxu0  ;;  %v737_v1 = vpop.f32.mrf.mxu1  ;;  %v949_v33 = vadd.f32 %v948_v31, %v947_v2  ;;  %v813_v32 = vsel %vm749_vm1, %v5048_v13, 0.0  ;;  %v963_v53 = vadd.f32 %v962_v42, %v885_v43  ;;  %v849_v28 = vmul.f32 %v4816_v54, %v4816_v54 }
 0x16e   :  { %v886_v29 = vmul.f32 %v5058_v52, %v5058_v52  ;;  %v926_v62 = vadd.f32 %v4985_v35, %v856_v41  ;;  %v857_v46 = vmul.f32 %v4828_v61, %v4828_v61  ;;  %v819_v21 = vadd.f32 %v818_v20, %v4856_v12 }
 0x16f   :  { %950 = vadd.xlane.f32.xlu0 %v949_v33  ;;  %v5075_v60 = vpop.f32.mrf.mxu0  ;;  %v5077_v44 = vpop.f32.mrf.mxu1  ;;  %v766_v34 = vadd.f32 %v765_v50, %v4892_v37  ;;  %v858_v35 = vmul.f32 %v4961_v58, %v4961_v58  ;;  %v814_v20 = vadd.f32 %v813_v32, %v812_v4  ;;  %v956_v36 = vadd.f32 %v955_v63, %v880_v5 }
 0x170   :  { %v888_v42 = vmul.f32 %v5077_v44, %v5077_v44  ;;  %v887_v43 = vmul.f32 %v5075_v60, %v5075_v60  ;;  %v964_v31 = vadd.f32 %v963_v53, %v886_v29  ;;  %v820_v41 = vadd.f32 %v819_v21, %v5058_v52 }
 0x171   :  { %v742_v2 = vpop.f32.mrf.mxu1  ;;  %v842_v1 = vmul.f32 %v4808_v49, %v4808_v49  ;;  %v957_v50 = vsel %vm749_vm1, %v881_v27, 0.0  ;;  %v917_v59 = vadd.f32 %v916_v3, %v849_v28  ;;  %v850_v29 = vmul.f32 %v4820_v57, %v4820_v57 }
 0x172   :  { %v965_v33 = vadd.f32 %v964_v31, %v887_v43  ;;  %v966_v54 = vsel %vm749_vm1, %v888_v42, 0.0  ;;  %v757_v53 = vadd.f32 %v756_v22, %v4874_v23  ;;  %v927_v58 = vadd.f32 %v926_v62, %v857_v46 }
 0x173   :  { %815 = vadd.xlane.f32.xlu0 %v814_v20  ;;  %v851_v4 = vmul.f32 %v4925_v56, %v4925_v56  ;;  %v767_v63 = vadd.f32 %v766_v34, %v4909_v19  ;;  %v768_v27 = vsel %vm749_vm1, %v4907_v16, 0.0  ;;  %v958_v32 = vadd.f32 %v957_v50, %v956_v36 }
 0x174   :  { %v967_v5 = vadd.f32 %v966_v54, %v965_v33  ;;  %v821_v21 = vadd.f32 %v820_v41, %v5075_v60  ;;  %v859_v3 = vmul.f32 %v4975_v55, %v4975_v55  ;;  %v928_v28 = vadd.f32 %v927_v58, %v858_v35 }
 0x175   :  { %v835_v22 = vmul.f32 %v4800_v45, %v4800_v45  ;;  %v908_v62 = vadd.f32 %v907_v0, %v842_v1  ;;  %v860_v46 = vmul.f32 %v4973_v24, %v4973_v24  ;;  %v822_v54 = vsel %vm749_vm1, %v5077_v44, 0.0 }
 0x176   :  { %968 = vadd.xlane.f32.xlu1 %v967_v5  ;;  %v843_v34 = vmul.f32 %v4812_v51, %v4812_v51  ;;  %v747_v42 = vadd.f32 %v4905_v14, %v4862_v15  ;;  %v830_v58 = vmul.f32 %v4862_v15, %v4862_v15  ;;  %v918_v43 = vadd.f32 %v917_v59, %v850_v29 }
 0x177   :  { %959 = vadd.xlane.f32.xlu0 %v958_v32  ;;  %v844_v0 = vmul.f32 %v4892_v37, %v4892_v37  ;;  %v769_v31 = vadd.f32 %v768_v27, %v767_v63  ;;  %v758_v35 = vadd.f32 %v757_v53, %v4879_v26  ;;  %v759_v41 = vsel %vm749_vm1, %v4877_v25, 0.0  ;;  %v6508_v32 = vld [vmem:[#allocation31_spill] sm:$0xff] }
 0x178   :  { %v823_v20 = vadd.f32 %v822_v54, %v821_v21  ;;  %v929_v2 = vadd.f32 %v928_v28, %v859_v3  ;;  %v852_v36 = vmul.f32 %v4948_v40, %v4948_v40  ;;  %v919_v14 = vadd.f32 %v918_v43, %v851_v4 }
 0x179   :  { %v899_v1 = vadd.f32 %v4921_v30, %v835_v22  ;;  %v836_v59 = vmul.f32 %v4804_v47, %v4804_v47  ;;  %v853_v50 = vmul.f32 %v4946_v39, %v4946_v39  ;;  %v930_v33 = vsel %vm749_vm1, %v860_v46, 0.0 }
 0x17a   :  { %770 = vadd.xlane.f32.xlu1 %v769_v31  ;;  %v832_v29 = vmul.f32 %v4866_v17, %v4866_v17  ;;  %v748_v53 = vadd.f32 %v747_v42, %v4868_v18  ;;  %v750_v4 = vsel %vm749_vm1, %v4866_v17, 0.0  ;;  %v909_v5 = vadd.f32 %v908_v62, %v843_v34 }
 0x17b   :  { %824 = vadd.xlane.f32.xlu0 %v823_v20  ;;  %v837_v30 = vmul.f32 %v4874_v23, %v4874_v23  ;;  %v760_v63 = vadd.f32 %v759_v41, %v758_v35  ;;  %v831_v27 = vmul.f32 %v4868_v18, %v4868_v18  ;;  %v892_v21 = vadd.f32 %v6508_v32, %v830_v58 }
 0x17c   :  { %v931_v3 = vadd.f32 %v930_v33, %v929_v2  ;;  %v920_v28 = vadd.f32 %v919_v14, %v852_v36  ;;  %v845_v22 = vmul.f32 %v4909_v19, %v4909_v19  ;;  %v910_v46 = vadd.f32 %v909_v5, %v844_v0 }
 0x17d   :  { %v846_v54 = vmul.f32 %v4907_v16, %v4907_v16  ;;  %v921_v62 = vsel %vm749_vm1, %v853_v50, 0.0  ;;  %v900_v34 = vadd.f32 %v899_v1, %v836_v59  ;;  %v751_v42 = vadd.f32 %v750_v4, %v748_v53 }
 0x17e   :  { %761 = vadd.xlane.f32.xlu1 %v760_v63  ;;  %v893_v43 = vadd.f32 %v892_v21, %v831_v27  ;;  %v894_v31 = vsel %vm749_vm1, %v832_v29, 0.0  ;;  %v922_v35 = vadd.f32 %v921_v62, %v920_v28  ;;  %v911_v58 = vadd.f32 %v910_v46, %v845_v22 }
 0x17f   :  { %932 = vadd.xlane.f32.xlu0 %v931_v3  ;;  %v838_v41 = vmul.f32 %v4879_v26, %v4879_v26  ;;  %v901_v20 = vadd.f32 %v900_v34, %v837_v30  ;;  %v839_v0 = vmul.f32 %v4877_v25, %v4877_v25  ;;  %v912_v2 = vsel %vm749_vm1, %v846_v54, 0.0 }
 0x180   :  { %v895_v36 = vadd.f32 %v894_v31, %v893_v43  ;;  %v913_v14 = vadd.f32 %v912_v2, %v911_v58  ;;  %v3892_v33 = vmov 0  }
 0x181   :  { %v902_v1 = vadd.f32 %v901_v20, %v838_v41  ;;  %v903_v59 = vsel %vm749_vm1, %v839_v0, 0.0  ;;  %3836 = vset.pattern.permute.xlu0 %v3892_v33  ;;  %3835 = vset.pattern.permute.xlu1 %v3892_v33 }
 0x182   :  { %752 = vadd.xlane.f32.xlu1 %v751_v42 }
 0x183   :  { %923 = vadd.xlane.f32.xlu0 %v922_v35  ;;  %v904_v50 = vadd.f32 %v903_v59, %v902_v1 }
 0x186   :  { %896 = vadd.xlane.f32.xlu1 %v895_v36 }
 0x187   :  { %914 = vadd.xlane.f32.xlu0 %v913_v14 }
 0x18b   :  { %905 = vadd.xlane.f32.xlu0 %v904_v50 }
 0x1e9   :  { %v780_v29 = vpop.xlane.xlu1 %779 }
 0x1ea   :  { %v5161_v41 = vmul.f32 0.0012755102, %v780_v29 }
 0x1ed   :  { %v789_v53 = vpop.xlane.xlu1 %788 }
 0x1ee   :  { %v5155_v34 = vmul.f32 0.0012755102, %v789_v53 }
 0x1f0   :  { %v992_v36 = vmul.f32 %v5155_v34, %v5155_v34 }
 0x1f1   :  { %v798_v5 = vpop.xlane.xlu1 %797 }
 0x1f2   :  { %v5149_v32 = vmul.f32 0.0012755102, %v798_v5 }
 0x1f4   :  { %v942_v4 = vpop.xlane.xlu0 %941  ;;  %v993_v28 = vmul.f32 %v5149_v32, %v5149_v32 }
 0x1f5   :  { %v807_v63 = vpop.xlane.xlu1 %806  ;;  %v984_v22 = vmul.f32 0.0012755102, %v942_v4  ;;  %v991_v4 = vmul.f32 %v5161_v41, %v5161_v41 }
 0x1f6   :  { %v5153_v54 = vmul.f32 0.0012755102, %v807_v63 }
 0x1f7   :  { %v1002_v43 = vsub.f32 %v984_v22, %v993_v28 }
 0x1f8   :  { %v951_v30 = vpop.xlane.xlu0 %950  ;;  %v994_v20 = vmul.f32 %v5153_v54, %v5153_v54 }
 0x1f9   :  { %v985_v0 = vmul.f32 0.0012755102, %v951_v30  ;;  %v1011_v59 = vadd.f32 0.001, %v1002_v43 }
 0x1fb   :  { %v1003_v5 = vsub.f32 %v985_v0, %v994_v20 }
 0x1fc   :  { %v816_v27 = vpop.xlane.xlu0 %815 }
 0x1fd   :  { %v5173_v22 = vmul.f32 0.0012755102, %v816_v27 }
 0x1ff   :  { %v969_v21 = vpop.xlane.xlu1 %968  ;;  %v995_v27 = vmul.f32 %v5173_v22, %v5173_v22 }
 0x200   :  { %v960_v3 = vpop.xlane.xlu0 %959  ;;  %v987_v31 = vmul.f32 0.0012755102, %v969_v21 }
 0x203   :  { %v771_v46 = vpop.xlane.xlu1 %770 }
 0x204   :  { %v825_v62 = vpop.xlane.xlu0 %824  ;;  %v5171_v21 = vmul.f32 0.0012755102, %v771_v46 }
 0x205   :  { %v5157_v42 = vmul.f32 0.0012755102, %v825_v62 }
 0x206   :  { %v990_v46 = vmul.f32 %v5171_v21, %v5171_v21 }
 0x207   :  { %v996_v35 = vmul.f32 %v5157_v42, %v5157_v42  ;;  %v762_v58 = vpop.xlane.xlu1 %761 }
 0x208   :  { %v933_v2 = vpop.xlane.xlu0 %932 }
 0x209   :  { %v1005_v14 = vsub.f32 %v987_v31, %v996_v35  ;;  %v983_v1 = vmul.f32 0.0012755102, %v933_v2  ;;  %v1012_v31 = vadd.f32 0.001, %v1003_v5  ;;  %v986_v35 = vmul.f32 0.0012755102, %v960_v3 }
 0x20b   :  { %v1014_v50 = vadd.f32 0.001, %v1005_v14  ;;  %v1001_v33 = vsub.f32 %v983_v1, %v992_v36  ;;  %v753_v53 = vpop.xlane.xlu1 %752  ;;  %v5179_v36 = vmul.f32 0.0012755102, %v762_v58  ;;  %v1004_v3 = vsub.f32 %v986_v35, %v995_v27 }
 0x20c   :  { %v5169_v29 = vmul.f32 0.0012755102, %v753_v53  ;;  %v924_v63 = vpop.xlane.xlu0 %923 }
 0x20d   :  { %3837 = vrsqrt.f32 %v1014_v50  ;;  %v1010_v30 = vadd.f32 0.001, %v1001_v33  ;;  %v982_v28 = vmul.f32 0.0012755102, %v924_v63  ;;  %v989_v53 = vmul.f32 %v5179_v36, %v5179_v36 }
 0x20e   :  { %3839 = vrsqrt.f32 %v1011_v59  ;;  %v988_v2 = vmul.f32 %v5169_v29, %v5169_v29 }
 0x20f   :  { %3841 = vrsqrt.f32 %v1010_v30  ;;  %v1000_v62 = vsub.f32 %v982_v28, %v991_v4  ;;  %v897_v43 = vpop.xlane.xlu1 %896  ;;  %v1032_v30 = vld [vmem:[%s6441_s2 + $0x40] sm:$0xff]  ;;  %v1013_v28 = vadd.f32 0.001, %v1004_v3  ;;  %v1030_v3 = vld [vmem:[%s6441_s2 + $0x30] sm:$0xff] }
 0x210   :  { %v979_v20 = vmul.f32 0.0012755102, %v897_v43  ;;  %v915_v0 = vpop.xlane.xlu0 %914 }
 0x211   :  { %v1009_v14 = vadd.f32 0.001, %v1000_v62  ;;  %v981_v1 = vmul.f32 0.0012755102, %v915_v0 }
 0x212   :  { %v997_v59 = vsub.f32 %v979_v20, %v988_v2 }
 0x213   :  { %3843 = vrsqrt.f32 %v1009_v14  ;;  %v999_v50 = vsub.f32 %v981_v1, %v990_v46  ;;  %v1029_v46 = vld [vmem:[%s6441_s2 + $0x28] sm:$0xff]  ;;  %v1027_v14 = vld [vmem:[%s6441_s2 + $0x18] sm:$0xff] }
 0x214   :  { %3845 = vrsqrt.f32 %v1012_v31  ;;  %v906_v33 = vpop.xlane.xlu0 %905  ;;  %v1006_v4 = vadd.f32 0.001, %v997_v59  ;;  %v1028_v31 = vld [vmem:[%s6441_s2 + $0x20] sm:$0xff] }
 0x215   :  { %v1008_v5 = vadd.f32 0.001, %v999_v50  ;;  %v980_v63 = vmul.f32 0.0012755102, %v906_v33  ;;  %v1026_v33 = vld [vmem:[%s6441_s2 + $0x10] sm:$0xff] }
 0x217   :  { %3847 = vrsqrt.f32 %v1008_v5  ;;  %v998_v58 = vsub.f32 %v980_v63, %v989_v53 }
 0x218   :  { %3849 = vrsqrt.f32 %v1006_v4 }
 0x219   :  { %v1007_v62 = vadd.f32 0.001, %v998_v58 }
 0x21a   :  { %v3838_v43 = vpop.eup %3837 }
 0x21b   :  { %v3840_v35 = vpop.eup %3839  ;;  %v1041_v2 = vmul.f32 %v3838_v43, %v1032_v30  ;;  %3851 = vrsqrt.f32 %v1007_v62  ;;  %v1047_v30 = vld [vmem:[%s6442_s3 + $0x28] sm:$0xff]  ;;  %v1024_v62 = vld [vmem:[%s6441_s2] sm:$0xff] }
 0x21c   :  { %v3842_v20 = vpop.eup %3841  ;;  %3853 = vrsqrt.f32 %v1013_v28  ;;  %v1038_v59 = vmul.f32 %v3840_v35, %v1029_v46  ;;  %v1025_v28 = vld [vmem:[%s6441_s2 + $0x8] sm:$0xff]  ;;  %v1031_v46 = vld [vmem:[%s6441_s2 + $0x38] sm:$0xff] }
 0x21d   :  { %1111 = vperm.xlu0 %3836, %v1041_v2   ;;  %v1037_v0 = vmul.f32 %v3842_v20, %v1028_v31 }
 0x21e   :  { %v1056_v63 = vmul.f32 %v1038_v59, %v5149_v32 }
 0x21f   :  { %1091 = vperm.xlu1 %3835, %v1037_v0  }
 0x220   :  { %v3844_v1 = vpop.eup %3843  ;;  %v1065_v31 = vsub.f32 %v1047_v30, %v1056_v63 }
 0x221   :  { %v3846_v27 = vpop.eup %3845  ;;  %v1036_v50 = vmul.f32 %v3844_v1, %v1027_v14 }
 0x222   :  { %v1039_v4 = vmul.f32 %v3846_v27, %v1030_v3  ;;  %v1042_v3 = vld [vmem:[%s6442_s3] sm:$0xff] }
 0x223   :  { %1096 = vperm.xlu1 %3835, %v1038_v59   ;;  %1086 = vperm.xlu0 %3836, %v1036_v50   ;;  %v1048_v59 = vld [vmem:[%s6442_s3 + $0x30] sm:$0xff] }
 0x224   :  { %v3848_v53 = vpop.eup %3847  ;;  %v1057_v1 = vmul.f32 %v1039_v4, %v5153_v54  ;;  %v1049_v54 = vld [vmem:[%s6442_s3 + $0x38] sm:$0xff] }
 0x225   :  { %v1035_v5 = vmul.f32 %v3848_v53, %v1026_v33  ;;  %v3850_v58 = vpop.eup %3849 }
 0x226   :  { %v1033_v20 = vmul.f32 %v3850_v58, %v1024_v62  ;;  %v1066_v33 = vsub.f32 %v1048_v59, %v1057_v1  ;;  %v1050_v58 = vld [vmem:[%s6442_s3 + $0x40] sm:$0xff] }
 0x227   :  { %1101 = vperm.xlu1 %3835, %v1039_v4   ;;  %1081 = vperm.xlu0 %3836, %v1035_v5  }
 0x228   :  { %v3852_v43 = vpop.eup %3851  ;;  %v1051_v27 = vmul.f32 %v1033_v20, %v5169_v29  ;;  %v1059_v29 = vmul.f32 %v1041_v2, %v5157_v42  ;;  %v1045_v42 = vld [vmem:[%s6442_s3 + $0x18] sm:$0xff] }
 0x229   :  { %v1034_v35 = vmul.f32 %v3852_v43, %v1025_v28  ;;  %v3854_v32 = vpop.eup %3853  ;;  %v1055_v28 = vmul.f32 %v1037_v0, %v5155_v34  ;;  %v1054_v43 = vmul.f32 %v1036_v50, %v5161_v41  ;;  %v1044_v34 = vld [vmem:[%s6442_s3 + $0x10] sm:$0xff]  ;;  %v1043_v41 = vld [vmem:[%s6442_s3 + $0x8] sm:$0xff] }
 0x22a   :  { %v1040_v14 = vmul.f32 %v3854_v32, %v1031_v46  ;;  %v1060_v53 = vsub.f32 %v1042_v3, %v1051_v27  ;;  %v1068_v30 = vsub.f32 %v1050_v58, %v1059_v29 }
 0x22b   :  { %1204 = vperm.xlu1 %3835, %v1065_v31   ;;  %1076 = vperm.xlu0 %3836, %v1034_v35   ;;  %v1063_v2 = vsub.f32 %v1045_v42, %v1054_v43  ;;  %v1053_v31 = vmul.f32 %v1035_v5, %v5171_v21  ;;  %v6510_v42 = vld [vmem:[#allocation28_spill] sm:$0xff] }
 0x22c   :  { %v1058_v63 = vmul.f32 %v1040_v14, %v5173_v22  ;;  %v1046_v22 = vld [vmem:[%s6442_s3 + $0x20] sm:$0xff] }
 0x22d   :  { %v1064_v62 = vsub.f32 %v1046_v22, %v1055_v28  ;;  %v1062_v0 = vsub.f32 %v1044_v34, %v1053_v31  ;;  %v6509_v22 = vld [vmem:[#allocation30_spill] sm:$0xff] }
 0x22e   :  { %v1067_v4 = vsub.f32 %v1049_v54, %v1058_v63  ;;  %v6511_v31 = vld [vmem:[#allocation26_spill] sm:$0xff] }
 0x22f   :  { %1106 = vperm.xlu1 %3835, %v1040_v14   ;;  %1071 = vperm.xlu0 %3836, %v1033_v20   ;;  %v1052_v20 = vmul.f32 %v1034_v35, %v5179_v36 }
 0x231   :  { %v1061_v50 = vsub.f32 %v1043_v41, %v1052_v20 }
 0x233   :  { %1209 = vperm.xlu1 %3835, %v1066_v33   ;;  %1179 = vperm.xlu0 %3836, %v1060_v53  }
 0x237   :  { %1214 = vperm.xlu1 %3835, %v1067_v4  }
 0x23b   :  { %1219 = vperm.xlu1 %3835, %v1068_v30  }
 0x23f   :  { %1199 = vperm.xlu1 %3835, %v1064_v62  }
 0x243   :  { %1194 = vperm.xlu1 %3835, %v1063_v2  }
 0x247   :  { %1189 = vperm.xlu1 %3835, %v1062_v0  }
 0x24b   :  { %1184 = vperm.xlu1 %3835, %v1061_v50  }
 0x298   :  { %v5248_v32 = vpop.permute.xlu0 %1111 }
 0x29a   :  { %v5250_v46 = vpop.permute.xlu1 %1091 }
 0x29e   :  { %v5252_v21 = vpop.permute.xlu1 %1096  ;;  %v5254_v5 = vpop.permute.xlu0 %1086 }
 0x29f   :  { %v1155_v27 = vmul.f32 %v5252_v21, %v5000_v6 }
 0x2a2   :  { %v5256_v14 = vpop.permute.xlu1 %1101  ;;  %v5258_v1 = vpop.permute.xlu0 %1081 }
 0x2a3   :  { %v1162_v54 = vmul.f32 %v5256_v14, %v5023_v7  ;;  %v1171_v7 = vmul.f32 %v5248_v32, %v4854_v11  ;;  %v6512_v11 = vld [vmem:[#allocation24_spill] sm:$0xff] }
 0x2a4   :  { %v1157_v20 = vmul.f32 %v5256_v14, %v6512_v11  ;;  %v6517_v11 = vld [vmem:[#allocation15_spill] sm:$0xff] }
 0x2a6   :  { %v5260_v36 = vpop.permute.xlu1 %1204  ;;  %v5262_v35 = vpop.permute.xlu0 %1076 }
 0x2a7   :  { %v5271_v33 = vadd.f32 %v5260_v36, %v1155_v27  ;;  %v6513_v27 = vld [vmem:[#allocation21_spill] sm:$0xff] }
 0x2aa   :  { %v5266_v59 = vpop.permute.xlu1 %1106  ;;  %v5268_v3 = vpop.permute.xlu0 %1071 }
 0x2ab   :  { %v1120_v29 = vmul.f32 %v5268_v3, %v4866_v17  ;;  %v1169_v6 = vmul.f32 %v5266_v59, %v5048_v13  ;;  %v1170_v17 = vmul.f32 %v5248_v32, %v6509_v22  ;;  %v1164_v2 = vmul.f32 %v5266_v59, %v6510_v42 }
 0x2ac   :  { %v1163_v34 = vmul.f32 %v5266_v59, %v6511_v31  ;;  %v1148_v22 = vmul.f32 %v5250_v46, %v4973_v24 }
 0x2ae   :  { %v5273_v53 = vpop.permute.xlu1 %1209  ;;  %v5275_v63 = vpop.permute.xlu0 %1179 }
 0x2af   :  { %v5286_v58 = vadd.f32 %v5273_v53, %v1162_v54  ;;  %v5289_v30 = vadd.f32 %v5275_v63, %v1120_v29  ;;  %v1156_v54 = vmul.f32 %v5256_v14, %v6513_v27  ;;  %v1265_v29 = vadd.f32 %v5273_v53, %v1157_v20  ;;  %v6518_v27 = vld [vmem:[#allocation14_spill] sm:$0xff] }
 0x2b0   :  { %v1142_v20 = vmul.f32 %v5250_v46, %v6517_v11 }
 0x2b2   :  { %v5281_v4 = vpop.permute.xlu1 %1214 }
 0x2b3   :  { %v5292_v28 = vadd.f32 %v5281_v4, %v1169_v6  ;;  %v1272_v0 = vadd.f32 %v5281_v4, %v1164_v2  ;;  %v1271_v50 = vadd.f32 %v5281_v4, %v1163_v34  ;;  %v6514_v6 = vld [vmem:[#allocation20_spill] sm:$0xff]  ;;  %v6516_v2 = vld [vmem:[#allocation17_spill] sm:$0xff] }
 0x2b4   :  { %v1143_v31 = vmul.f32 %v5250_v46, %v6516_v2 }
 0x2b6   :  { %v5298_v62 = vpop.permute.xlu1 %1219 }
 0x2b7   :  { %v1279_v43 = vadd.f32 %v5298_v62, %v1171_v7  ;;  %v1278_v13 = vadd.f32 %v5298_v62, %v1170_v17  ;;  %v1150_v7 = vmul.f32 %v5252_v21, %v6514_v6  ;;  %v1264_v17 = vadd.f32 %v5273_v53, %v1156_v54 }
 0x2b8   :  { %v1136_v54 = vmul.f32 %v5254_v5, %v6518_v27  ;;  %v6522_v27 = vld [vmem:[#allocation9_spill] sm:$0xff] }
 0x2b9   :  { %1516 = vmatprep.subr.mxu0 %v1279_v43  ;;  %3812 = vmatprep.subr.mxu1 %v1279_v43  ;;  %v6515_v43 = vld [vmem:[#allocation18_spill] sm:$0xff]  ;;  %v1258_v42 = vadd.f32 %v5260_v36, %v1150_v7  ;;  %v6519_v7 = vld [vmem:[#allocation13_spill] sm:$0xff] }
 0x2ba   :  { %v5309_v41 = vpop.permute.xlu1 %1199  ;;  %1517 = vmatpush1.msra.mxu0 %v1278_v13  ;;  %3821 = vmatpush1.msra.mxu1 %v1278_v13  ;;  %v1149_v13 = vmul.f32 %v5252_v21, %v6515_v43 }
 0x2bb   :  { %1518 = vmatprep.subr.mxu0 %v1272_v0  ;;  %3813 = vmatprep.subr.mxu1 %v1272_v0  ;;  %v5326_v34 = vadd.f32 %v5309_v41, %v1148_v22  ;;  %v1250_v6 = vadd.f32 %v5309_v41, %v1142_v20  ;;  %v1135_v22 = vmul.f32 %v5254_v5, %v6519_v7 }
 0x2bc   :  { %1519 = vmatpush1.msra.mxu0 %v1271_v50  ;;  %3822 = vmatpush1.msra.mxu1 %v1271_v50  ;;  %v1257_v24 = vadd.f32 %v5260_v36, %v1149_v13  ;;  %v1251_v50 = vadd.f32 %v5309_v41, %v1143_v31 }
 0x2bd   :  { %1520 = vmatprep.subr.mxu0 %v1265_v29  ;;  %3814 = vmatprep.subr.mxu1 %v1265_v29  ;;  %v1141_v29 = vmul.f32 %v5254_v5, %v4946_v39 }
 0x2be   :  { %v5328_v0 = vpop.permute.xlu1 %1194  ;;  %1521 = vmatpush1.msra.mxu0 %v1264_v17  ;;  %3823 = vmatpush1.msra.mxu1 %v1264_v17  ;;  %v6520_v17 = vld [vmem:[#allocation12_spill] sm:$0xff] }
 0x2bf   :  { %1522 = vmatprep.subr.mxu0 %v1258_v42  ;;  %3815 = vmatprep.subr.mxu1 %v1258_v42  ;;  %v1129_v43 = vmul.f32 %v5258_v1, %v6520_v17  ;;  %v1244_v13 = vadd.f32 %v5328_v0, %v1136_v54  ;;  %v6521_v42 = vld [vmem:[#allocation11_spill] sm:$0xff]  ;;  %v5347_v31 = vadd.f32 %v5328_v0, %v1141_v29  ;;  %v6523_v29 = vld [vmem:[#allocation8_spill] sm:$0xff] }
 0x2c0   :  { %1523 = vmatpush1.msra.mxu0 %v1257_v24  ;;  %3824 = vmatpush1.msra.mxu1 %v1257_v24  ;;  %v1128_v2 = vmul.f32 %v5258_v1, %v6521_v42  ;;  %v1243_v24 = vadd.f32 %v5328_v0, %v1135_v22  ;;  %v1122_v54 = vmul.f32 %v5262_v35, %v6522_v27 }
 0x2c1   :  { %1524 = vmatprep.subr.mxu0 %v1251_v50  ;;  %3816 = vmatprep.subr.mxu1 %v1251_v50  ;;  %v1134_v50 = vmul.f32 %v5258_v1, %v4907_v16  ;;  %v1127_v16 = vmul.f32 %v5262_v35, %v4877_v25  ;;  %v1172_v27 = vmul.f32 %v5248_v32, %v4852_v10 }
 0x2c2   :  { %v5349_v39 = vpop.permute.xlu1 %1189  ;;  %1525 = vmatpush1.msra.mxu0 %v1250_v6  ;;  %3825 = vmatpush1.msra.mxu1 %v1250_v6  ;;  %v1121_v6 = vmul.f32 %v5262_v35, %v6523_v29  ;;  %v1174_v29 = vmul.f32 %v5248_v32, %v5058_v52 }
 0x2c3   :  { %1526 = vmatprep.subr.mxu0 %v1244_v13  ;;  %3817 = vmatprep.subr.mxu1 %v1244_v13  ;;  %v1237_v11 = vadd.f32 %v5349_v39, %v1129_v43  ;;  %v1236_v20 = vadd.f32 %v5349_v39, %v1128_v2  ;;  %v5361_v7 = vadd.f32 %v5349_v39, %v1134_v50  ;;  %v6524_v13 = vld [vmem:[#allocation6_spill] sm:$0xff]  ;;  %v6525_v2 = vld [vmem:[#allocation5_spill] sm:$0xff] }
 0x2c4   :  { %1527 = vmatpush1.msra.mxu0 %v1243_v24  ;;  %3826 = vmatpush1.msra.mxu1 %v1243_v24  ;;  %v1115_v42 = vmul.f32 %v5268_v3, %v6524_v13  ;;  %v1114_v24 = vmul.f32 %v5268_v3, %v6525_v2  ;;  %v1168_v13 = vmul.f32 %v5266_v59, %v5046_v38 }
 0x2c5   :  { %1528 = vmatprep.subr.mxu0 %v1237_v11  ;;  %3818 = vmatprep.subr.mxu1 %v1237_v11  ;;  %v1173_v11 = vmul.f32 %v5248_v32, %v4856_v12  ;;  %v5387_v12 = vld [vmem:[%s6443_s4 + $0x148] sm:$0xff]  ;;  %v1282_v2 = vadd.f32 %v5298_v62, %v1174_v29  ;;  %v1167_v38 = vmul.f32 %v5266_v59, %v5037_v48  ;;  %v6529_v48 = vld [vmem:[#allocation25_spill] sm:$0xff] }
 0x2c6   :  { %v5363_v22 = vpop.permute.xlu1 %1184  ;;  %1529 = vmatpush1.msra.mxu0 %v1236_v20  ;;  %3827 = vmatpush1.msra.mxu1 %v1236_v20  ;;  %v1223_v25 = vadd.f32 %v5275_v63, %v1115_v42  ;;  %v1175_v20 = vmul.f32 %v5248_v32, %v5075_v60  ;;  %v5397_v60 = vld [vmem:[%s6443_s4] sm:$0xff]  ;;  %v1280_v42 = vadd.f32 %v5298_v62, %v1172_v27 }
 0x2c7   :  { %v1230_v17 = vadd.f32 %v5363_v22, %v1122_v54  ;;  %v1229_v43 = vadd.f32 %v5363_v22, %v1121_v6  ;;  %v5376_v50 = vadd.f32 %v5363_v22, %v1127_v16  ;;  %v1222_v54 = vadd.f32 %v5275_v63, %v1114_v24  ;;  %v6526_v16 = vld [vmem:[#allocation23_spill] sm:$0xff]  ;;  %v6527_v24 = vld [vmem:[#allocation29_spill] sm:$0xff] }
 0x2c8   :  { %v1145_v6 = vmul.f32 %v5250_v46, %v4828_v61  ;;  %v1281_v10 = vadd.f32 %v5298_v62, %v1173_v11  ;;  %v1283_v52 = vadd.f32 %v5298_v62, %v1175_v20  ;;  %v1166_v61 = vmul.f32 %v5266_v59, %v4848_v8  ;;  %v5424_v20 = vld [vmem:[%s6443_s4 + $0x150] sm:$0xff]  ;;  %v6528_v27 = vld [vmem:[#allocation27_spill] sm:$0xff] }
 0x2c9   :  { %1530 = vmatprep.subr.mxu0 %v1230_v17  ;;  %3819 = vmatprep.subr.mxu1 %v1230_v17  ;;  %v1152_v17 = vmul.f32 %v5252_v21, %v6526_v16  ;;  %v1276_v11 = vadd.f32 %v5281_v4, %v1168_v13  ;;  %v1161_v29 = vmul.f32 %v5256_v14, %v5025_v9  ;;  %v6530_v16 = vld [vmem:[#allocation35_spill] sm:$0xff] }
 0x2ca   :  { %1531 = vmatpush1.msra.mxu0 %v1229_v43  ;;  %3828 = vmatpush1.msra.mxu1 %v1229_v43  ;;  %v1147_v43 = vmul.f32 %v5250_v46, %v4975_v55  ;;  %v1165_v55 = vmul.f32 %v5266_v59, %v6527_v24  ;;  %v1274_v8 = vadd.f32 %v5281_v4, %v1166_v61  ;;  %v6531_v61 = vmov 0.0  }
 0x2cb   :  { %1532 = vmatprep.subr.mxu0 %v1223_v25  ;;  %3820 = vmatprep.subr.mxu1 %v1223_v25  ;;  %v1158_v59 = vmul.f32 %v5256_v14, %v6529_v48 }
 0x2cc   :  { %1533 = vmatpush1.msra.mxu0 %v1222_v54  ;;  %3829 = vmatpush1.msra.mxu1 %v1222_v54  ;;  %v1273_v25 = vadd.f32 %v5281_v4, %v1165_v55  ;;  %v1159_v54 = vmul.f32 %v5256_v14, %v6528_v27  ;;  %v6533_v55 = vld [vmem:[#allocation22_spill] sm:$0xff] }
 0x2cd   :  { %3475 = vmatmul.mubr.msk.f32.vlgmr.msra.gmra.mxu1 %vm1339_vm2, %v5387_v12  ;;  %1905 = vmatprep.subr.mxu1 %v1281_v10  ;;  %v1275_v10 = vadd.f32 %v5281_v4, %v1167_v38  ;;  %v1266_v4 = vadd.f32 %v5273_v53, %v1158_v59  ;;  %v6534_v38 = vld [vmem:[#allocation33_spill] sm:$0xff]  ;;  %v1140_v59 = vmul.f32 %v5254_v5, %v4948_v40 }
 0x2ce   :  { %2294 = vmatprep.subr.mxu0 %v1283_v52  ;;  %3434 = vmatmul.mubr.msk.f32.vlgmr.msra.gmra.mxu0 %vm1339_vm2, %v5397_v60  ;;  %v1160_v52 = vmul.f32 %v5256_v14, %v6530_v16  ;;  %v1267_v13 = vadd.f32 %v5273_v53, %v1159_v54  ;;  %v1151_v14 = vmul.f32 %v5252_v21, %v6533_v55  ;;  %v6535_v54 = vld [vmem:[#allocation19_spill] sm:$0xff] }
 0x2cf   :  { %1906 = vmatpush1.msra.mxu1 %v1280_v42  ;;  %2295 = vmatpush1.msra.mxu0 %v1282_v2  ;;  %v1269_v42 = vadd.f32 %v5273_v53, %v1161_v29  ;;  %v6532_v2 = vld [vmem:[#allocation34_spill] sm:$0xff]  ;;  %v1144_v29 = vmul.f32 %v5250_v46, %v6535_v54  ;;  %v1253_v16 = vadd.f32 %v5309_v41, %v1145_v6 }
 0x2d0   :  { %1907 = vmatprep.subr.mxu1 %v1274_v8  ;;  %2296 = vmatprep.subr.mxu0 %v1276_v11  ;;  %v1154_v9 = vmul.f32 %v5252_v21, %v6532_v2  ;;  %v1268_v24 = vadd.f32 %v5273_v53, %v1160_v52  ;;  %v1260_v8 = vadd.f32 %v5260_v36, %v1152_v17  ;;  %v5454_v53 = vld [vmem:[%s6443_s4 + $0x158] sm:$0xff] }
 0x2d1   :  { %1818 = vmatprep.mubr.f32.mxu1 %v6531_v61  ;;  %1908 = vmatpush1.msra.mxu1 %v1273_v25  ;;  %v1153_v25 = vmul.f32 %v5252_v21, %v6534_v38  ;;  %v1259_v27 = vadd.f32 %v5260_v36, %v1151_v14  ;;  %v1138_v21 = vmul.f32 %v5254_v5, %v4820_v57 }
 0x2d2   :  { %2297 = vmatpush1.msra.mxu0 %v1275_v10  ;;  %3476 = vmatmul.mubr.msk.f32.gmra.mxu1 %vm1339_vm2, %v5424_v20  ;;  %v1262_v11 = vadd.f32 %v5260_v36, %v1154_v9  ;;  %v6536_v10 = vld [vmem:[#allocation32_spill] sm:$0xff]  ;;  %v1255_v52 = vadd.f32 %v5309_v41, %v1147_v43  ;;  %v1139_v40 = vmul.f32 %v5254_v5, %v4925_v56 }
 0x2d3   :  { %1909 = vmatprep.subr.mxu1 %v1267_v13  ;;  %2298 = vmatprep.subr.mxu0 %v1269_v42  ;;  %v1146_v17 = vmul.f32 %v5250_v46, %v6536_v10  ;;  %v1261_v48 = vadd.f32 %v5260_v36, %v1153_v25  ;;  %v6537_v13 = vld [vmem:[#allocation16_spill] sm:$0xff]  ;;  %v1252_v36 = vadd.f32 %v5309_v41, %v1144_v29  ;;  %v5577_v10 = vld [vmem:[%s6443_s4 + $0x180] sm:$0xff] }
 0x2d4   :  { %1910 = vmatpush1.msra.mxu1 %v1266_v4  ;;  %2299 = vmatpush1.msra.mxu0 %v1268_v24  ;;  %v1137_v46 = vmul.f32 %v5254_v5, %v6537_v13  ;;  %v1246_v6 = vadd.f32 %v5328_v0, %v1138_v21  ;;  %v1248_v43 = vadd.f32 %v5328_v0, %v1140_v59  ;;  %v5603_v21 = vld [vmem:[%s6443_s4 + $0x28] sm:$0xff]  ;;  %v5609_v59 = vld [vmem:[%s6443_s4 + $0x190] sm:$0xff]  ;;  %v5635_v13 = vld [vmem:[%s6443_s4 + $0x38] sm:$0xff] }
 0x2d5   :  { %1911 = vmatprep.subr.mxu1 %v1260_v8  ;;  %2300 = vmatprep.subr.mxu0 %v1262_v11  ;;  %v1254_v57 = vadd.f32 %v5309_v41, %v1146_v17  ;;  %v1131_v42 = vmul.f32 %v5258_v1, %v4812_v51  ;;  %v5484_v41 = vld [vmem:[%s6443_s4 + $0x160] sm:$0xff]  ;;  %v1133_v56 = vmul.f32 %v5258_v1, %v4909_v19  ;;  %v6538_v8 = vld [vmem:[#allocation10_spill] sm:$0xff] }
 0x2d6   :  { %1824 = vmatprep.mubr.f32.mxu1 %v6531_v61  ;;  %1912 = vmatpush1.msra.mxu1 %v1259_v27  ;;  %v1245_v2 = vadd.f32 %v5328_v0, %v1137_v46  ;;  %v1130_v5 = vmul.f32 %v5258_v1, %v4808_v49  ;;  %v1247_v9 = vadd.f32 %v5328_v0, %v1139_v40  ;;  %v5587_v17 = vld [vmem:[%s6443_s4 + $0x20] sm:$0xff]  ;;  %v5667_v40 = vld [vmem:[%s6443_s4 + $0x48] sm:$0xff] }
 0x2d7   :  { %2301 = vmatpush1.msra.mxu0 %v1261_v48  ;;  %3477 = vmatmul.mubr.msk.f32.gmra.mxu1 %vm1339_vm2, %v5454_v53  ;;  %v1132_v51 = vmul.f32 %v5258_v1, %v4892_v37  ;;  %v1124_v4 = vmul.f32 %v5262_v35, %v4804_v47  ;;  %v1239_v24 = vadd.f32 %v5349_v39, %v1131_v42  ;;  %v5593_v48 = vld [vmem:[%s6443_s4 + $0x188] sm:$0xff]  ;;  %v5641_v46 = vld [vmem:[%s6443_s4 + $0x1a0] sm:$0xff] }
 0x2d8   :  { %1913 = vmatprep.subr.mxu1 %v1253_v16  ;;  %2302 = vmatprep.subr.mxu0 %v1255_v52  ;;  %v1241_v19 = vadd.f32 %v5349_v39, %v1133_v56  ;;  %v1126_v49 = vmul.f32 %v5262_v35, %v4879_v26  ;;  %v1238_v0 = vadd.f32 %v5349_v39, %v1130_v5  ;;  %v5619_v16 = vld [vmem:[%s6443_s4 + $0x30] sm:$0xff]  ;;  %v5625_v52 = vld [vmem:[%s6443_s4 + $0x198] sm:$0xff]  ;;  %v5802_v42 = vld [vmem:[%s6443_s4 + $0xa0] sm:$0xff] }
 0x2d9   :  { %1914 = vmatpush1.msra.mxu1 %v1252_v36  ;;  %2303 = vmatpush1.msra.mxu0 %v1254_v57  ;;  %v1240_v37 = vadd.f32 %v5349_v39, %v1132_v51  ;;  %v1123_v47 = vmul.f32 %v5262_v35, %v4800_v45  ;;  %v1232_v1 = vadd.f32 %v5363_v22, %v1124_v4  ;;  %v5514_v39 = vld [vmem:[%s6443_s4 + $0x168] sm:$0xff]  ;;  %v5651_v36 = vld [vmem:[%s6443_s4 + $0x40] sm:$0xff]  ;;  %v5824_v56 = vld [vmem:[%s6443_s4 + $0xb0] sm:$0xff] }
 0x2da   :  { %1915 = vmatprep.subr.mxu1 %v1246_v6  ;;  %2304 = vmatprep.subr.mxu0 %v1248_v43  ;;  %v1234_v55 = vadd.f32 %v5363_v22, %v1126_v49  ;;  %v1125_v26 = vmul.f32 %v5262_v35, %v4874_v23  ;;  %v1117_v45 = vmul.f32 %v5268_v3, %v6538_v8  ;;  %v6539_v23 = vld [vmem:[#allocation7_spill] sm:$0xff]  ;;  %v5657_v57 = vld [vmem:[%s6443_s4 + $0x1a8] sm:$0xff]  ;;  %v5678_v6 = vld [vmem:[%s6443_s4 + $0x50] sm:$0xff] }
 0x2db   :  { %1830 = vmatprep.mubr.f32.mxu1 %v6531_v61  ;;  %1916 = vmatpush1.msra.mxu1 %v1245_v2  ;;  %v1231_v14 = vadd.f32 %v5363_v22, %v1123_v47  ;;  %v1119_v11 = vmul.f32 %v5268_v3, %v4868_v18  ;;  %v1116_v35 = vmul.f32 %v5268_v3, %v6539_v23  ;;  %v5690_v43 = vld [vmem:[%s6443_s4 + $0x58] sm:$0xff]  ;;  %v5813_v2 = vld [vmem:[%s6443_s4 + $0xa8] sm:$0xff]  ;;  %v5868_v4 = vld [vmem:[%s6443_s4 + $0xd0] sm:$0xff] }
 0x2dc   :  { %2305 = vmatpush1.msra.mxu0 %v1247_v9  ;;  %3478 = vmatmul.mubr.msk.f32.gmra.mxu1 %vm1339_vm2, %v5484_v41  ;;  %v1233_v38 = vadd.f32 %v5363_v22, %v1125_v26  ;;  %v1118_v25 = vmul.f32 %v5268_v3, %v4862_v15  ;;  %v1225_v27 = vadd.f32 %v5275_v63, %v1117_v45  ;;  %v5538_v3 = vld [vmem:[%s6443_s4 + $0x8] sm:$0xff]  ;;  %v5835_v5 = vld [vmem:[%s6443_s4 + $0xb8] sm:$0xff]  ;;  %v5846_v9 = vld [vmem:[%s6443_s4 + $0xc0] sm:$0xff] }
 0x2dd   :  { %1917 = vmatprep.subr.mxu1 %v1239_v24  ;;  %2306 = vmatprep.subr.mxu0 %v1241_v19  ;;  %v1227_v54 = vadd.f32 %v5275_v63, %v1119_v11  ;;  %v1176_v18 = vmul.f32 %v5248_v32, %v5077_v44  ;;  %v1224_v22 = vadd.f32 %v5275_v63, %v1116_v35  ;;  %v5543_v44 = vld [vmem:[%s6443_s4 + $0x170] sm:$0xff]  ;;  %v5857_v51 = vld [vmem:[%s6443_s4 + $0xc8] sm:$0xff]  ;;  %v5879_v24 = vld [vmem:[%s6443_s4 + $0xd8] sm:$0xff] }
 0x2de   :  { %1918 = vmatpush1.msra.mxu1 %v1238_v0  ;;  %2307 = vmatpush1.msra.mxu0 %v1240_v37  ;;  %v1226_v29 = vadd.f32 %v5275_v63, %v1118_v25  ;;  %v5555_v32 = vld [vmem:[%s6443_s4 + $0x10] sm:$0xff]  ;;  %v5561_v63 = vld [vmem:[%s6443_s4 + $0x178] sm:$0xff]  ;;  %v5890_v19 = vld [vmem:[%s6443_s4 + $0xe0] sm:$0xff] }
 0x2df   :  { %1919 = vmatprep.subr.mxu1 %v1232_v1  ;;  %2308 = vmatprep.subr.mxu0 %v1234_v55  ;;  %v1284_v15 = vadd.f32 %v5298_v62, %v1176_v18  ;;  %v5571_v62 = vld [vmem:[%s6443_s4 + $0x18] sm:$0xff]  ;;  %v5901_v49 = vld [vmem:[%s6443_s4 + $0xe8] sm:$0xff]  ;;  %v5912_v0 = vld [vmem:[%s6443_s4 + $0xf0] sm:$0xff] }
 0x2e0   :  { %1836 = vmatprep.mubr.f32.mxu1 %v6531_v61  ;;  %1920 = vmatpush1.msra.mxu1 %v1231_v14  ;;  %v5923_v37 = vld [vmem:[%s6443_s4 + $0xf8] sm:$0xff]  ;;  %v5934_v47 = vld [vmem:[%s6443_s4 + $0x100] sm:$0xff]  ;;  %v5945_v1 = vld [vmem:[%s6443_s4 + $0x108] sm:$0xff] }
 0x2e1   :  { %2309 = vmatpush1.msra.mxu0 %v1233_v38  ;;  %3479 = vmatmul.mubr.msk.f32.gmra.mxu1 %vm1339_vm2, %v5514_v39  ;;  %v5956_v55 = vld [vmem:[%s6443_s4 + $0x110] sm:$0xff]  ;;  %v5967_v26 = vld [vmem:[%s6443_s4 + $0x118] sm:$0xff]  ;;  %v5978_v14 = vld [vmem:[%s6443_s4 + $0x120] sm:$0xff] }
 0x2e2   :  { %1921 = vmatprep.subr.mxu1 %v1225_v27  ;;  %2310 = vmatprep.subr.mxu0 %v1227_v54  ;;  %v5989_v8 = vld [vmem:[%s6443_s4 + $0x128] sm:$0xff]  ;;  %v6000_v45 = vld [vmem:[%s6443_s4 + $0x130] sm:$0xff]  ;;  %v6011_v11 = vld [vmem:[%s6443_s4 + $0x138] sm:$0xff] }
 0x2e3   :  { %1922 = vmatpush1.msra.mxu1 %v1224_v22  ;;  %2311 = vmatpush1.msra.mxu0 %v1226_v29  ;;  %v6022_v38 = vld [vmem:[%s6443_s4 + $0x140] sm:$0xff] }
 0x2e4   :  { %1572 = vmatprep.mubr.f32.mxu0 %v6531_v61  ;;  %3713 = vmatprep.subr.mxu1 %v1284_v15 }
 0x2e5   :  { %3435 = vmatmul.mubr.msk.f32.gmra.mxu0 %vm1339_vm2, %v5538_v3  ;;  %1842 = vmatprep.mubr.f32.mxu1 %v6531_v61 }
 0x2e6   :  { %3480 = vmatmul.mubr.msk.f32.gmra.mxu1 %vm1339_vm2, %v5543_v44  ;;  %1578 = vmatprep.mubr.f32.mxu0 %v6531_v61 }
 0x2e7   :  { %1848 = vmatprep.mubr.f32.mxu1 %v6531_v61 }
 0x2e9   :  { %3436 = vmatmul.mubr.msk.f32.gmra.mxu0 %vm1339_vm2, %v5555_v32 }
 0x2ea   :  { %3481 = vmatmul.mubr.msk.f32.gmra.mxu1 %vm1339_vm2, %v5561_v63  ;;  %1584 = vmatprep.mubr.f32.mxu0 %v6531_v61 }
 0x2eb   :  { %1854 = vmatprep.mubr.f32.mxu1 %v6531_v61 }
 0x2ed   :  { %3437 = vmatmul.mubr.msk.f32.gmra.mxu0 %vm1339_vm2, %v5571_v62 }
 0x2ee   :  { %3482 = vmatmul.mubr.msk.f32.gmra.mxu1 %vm1339_vm2, %v5577_v10  ;;  %1590 = vmatprep.mubr.f32.mxu0 %v6531_v61 }
 0x2ef   :  { %1860 = vmatprep.mubr.f32.mxu1 %v6531_v61 }
 0x2f1   :  { %3438 = vmatmul.mubr.msk.f32.gmra.mxu0 %vm1339_vm2, %v5587_v17 }
 0x2f2   :  { %3483 = vmatmul.mubr.msk.f32.gmra.mxu1 %vm1339_vm2, %v5593_v48  ;;  %1596 = vmatprep.mubr.f32.mxu0 %v6531_v61 }
 0x2f3   :  { %1866 = vmatprep.mubr.f32.mxu1 %v6531_v61 }
 0x2f5   :  { %3439 = vmatmul.mubr.msk.f32.gmra.mxu0 %vm1339_vm2, %v5603_v21 }
 0x2f6   :  { %3484 = vmatmul.mubr.msk.f32.gmra.mxu1 %vm1339_vm2, %v5609_v59  ;;  %1602 = vmatprep.mubr.f32.mxu0 %v6531_v61 }
 0x2f7   :  { %1872 = vmatprep.mubr.f32.mxu1 %v6531_v61 }
 0x2f9   :  { %3440 = vmatmul.mubr.msk.f32.gmra.mxu0 %vm1339_vm2, %v5619_v16 }
 0x2fa   :  { %3485 = vmatmul.mubr.msk.f32.gmra.mxu1 %vm1339_vm2, %v5625_v52  ;;  %1608 = vmatprep.mubr.f32.mxu0 %v6531_v61 }
 0x2fb   :  { %1878 = vmatprep.mubr.f32.mxu1 %v6531_v61 }
 0x2fd   :  { %3441 = vmatmul.mubr.msk.f32.gmra.mxu0 %vm1339_vm2, %v5635_v13 }
 0x2fe   :  { %3486 = vmatmul.mubr.msk.f32.gmra.mxu1 %vm1339_vm2, %v5641_v46  ;;  %1614 = vmatprep.mubr.f32.mxu0 %v6531_v61 }
 0x2ff   :  { %1884 = vmatprep.mubr.f32.mxu1 %v6531_v61 }
 0x301   :  { %3442 = vmatmul.mubr.msk.f32.gmra.mxu0 %vm1339_vm2, %v5651_v36 }
 0x302   :  { %3487 = vmatmul.mubr.msk.f32.gmra.mxu1 %vm1339_vm2, %v5657_v57  ;;  %1620 = vmatprep.mubr.f32.mxu0 %v6531_v61 }
 0x303   :  { %1955 = vmatprep.mubr.f32.mxu1 %v6531_v61 }
 0x305   :  { %3443 = vmatmul.mubr.msk.f32.gmra.mxu0 %vm1339_vm2, %v5667_v40 }
 0x306   :  { %3488 = vmatmul.mubr.msk.f32.vlgmr.msra.gmra.mxu1 %vm1339_vm2, %v5397_v60  ;;  %1626 = vmatprep.mubr.f32.mxu0 %v6531_v61 }
 0x307   :  { %3714 = vmatpush3.msra.mxu1 %v1284_v15  ;;  %1961 = vmatprep.mubr.f32.mxu1 %v6531_v61 }
 0x308   :  { %3715 = vmatprep.subr.mxu1 %v5292_v28 }
 0x309   :  { %3716 = vmatpush3.msra.mxu1 %v5292_v28  ;;  %3444 = vmatmul.mubr.msk.f32.gmra.mxu0 %vm1339_vm2, %v5678_v6  ;;  %v5704_v28 = vld [vmem:[%s6443_s4 + $0x60] sm:$0xff] }
 0x30a   :  { %3717 = vmatprep.subr.mxu1 %v5286_v58  ;;  %1632 = vmatprep.mubr.f32.mxu0 %v6531_v61 }
 0x30b   :  { %3718 = vmatpush3.msra.mxu1 %v5286_v58  ;;  %v5734_v58 = vld [vmem:[%s6443_s4 + $0x70] sm:$0xff] }
 0x30c   :  { %3719 = vmatprep.subr.mxu1 %v5271_v33  ;;  %3489 = vmatmul.mubr.msk.f32.gmra.mxu1 %vm1339_vm2, %v5538_v3 }
 0x30d   :  { %3720 = vmatpush3.msra.mxu1 %v5271_v33  ;;  %3445 = vmatmul.mubr.msk.f32.gmra.mxu0 %vm1339_vm2, %v5690_v43  ;;  %v5719_v33 = vld [vmem:[%s6443_s4 + $0x68] sm:$0xff] }
 0x30e   :  { %3721 = vmatprep.subr.mxu1 %v5326_v34  ;;  %1638 = vmatprep.mubr.f32.mxu0 %v6531_v61 }
 0x30f   :  { %3722 = vmatpush3.msra.mxu1 %v5326_v34  ;;  %1967 = vmatprep.mubr.f32.mxu1 %v6531_v61  ;;  %v5747_v34 = vld [vmem:[%s6443_s4 + $0x78] sm:$0xff] }
 0x310   :  { %3723 = vmatprep.subr.mxu1 %v5347_v31  ;;  %3490 = vmatmul.mubr.msk.f32.gmra.mxu1 %vm1339_vm2, %v5555_v32 }
 0x311   :  { %3724 = vmatpush3.msra.mxu1 %v5347_v31  ;;  %3446 = vmatmul.mubr.msk.f32.gmra.mxu0 %vm1339_vm2, %v5704_v28  ;;  %v5769_v31 = vld [vmem:[%s6443_s4 + $0x88] sm:$0xff] }
 0x312   :  { %3725 = vmatprep.subr.mxu1 %v5361_v7  ;;  %1644 = vmatprep.mubr.f32.mxu0 %v6531_v61 }
 0x313   :  { %3726 = vmatpush3.msra.mxu1 %v5361_v7  ;;  %1973 = vmatprep.mubr.f32.mxu1 %v6531_v61  ;;  %v5780_v7 = vld [vmem:[%s6443_s4 + $0x90] sm:$0xff] }
 0x314   :  { %3727 = vmatprep.subr.mxu1 %v5376_v50  ;;  %3491 = vmatmul.mubr.msk.f32.gmra.mxu1 %vm1339_vm2, %v5571_v62 }
 0x315   :  { %3728 = vmatpush3.msra.mxu1 %v5376_v50  ;;  %3447 = vmatmul.mubr.msk.f32.gmra.mxu0 %vm1339_vm2, %v5719_v33  ;;  %v5791_v50 = vld [vmem:[%s6443_s4 + $0x98] sm:$0xff] }
 0x316   :  { %3729 = vmatprep.subr.mxu1 %v5289_v30  ;;  %1650 = vmatprep.mubr.f32.mxu0 %v6531_v61 }
 0x317   :  { %3730 = vmatpush3.msra.mxu1 %v5289_v30  ;;  %1979 = vmatprep.mubr.f32.mxu1 %v6531_v61  ;;  %v5758_v30 = vld [vmem:[%s6443_s4 + $0x80] sm:$0xff] }
 0x318   :  { %3492 = vmatmul.mubr.msk.f32.gmra.mxu1 %vm1339_vm2, %v5587_v17 }
 0x319   :  { %3448 = vmatmul.mubr.msk.f32.gmra.mxu0 %vm1339_vm2, %v5734_v58  ;;  %1985 = vmatprep.mubr.f32.mxu1 %v6531_v61 }
 0x31a   :  { %1656 = vmatprep.mubr.f32.mxu0 %v6531_v61 }
 0x31c   :  { %3493 = vmatmul.mubr.msk.f32.gmra.mxu1 %vm1339_vm2, %v5603_v21 }
 0x31d   :  { %3449 = vmatmul.mubr.msk.f32.gmra.mxu0 %vm1339_vm2, %v5747_v34  ;;  %1991 = vmatprep.mubr.f32.mxu1 %v6531_v61 }
 0x31e   :  { %1662 = vmatprep.mubr.f32.mxu0 %v6531_v61 }
 0x320   :  { %3494 = vmatmul.mubr.msk.f32.gmra.mxu1 %vm1339_vm2, %v5619_v16 }
 0x321   :  { %3450 = vmatmul.mubr.msk.f32.gmra.mxu0 %vm1339_vm2, %v5758_v30  ;;  %1997 = vmatprep.mubr.f32.mxu1 %v6531_v61 }
 0x322   :  { %1668 = vmatprep.mubr.f32.mxu0 %v6531_v61 }
 0x324   :  { %3495 = vmatmul.mubr.msk.f32.gmra.mxu1 %vm1339_vm2, %v5635_v13 }
 0x325   :  { %3451 = vmatmul.mubr.msk.f32.gmra.mxu0 %vm1339_vm2, %v5769_v31  ;;  %2003 = vmatprep.mubr.f32.mxu1 %v6531_v61 }
 0x326   :  { %1674 = vmatprep.mubr.f32.mxu0 %v6531_v61 }
 0x328   :  { %3496 = vmatmul.mubr.msk.f32.gmra.mxu1 %vm1339_vm2, %v5651_v36 }
 0x329   :  { %3452 = vmatmul.mubr.msk.f32.gmra.mxu0 %vm1339_vm2, %v5780_v7  ;;  %2009 = vmatprep.mubr.f32.mxu1 %v6531_v61 }
 0x32a   :  { %1680 = vmatprep.mubr.f32.mxu0 %v6531_v61 }
 0x32c   :  { %3497 = vmatmul.mubr.msk.f32.gmra.mxu1 %vm1339_vm2, %v5667_v40 }
 0x32d   :  { %3453 = vmatmul.mubr.msk.f32.gmra.mxu0 %vm1339_vm2, %v5791_v50  ;;  %2015 = vmatprep.mubr.f32.mxu1 %v6531_v61 }
 0x32e   :  { %1686 = vmatprep.mubr.f32.mxu0 %v6531_v61 }
 0x330   :  { %3498 = vmatmul.mubr.msk.f32.gmra.mxu1 %vm1339_vm2, %v5678_v6 }
 0x331   :  { %3454 = vmatmul.mubr.msk.f32.gmra.mxu0 %vm1339_vm2, %v5802_v42  ;;  %2021 = vmatprep.mubr.f32.mxu1 %v6531_v61 }
 0x332   :  { %1692 = vmatprep.mubr.f32.mxu0 %v6531_v61 }
 0x334   :  { %3499 = vmatmul.mubr.msk.f32.gmra.mxu1 %vm1339_vm2, %v5690_v43 }
 0x335   :  { %3455 = vmatmul.mubr.msk.f32.gmra.mxu0 %vm1339_vm2, %v5813_v2  ;;  %2027 = vmatprep.mubr.f32.mxu1 %v6531_v61 }
 0x336   :  { %1698 = vmatprep.mubr.f32.mxu0 %v6531_v61 }
 0x338   :  { %3500 = vmatmul.mubr.msk.f32.gmra.mxu1 %vm1339_vm2, %v5704_v28 }
 0x339   :  { %3456 = vmatmul.mubr.msk.f32.gmra.mxu0 %vm1339_vm2, %v5824_v56  ;;  %2033 = vmatprep.mubr.f32.mxu1 %v6531_v61 }
 0x33a   :  { %1704 = vmatprep.mubr.f32.mxu0 %v6531_v61 }
 0x33c   :  { %3501 = vmatmul.mubr.msk.f32.gmra.mxu1 %vm1339_vm2, %v5719_v33 }
 0x33d   :  { %3457 = vmatmul.mubr.msk.f32.gmra.mxu0 %vm1339_vm2, %v5835_v5  ;;  %2039 = vmatprep.mubr.f32.mxu1 %v6531_v61 }
 0x33e   :  { %1710 = vmatprep.mubr.f32.mxu0 %v6531_v61 }
 0x340   :  { %3502 = vmatmul.mubr.msk.f32.gmra.mxu1 %vm1339_vm2, %v5734_v58 }
 0x341   :  { %3458 = vmatmul.mubr.msk.f32.gmra.mxu0 %vm1339_vm2, %v5846_v9  ;;  %2045 = vmatprep.mubr.f32.mxu1 %v6531_v61 }
 0x342   :  { %1716 = vmatprep.mubr.f32.mxu0 %v6531_v61 }
 0x344   :  { %3503 = vmatmul.mubr.msk.f32.gmra.mxu1 %vm1339_vm2, %v5747_v34 }
 0x345   :  { %3459 = vmatmul.mubr.msk.f32.gmra.mxu0 %vm1339_vm2, %v5857_v51  ;;  %2051 = vmatprep.mubr.f32.mxu1 %v6531_v61 }
 0x346   :  { %1722 = vmatprep.mubr.f32.mxu0 %v6531_v61 }
 0x348   :  { %3504 = vmatmul.mubr.msk.f32.gmra.mxu1 %vm1339_vm2, %v5758_v30 }
 0x349   :  { %3460 = vmatmul.mubr.msk.f32.gmra.mxu0 %vm1339_vm2, %v5868_v4  ;;  %2057 = vmatprep.mubr.f32.mxu1 %v6531_v61 }
 0x34a   :  { %1728 = vmatprep.mubr.f32.mxu0 %v6531_v61 }
 0x34c   :  { %3505 = vmatmul.mubr.msk.f32.gmra.mxu1 %vm1339_vm2, %v5769_v31 }
 0x34d   :  { %3461 = vmatmul.mubr.msk.f32.gmra.mxu0 %vm1339_vm2, %v5879_v24  ;;  %2063 = vmatprep.mubr.f32.mxu1 %v6531_v61 }
 0x34e   :  { %1734 = vmatprep.mubr.f32.mxu0 %v6531_v61 }
 0x350   :  { %3506 = vmatmul.mubr.msk.f32.gmra.mxu1 %vm1339_vm2, %v5780_v7 }
 0x351   :  { %3462 = vmatmul.mubr.msk.f32.gmra.mxu0 %vm1339_vm2, %v5890_v19  ;;  %2069 = vmatprep.mubr.f32.mxu1 %v6531_v61 }
 0x352   :  { %1740 = vmatprep.mubr.f32.mxu0 %v6531_v61 }
 0x354   :  { %3507 = vmatmul.mubr.msk.f32.gmra.mxu1 %vm1339_vm2, %v5791_v50 }
 0x355   :  { %3463 = vmatmul.mubr.msk.f32.gmra.mxu0 %vm1339_vm2, %v5901_v49  ;;  %2075 = vmatprep.mubr.f32.mxu1 %v6531_v61 }
 0x356   :  { %1746 = vmatprep.mubr.f32.mxu0 %v6531_v61 }
 0x358   :  { %3508 = vmatmul.mubr.msk.f32.gmra.mxu1 %vm1339_vm2, %v5802_v42 }
 0x359   :  { %3464 = vmatmul.mubr.msk.f32.gmra.mxu0 %vm1339_vm2, %v5912_v0  ;;  %2081 = vmatprep.mubr.f32.mxu1 %v6531_v61 }
 0x35a   :  { %1752 = vmatprep.mubr.f32.mxu0 %v6531_v61 }
 0x35c   :  { %3509 = vmatmul.mubr.msk.f32.gmra.mxu1 %vm1339_vm2, %v5813_v2 }
 0x35d   :  { %3465 = vmatmul.mubr.msk.f32.gmra.mxu0 %vm1339_vm2, %v5923_v37  ;;  %2087 = vmatprep.mubr.f32.mxu1 %v6531_v61 }
 0x35e   :  { %1758 = vmatprep.mubr.f32.mxu0 %v6531_v61 }
 0x360   :  { %3510 = vmatmul.mubr.msk.f32.gmra.mxu1 %vm1339_vm2, %v5824_v56 }
 0x361   :  { %3466 = vmatmul.mubr.msk.f32.gmra.mxu0 %vm1339_vm2, %v5934_v47  ;;  %2093 = vmatprep.mubr.f32.mxu1 %v6531_v61 }
 0x362   :  { %1764 = vmatprep.mubr.f32.mxu0 %v6531_v61 }
 0x364   :  { %3511 = vmatmul.mubr.msk.f32.gmra.mxu1 %vm1339_vm2, %v5835_v5 }
 0x365   :  { %3467 = vmatmul.mubr.msk.f32.gmra.mxu0 %vm1339_vm2, %v5945_v1  ;;  %2099 = vmatprep.mubr.f32.mxu1 %v6531_v61 }
 0x366   :  { %1770 = vmatprep.mubr.f32.mxu0 %v6531_v61 }
 0x368   :  { %3512 = vmatmul.mubr.msk.f32.gmra.mxu1 %vm1339_vm2, %v5846_v9 }
 0x369   :  { %3468 = vmatmul.mubr.msk.f32.gmra.mxu0 %vm1339_vm2, %v5956_v55  ;;  %2105 = vmatprep.mubr.f32.mxu1 %v6531_v61 }
 0x36a   :  { %1776 = vmatprep.mubr.f32.mxu0 %v6531_v61 }
 0x36c   :  { %3513 = vmatmul.mubr.msk.f32.gmra.mxu1 %vm1339_vm2, %v5857_v51 }
 0x36d   :  { %3469 = vmatmul.mubr.msk.f32.gmra.mxu0 %vm1339_vm2, %v5967_v26  ;;  %2111 = vmatprep.mubr.f32.mxu1 %v6531_v61 }
 0x36e   :  { %1782 = vmatprep.mubr.f32.mxu0 %v6531_v61 }
 0x370   :  { %3514 = vmatmul.mubr.msk.f32.gmra.mxu1 %vm1339_vm2, %v5868_v4 }
 0x371   :  { %3470 = vmatmul.mubr.msk.f32.gmra.mxu0 %vm1339_vm2, %v5978_v14  ;;  %2117 = vmatprep.mubr.f32.mxu1 %v6531_v61 }
 0x372   :  { %1788 = vmatprep.mubr.f32.mxu0 %v6531_v61 }
 0x374   :  { %3515 = vmatmul.mubr.msk.f32.gmra.mxu1 %vm1339_vm2, %v5879_v24 }
 0x375   :  { %3471 = vmatmul.mubr.msk.f32.gmra.mxu0 %vm1339_vm2, %v5989_v8  ;;  %2123 = vmatprep.mubr.f32.mxu1 %v6531_v61 }
 0x376   :  { %1794 = vmatprep.mubr.f32.mxu0 %v6531_v61 }
 0x378   :  { %3516 = vmatmul.mubr.msk.f32.gmra.mxu1 %vm1339_vm2, %v5890_v19 }
 0x379   :  { %3472 = vmatmul.mubr.msk.f32.gmra.mxu0 %vm1339_vm2, %v6000_v45  ;;  %2129 = vmatprep.mubr.f32.mxu1 %v6531_v61 }
 0x37a   :  { %1800 = vmatprep.mubr.f32.mxu0 %v6531_v61 }
 0x37c   :  { %3517 = vmatmul.mubr.msk.f32.gmra.mxu1 %vm1339_vm2, %v5901_v49 }
 0x37d   :  { %3473 = vmatmul.mubr.msk.f32.gmra.mxu0 %vm1339_vm2, %v6011_v11  ;;  %2135 = vmatprep.mubr.f32.mxu1 %v6531_v61 }
 0x37e   :  { %1806 = vmatprep.mubr.f32.mxu0 %v6531_v61 }
 0x380   :  { %3518 = vmatmul.mubr.msk.f32.gmra.mxu1 %vm1339_vm2, %v5912_v0 }
 0x381   :  { %3474 = vmatmul.mubr.msk.f32.gmra.mxu0 %vm1339_vm2, %v6022_v38  ;;  %2141 = vmatprep.mubr.f32.mxu1 %v6531_v61 }
 0x382   :  { %2344 = vmatprep.mubr.f32.mxu0 %v6531_v61 }
 0x384   :  { %3519 = vmatmul.mubr.msk.f32.gmra.mxu1 %vm1339_vm2, %v5923_v37 }
 0x385   :  { %3542 = vmatmul.mubr.msk.f32.vlgmr.msra.gmra.mxu0 %vm1339_vm2, %v5397_v60  ;;  %2147 = vmatprep.mubr.f32.mxu1 %v6531_v61 }
 0x386   :  { %2350 = vmatprep.mubr.f32.mxu0 %v6531_v61 }
 0x388   :  { %3520 = vmatmul.mubr.msk.f32.gmra.mxu1 %vm1339_vm2, %v5934_v47 }
 0x389   :  { %3543 = vmatmul.mubr.msk.f32.gmra.mxu0 %vm1339_vm2, %v5538_v3  ;;  %2153 = vmatprep.mubr.f32.mxu1 %v6531_v61 }
 0x38a   :  { %2356 = vmatprep.mubr.f32.mxu0 %v6531_v61 }
 0x38c   :  { %3521 = vmatmul.mubr.msk.f32.gmra.mxu1 %vm1339_vm2, %v5945_v1 }
 0x38d   :  { %3544 = vmatmul.mubr.msk.f32.gmra.mxu0 %vm1339_vm2, %v5555_v32  ;;  %2159 = vmatprep.mubr.f32.mxu1 %v6531_v61  ;;  %v1814_v60 = vpop.f32.mrf.mxu1 }
 0x38e   :  { %2362 = vmatprep.mubr.f32.mxu0 %v6531_v61  ;;  %v1568_v23 = vpop.f32.mrf.mxu0  ;;  %3291 = vst [vmem:[#allocation2 + $0x8f8] sm:$0xff] %v1814_v60 }
 0x38f   :  { %3004 = vst [vmem:[#allocation2] sm:$0xff] %v1568_v23  ;;  %v1816_v35 = vpop.f32.mrf.mxu1 }
 0x390   :  { %3522 = vmatmul.mubr.msk.f32.gmra.mxu1 %vm1339_vm2, %v5956_v55  ;;  %v1570_v25 = vpop.f32.mrf.mxu0  ;;  %3292 = vst [vmem:[#allocation2 + $0x900] sm:$0xff] %v1816_v35 }
 0x391   :  { %3545 = vmatmul.mubr.msk.f32.gmra.mxu0 %vm1339_vm2, %v5571_v62  ;;  %3005 = vst [vmem:[#allocation2 + $0x8] sm:$0xff] %v1570_v25  ;;  %2165 = vmatprep.mubr.f32.mxu1 %v6531_v61 }
 0x392   :  { %2368 = vmatprep.mubr.f32.mxu0 %v6531_v61  ;;  %v1820_v27 = vpop.f32.mrf.mxu1 }
 0x393   :  { %3298 = vst [vmem:[#allocation2 + $0x930] sm:$0xff] %v1820_v27 }
 0x394   :  { %3523 = vmatmul.mubr.msk.f32.gmra.mxu1 %vm1339_vm2, %v5967_v26  ;;  %v1822_v54 = vpop.f32.mrf.mxu1 }
 0x395   :  { %3546 = vmatmul.mubr.msk.f32.gmra.mxu0 %vm1339_vm2, %v5587_v17  ;;  %2171 = vmatprep.mubr.f32.mxu1 %v6531_v61  ;;  %3299 = vst [vmem:[#allocation2 + $0x938] sm:$0xff] %v1822_v54 }
 0x396   :  { %2374 = vmatprep.mubr.f32.mxu0 %v6531_v61 }
 0x397   :  { %v1826_v18 = vpop.f32.mrf.mxu1 }
 0x398   :  { %3524 = vmatmul.mubr.msk.f32.gmra.mxu1 %vm1339_vm2, %v5978_v14  ;;  %3305 = vst [vmem:[#allocation2 + $0x968] sm:$0xff] %v1826_v18 }
 0x399   :  { %3547 = vmatmul.mubr.msk.f32.gmra.mxu0 %vm1339_vm2, %v5603_v21  ;;  %2177 = vmatprep.mubr.f32.mxu1 %v6531_v61  ;;  %v1828_v22 = vpop.f32.mrf.mxu1 }
 0x39a   :  { %2380 = vmatprep.mubr.f32.mxu0 %v6531_v61  ;;  %3306 = vst [vmem:[#allocation2 + $0x970] sm:$0xff] %v1828_v22 }
 0x39c   :  { %3525 = vmatmul.mubr.msk.f32.gmra.mxu1 %vm1339_vm2, %v5989_v8  ;;  %v1832_v29 = vpop.f32.mrf.mxu1 }
 0x39d   :  { %3548 = vmatmul.mubr.msk.f32.gmra.mxu0 %vm1339_vm2, %v5619_v16  ;;  %2183 = vmatprep.mubr.f32.mxu1 %v6531_v61  ;;  %3312 = vst [vmem:[#allocation2 + $0x9a0] sm:$0xff] %v1832_v29 }
 0x39e   :  { %2386 = vmatprep.mubr.f32.mxu0 %v6531_v61  ;;  %v1834_v15 = vpop.f32.mrf.mxu1 }
 0x39f   :  { %3313 = vst [vmem:[#allocation2 + $0x9a8] sm:$0xff] %v1834_v15 }
 0x3a0   :  { %3526 = vmatmul.mubr.msk.f32.gmra.mxu1 %vm1339_vm2, %v6000_v45 }
 0x3a1   :  { %3549 = vmatmul.mubr.msk.f32.gmra.mxu0 %vm1339_vm2, %v5635_v13  ;;  %2189 = vmatprep.mubr.f32.mxu1 %v6531_v61  ;;  %v1838_v60 = vpop.f32.mrf.mxu1 }
 0x3a2   :  { %2392 = vmatprep.mubr.f32.mxu0 %v6531_v61  ;;  %3319 = vst [vmem:[#allocation2 + $0x9d8] sm:$0xff] %v1838_v60 }
 0x3a3   :  { %v1840_v23 = vpop.f32.mrf.mxu1 }
 0x3a4   :  { %3527 = vmatmul.mubr.msk.f32.gmra.mxu1 %vm1339_vm2, %v6011_v11  ;;  %3320 = vst [vmem:[#allocation2 + $0x9e0] sm:$0xff] %v1840_v23 }
 0x3a5   :  { %v1574_v35 = vpop.f32.mrf.mxu0  ;;  %3550 = vmatmul.mubr.msk.f32.gmra.mxu0 %vm1339_vm2, %v5651_v36  ;;  %2195 = vmatprep.mubr.f32.mxu1 %v6531_v61 }
 0x3a6   :  { %3011 = vst [vmem:[#allocation2 + $0x38] sm:$0xff] %v1574_v35  ;;  %2398 = vmatprep.mubr.f32.mxu0 %v6531_v61  ;;  %v1844_v25 = vpop.f32.mrf.mxu1 }
 0x3a7   :  { %v1576_v27 = vpop.f32.mrf.mxu0  ;;  %3326 = vst [vmem:[#allocation2 + $0xa10] sm:$0xff] %v1844_v25 }
 0x3a8   :  { %3012 = vst [vmem:[#allocation2 + $0x40] sm:$0xff] %v1576_v27  ;;  %3528 = vmatmul.mubr.msk.f32.gmra.mxu1 %vm1339_vm2, %v6022_v38  ;;  %v1846_v54 = vpop.f32.mrf.mxu1 }
 0x3a9   :  { %v1580_v18 = vpop.f32.mrf.mxu0  ;;  %3551 = vmatmul.mubr.msk.f32.gmra.mxu0 %vm1339_vm2, %v5667_v40  ;;  %3327 = vst [vmem:[#allocation2 + $0xa18] sm:$0xff] %v1846_v54  ;;  %2201 = vmatprep.mubr.f32.mxu1 %v6531_v61 }
 0x3aa   :  { %3018 = vst [vmem:[#allocation2 + $0x70] sm:$0xff] %v1580_v18  ;;  %2404 = vmatprep.mubr.f32.mxu0 %v6531_v61  ;;  %v1850_v22 = vpop.f32.mrf.mxu1 }
 0x3ab   :  { %v1582_v29 = vpop.f32.mrf.mxu0  ;;  %3333 = vst [vmem:[#allocation2 + $0xa48] sm:$0xff] %v1850_v22 }
 0x3ac   :  { %3019 = vst [vmem:[#allocation2 + $0x78] sm:$0xff] %v1582_v29  ;;  %3529 = vmatmul.mubr.msk.f32.gmra.mxu1 %vm1339_vm2, %v5387_v12  ;;  %v1852_v15 = vpop.f32.mrf.mxu1 }
 0x3ad   :  { %v1586_v60 = vpop.f32.mrf.mxu0  ;;  %3552 = vmatmul.mubr.msk.f32.gmra.mxu0 %vm1339_vm2, %v5678_v6  ;;  %3334 = vst [vmem:[#allocation2 + $0xa50] sm:$0xff] %v1852_v15  ;;  %2207 = vmatprep.mubr.f32.mxu1 %v6531_v61 }
 0x3ae   :  { %3025 = vst [vmem:[#allocation2 + $0xa8] sm:$0xff] %v1586_v60  ;;  %2410 = vmatprep.mubr.f32.mxu0 %v6531_v61  ;;  %v1856_v23 = vpop.f32.mrf.mxu1 }
 0x3af   :  { %v1588_v35 = vpop.f32.mrf.mxu0  ;;  %3340 = vst [vmem:[#allocation2 + $0xa80] sm:$0xff] %v1856_v23 }
 0x3b0   :  { %3026 = vst [vmem:[#allocation2 + $0xb0] sm:$0xff] %v1588_v35  ;;  %3530 = vmatmul.mubr.msk.f32.gmra.mxu1 %vm1339_vm2, %v5424_v20  ;;  %v1858_v25 = vpop.f32.mrf.mxu1 }
 0x3b1   :  { %v1592_v12 = vpop.f32.mrf.mxu0  ;;  %3553 = vmatmul.mubr.msk.f32.gmra.mxu0 %vm1339_vm2, %v5690_v43  ;;  %3341 = vst [vmem:[#allocation2 + $0xa88] sm:$0xff] %v1858_v25  ;;  %2213 = vmatprep.mubr.f32.mxu1 %v6531_v61 }
 0x3b2   :  { %3032 = vst [vmem:[#allocation2 + $0xe0] sm:$0xff] %v1592_v12  ;;  %2416 = vmatprep.mubr.f32.mxu0 %v6531_v61  ;;  %v1862_v27 = vpop.f32.mrf.mxu1 }
 0x3b3   :  { %v1594_v54 = vpop.f32.mrf.mxu0  ;;  %3347 = vst [vmem:[#allocation2 + $0xab8] sm:$0xff] %v1862_v27 }
 0x3b4   :  { %3033 = vst [vmem:[#allocation2 + $0xe8] sm:$0xff] %v1594_v54  ;;  %3531 = vmatmul.mubr.msk.f32.gmra.mxu1 %vm1339_vm2, %v5454_v53  ;;  %v1864_v18 = vpop.f32.mrf.mxu1 }
 0x3b5   :  { %v1598_v20 = vpop.f32.mrf.mxu0  ;;  %3554 = vmatmul.mubr.msk.f32.gmra.mxu0 %vm1339_vm2, %v5704_v28  ;;  %3348 = vst [vmem:[#allocation2 + $0xac0] sm:$0xff] %v1864_v18  ;;  %2219 = vmatprep.mubr.f32.mxu1 %v6531_v61 }
 0x3b6   :  { %3039 = vst [vmem:[#allocation2 + $0x118] sm:$0xff] %v1598_v20  ;;  %2422 = vmatprep.mubr.f32.mxu0 %v6531_v61  ;;  %v1868_v22 = vpop.f32.mrf.mxu1 }
 0x3b7   :  { %v1600_v29 = vpop.f32.mrf.mxu0  ;;  %3354 = vst [vmem:[#allocation2 + $0xaf0] sm:$0xff] %v1868_v22 }
 0x3b8   :  { %3040 = vst [vmem:[#allocation2 + $0x120] sm:$0xff] %v1600_v29  ;;  %3532 = vmatmul.mubr.msk.f32.gmra.mxu1 %vm1339_vm2, %v5484_v41  ;;  %v1870_v15 = vpop.f32.mrf.mxu1 }
 0x3b9   :  { %v1604_v53 = vpop.f32.mrf.mxu0  ;;  %3555 = vmatmul.mubr.msk.f32.gmra.mxu0 %vm1339_vm2, %v5719_v33  ;;  %3355 = vst [vmem:[#allocation2 + $0xaf8] sm:$0xff] %v1870_v15  ;;  %2225 = vmatprep.mubr.f32.mxu1 %v6531_v61 }
 0x3ba   :  { %3046 = vst [vmem:[#allocation2 + $0x150] sm:$0xff] %v1604_v53  ;;  %2428 = vmatprep.mubr.f32.mxu0 %v6531_v61  ;;  %v1874_v60 = vpop.f32.mrf.mxu1 }
 0x3bb   :  { %v1606_v23 = vpop.f32.mrf.mxu0  ;;  %3361 = vst [vmem:[#allocation2 + $0xb28] sm:$0xff] %v1874_v60 }
 0x3bc   :  { %3047 = vst [vmem:[#allocation2 + $0x158] sm:$0xff] %v1606_v23  ;;  %3533 = vmatmul.mubr.msk.f32.gmra.mxu1 %vm1339_vm2, %v5514_v39  ;;  %v1876_v35 = vpop.f32.mrf.mxu1 }
 0x3bd   :  { %v1610_v41 = vpop.f32.mrf.mxu0  ;;  %3556 = vmatmul.mubr.msk.f32.gmra.mxu0 %vm1339_vm2, %v5734_v58  ;;  %3362 = vst [vmem:[#allocation2 + $0xb30] sm:$0xff] %v1876_v35  ;;  %2231 = vmatprep.mubr.f32.mxu1 %v6531_v61 }
 0x3be   :  { %3053 = vst [vmem:[#allocation2 + $0x188] sm:$0xff] %v1610_v41  ;;  %2434 = vmatprep.mubr.f32.mxu0 %v6531_v61  ;;  %v1880_v25 = vpop.f32.mrf.mxu1 }
 0x3bf   :  { %v1612_v12 = vpop.f32.mrf.mxu0  ;;  %3368 = vst [vmem:[#allocation2 + $0xb60] sm:$0xff] %v1880_v25 }
 0x3c0   :  { %3054 = vst [vmem:[#allocation2 + $0x190] sm:$0xff] %v1612_v12  ;;  %3534 = vmatmul.mubr.msk.f32.gmra.mxu1 %vm1339_vm2, %v5543_v44  ;;  %v1882_v27 = vpop.f32.mrf.mxu1 }
 0x3c1   :  { %v1616_v39 = vpop.f32.mrf.mxu0  ;;  %3557 = vmatmul.mubr.msk.f32.gmra.mxu0 %vm1339_vm2, %v5747_v34  ;;  %3369 = vst [vmem:[#allocation2 + $0xb68] sm:$0xff] %v1882_v27  ;;  %2237 = vmatprep.mubr.f32.mxu1 %v6531_v61 }
 0x3c2   :  { %3060 = vst [vmem:[#allocation2 + $0x1c0] sm:$0xff] %v1616_v39  ;;  %2440 = vmatprep.mubr.f32.mxu0 %v6531_v61  ;;  %v1886_v54 = vpop.f32.mrf.mxu1 }
 0x3c3   :  { %v1618_v18 = vpop.f32.mrf.mxu0  ;;  %3375 = vst [vmem:[#allocation2 + $0xb98] sm:$0xff] %v1886_v54 }
 0x3c4   :  { %3061 = vst [vmem:[#allocation2 + $0x1c8] sm:$0xff] %v1618_v18  ;;  %3535 = vmatmul.mubr.msk.f32.gmra.mxu1 %vm1339_vm2, %v5561_v63  ;;  %v1888_v20 = vpop.f32.mrf.mxu1 }
 0x3c5   :  { %v1622_v44 = vpop.f32.mrf.mxu0  ;;  %3558 = vmatmul.mubr.msk.f32.gmra.mxu0 %vm1339_vm2, %v5758_v30  ;;  %3376 = vst [vmem:[#allocation2 + $0xba0] sm:$0xff] %v1888_v20  ;;  %2243 = vmatprep.mubr.f32.mxu1 %v6531_v61 }
 0x3c6   :  { %3067 = vst [vmem:[#allocation2 + $0x1f8] sm:$0xff] %v1622_v44  ;;  %2446 = vmatprep.mubr.f32.mxu0 %v6531_v61  ;;  %v1957_v22 = vpop.f32.mrf.mxu1 }
 0x3c7   :  { %v1624_v29 = vpop.f32.mrf.mxu0  ;;  %3006 = vst [vmem:[#allocation2 + $0x10] sm:$0xff] %v1957_v22 }
 0x3c8   :  { %3068 = vst [vmem:[#allocation2 + $0x200] sm:$0xff] %v1624_v29  ;;  %3536 = vmatmul.mubr.msk.f32.gmra.mxu1 %vm1339_vm2, %v5577_v10  ;;  %v1959_v15 = vpop.f32.mrf.mxu1 }
 0x3c9   :  { %v1628_v63 = vpop.f32.mrf.mxu0  ;;  %3559 = vmatmul.mubr.msk.f32.gmra.mxu0 %vm1339_vm2, %v5769_v31  ;;  %3007 = vst [vmem:[#allocation2 + $0x18] sm:$0xff] %v1959_v15  ;;  %2249 = vmatprep.mubr.f32.mxu1 %v6531_v61 }
 0x3ca   :  { %3074 = vst [vmem:[#allocation2 + $0x230] sm:$0xff] %v1628_v63  ;;  %2452 = vmatprep.mubr.f32.mxu0 %v6531_v61 }
 0x3cb   :  { %v1630_v53 = vpop.f32.mrf.mxu0 }
 0x3cc   :  { %3075 = vst [vmem:[#allocation2 + $0x238] sm:$0xff] %v1630_v53  ;;  %v1963_v60 = vpop.f32.mrf.mxu1  ;;  %3537 = vmatmul.mubr.msk.f32.gmra.mxu1 %vm1339_vm2, %v5593_v48 }
 0x3cd   :  { %v1634_v23 = vpop.f32.mrf.mxu0  ;;  %3560 = vmatmul.mubr.msk.f32.gmra.mxu0 %vm1339_vm2, %v5780_v7  ;;  %3013 = vst [vmem:[#allocation2 + $0x48] sm:$0xff] %v1963_v60  ;;  %2255 = vmatprep.mubr.f32.mxu1 %v6531_v61 }
 0x3ce   :  { %3081 = vst [vmem:[#allocation2 + $0x268] sm:$0xff] %v1634_v23  ;;  %2458 = vmatprep.mubr.f32.mxu0 %v6531_v61  ;;  %v1965_v10 = vpop.f32.mrf.mxu1 }
 0x3cf   :  { %v1636_v35 = vpop.f32.mrf.mxu0  ;;  %3014 = vst [vmem:[#allocation2 + $0x50] sm:$0xff] %v1965_v10 }
 0x3d0   :  { %3082 = vst [vmem:[#allocation2 + $0x270] sm:$0xff] %v1636_v35  ;;  %v1969_v41 = vpop.f32.mrf.mxu1  ;;  %3538 = vmatmul.mubr.msk.f32.gmra.mxu1 %vm1339_vm2, %v5609_v59 }
 0x3d1   :  { %v1640_v25 = vpop.f32.mrf.mxu0  ;;  %3561 = vmatmul.mubr.msk.f32.gmra.mxu0 %vm1339_vm2, %v5791_v50  ;;  %3020 = vst [vmem:[#allocation2 + $0x80] sm:$0xff] %v1969_v41  ;;  %2261 = vmatprep.mubr.f32.mxu1 %v6531_v61 }
 0x3d2   :  { %3088 = vst [vmem:[#allocation2 + $0x2a0] sm:$0xff] %v1640_v25  ;;  %2464 = vmatprep.mubr.f32.mxu0 %v6531_v61  ;;  %v1971_v48 = vpop.f32.mrf.mxu1 }
 0x3d3   :  { %v1642_v12 = vpop.f32.mrf.mxu0  ;;  %3021 = vst [vmem:[#allocation2 + $0x88] sm:$0xff] %v1971_v48 }
 0x3d4   :  { %3089 = vst [vmem:[#allocation2 + $0x2a8] sm:$0xff] %v1642_v12  ;;  %v1975_v27 = vpop.f32.mrf.mxu1  ;;  %3539 = vmatmul.mubr.msk.f32.gmra.mxu1 %vm1339_vm2, %v5625_v52 }
 0x3d5   :  { %v1646_v39 = vpop.f32.mrf.mxu0  ;;  %3562 = vmatmul.mubr.msk.f32.gmra.mxu0 %vm1339_vm2, %v5802_v42  ;;  %3027 = vst [vmem:[#allocation2 + $0xb8] sm:$0xff] %v1975_v27  ;;  %2267 = vmatprep.mubr.f32.mxu1 %v6531_v61 }
 0x3d6   :  { %3095 = vst [vmem:[#allocation2 + $0x2d8] sm:$0xff] %v1646_v39  ;;  %2470 = vmatprep.mubr.f32.mxu0 %v6531_v61  ;;  %v1977_v59 = vpop.f32.mrf.mxu1 }
 0x3d7   :  { %v1648_v54 = vpop.f32.mrf.mxu0  ;;  %3028 = vst [vmem:[#allocation2 + $0xc0] sm:$0xff] %v1977_v59 }
 0x3d8   :  { %3096 = vst [vmem:[#allocation2 + $0x2e0] sm:$0xff] %v1648_v54  ;;  %v1981_v18 = vpop.f32.mrf.mxu1  ;;  %3540 = vmatmul.mubr.msk.f32.gmra.mxu1 %vm1339_vm2, %v5641_v46  ;;  %v3855_v46 = vld [vmem:[%s6443_s4] sm:$0xff] }
 0x3d9   :  { %v1652_v20 = vpop.f32.mrf.mxu0  ;;  %3563 = vmatmul.mubr.msk.f32.gmra.mxu0 %vm1339_vm2, %v5813_v2  ;;  %3034 = vst [vmem:[#allocation2 + $0xf0] sm:$0xff] %v1981_v18  ;;  %2273 = vmatprep.mubr.f32.mxu1 %v6531_v61 }
 0x3da   :  { %3102 = vst [vmem:[#allocation2 + $0x310] sm:$0xff] %v1652_v20  ;;  %2476 = vmatprep.mubr.f32.mxu0 %v6531_v61  ;;  %v1983_v52 = vpop.f32.mrf.mxu1 }
 0x3db   :  { %v1654_v44 = vpop.f32.mrf.mxu0  ;;  %3035 = vst [vmem:[#allocation2 + $0xf8] sm:$0xff] %v1983_v52 }
 0x3dc   :  { %3103 = vst [vmem:[#allocation2 + $0x318] sm:$0xff] %v1654_v44  ;;  %v1987_v22 = vpop.f32.mrf.mxu1  ;;  %3541 = vmatmul.mubr.msk.f32.gmra.mxu1 %vm1339_vm2, %v5657_v57 }
 0x3dd   :  { %v1658_v29 = vpop.f32.mrf.mxu0  ;;  %3564 = vmatmul.mubr.msk.f32.gmra.mxu0 %vm1339_vm2, %v5824_v56  ;;  %3041 = vst [vmem:[#allocation2 + $0x128] sm:$0xff] %v1987_v22  ;;  %3731 = vmatprep.mubr.msk.f32.mxu1 %vm1339_vm2, %v3855_v46 }
 0x3de   :  { %3109 = vst [vmem:[#allocation2 + $0x348] sm:$0xff] %v1658_v29  ;;  %2482 = vmatprep.mubr.f32.mxu0 %v6531_v61  ;;  %v1989_v15 = vpop.f32.mrf.mxu1 }
 0x3df   :  { %v1660_v63 = vpop.f32.mrf.mxu0  ;;  %3042 = vst [vmem:[#allocation2 + $0x130] sm:$0xff] %v1989_v15 }
 0x3e0   :  { %3110 = vst [vmem:[#allocation2 + $0x350] sm:$0xff] %v1660_v63  ;;  %v1993_v53 = vpop.f32.mrf.mxu1  ;;  %3732 = vmatmul.mubr.msk.f32.vlgmr.msra.gmra.mxu1 %vm1339_vm2, %v5538_v3 }
 0x3e1   :  { %v1664_v57 = vpop.f32.mrf.mxu0  ;;  %3565 = vmatmul.mubr.msk.f32.gmra.mxu0 %vm1339_vm2, %v5835_v5  ;;  %3048 = vst [vmem:[#allocation2 + $0x160] sm:$0xff] %v1993_v53  ;;  %3734 = vmatprep.mubr.msk.f32.mxu1 %vm1339_vm2, %v5555_v32 }
 0x3e2   :  { %3116 = vst [vmem:[#allocation2 + $0x380] sm:$0xff] %v1664_v57  ;;  %2488 = vmatprep.mubr.f32.mxu0 %v6531_v61  ;;  %v1995_v60 = vpop.f32.mrf.mxu1 }
 0x3e3   :  { %v1666_v23 = vpop.f32.mrf.mxu0  ;;  %3049 = vst [vmem:[#allocation2 + $0x168] sm:$0xff] %v1995_v60 }
 0x3e4   :  { %3117 = vst [vmem:[#allocation2 + $0x388] sm:$0xff] %v1666_v23  ;;  %v1999_v10 = vpop.f32.mrf.mxu1  ;;  %3735 = vmatmul.mubr.msk.f32.gmra.mxu1 %vm1339_vm2, %v5571_v62 }
 0x3e5   :  { %v1670_v3 = vpop.f32.mrf.mxu0  ;;  %3566 = vmatmul.mubr.msk.f32.gmra.mxu0 %vm1339_vm2, %v5846_v9  ;;  %3055 = vst [vmem:[#allocation2 + $0x198] sm:$0xff] %v1999_v10  ;;  %3737 = vmatprep.mubr.msk.f32.mxu1 %vm1339_vm2, %v5587_v17 }
 0x3e6   :  { %3123 = vst [vmem:[#allocation2 + $0x3b8] sm:$0xff] %v1670_v3  ;;  %2494 = vmatprep.mubr.f32.mxu0 %v6531_v61  ;;  %v2001_v32 = vpop.f32.mrf.mxu1 }
 0x3e7   :  { %v1672_v35 = vpop.f32.mrf.mxu0  ;;  %3056 = vst [vmem:[#allocation2 + $0x1a0] sm:$0xff] %v2001_v32 }
 0x3e8   :  { %3124 = vst [vmem:[#allocation2 + $0x3c0] sm:$0xff] %v1672_v35  ;;  %v2005_v41 = vpop.f32.mrf.mxu1  ;;  %3738 = vmatmul.mubr.msk.f32.gmra.mxu1 %vm1339_vm2, %v5603_v21 }
 0x3e9   :  { %v1676_v62 = vpop.f32.mrf.mxu0  ;;  %3567 = vmatmul.mubr.msk.f32.gmra.mxu0 %vm1339_vm2, %v5857_v51  ;;  %3062 = vst [vmem:[#allocation2 + $0x1d0] sm:$0xff] %v2005_v41  ;;  %3740 = vmatprep.mubr.msk.f32.mxu1 %vm1339_vm2, %v5619_v16 }
 0x3ea   :  { %3130 = vst [vmem:[#allocation2 + $0x3f0] sm:$0xff] %v1676_v62  ;;  %2500 = vmatprep.mubr.f32.mxu0 %v6531_v61  ;;  %v2007_v17 = vpop.f32.mrf.mxu1 }
 0x3eb   :  { %v1678_v25 = vpop.f32.mrf.mxu0  ;;  %3063 = vst [vmem:[#allocation2 + $0x1d8] sm:$0xff] %v2007_v17 }
 0x3ec   :  { %3131 = vst [vmem:[#allocation2 + $0x3f8] sm:$0xff] %v1678_v25  ;;  %v2011_v48 = vpop.f32.mrf.mxu1  ;;  %3741 = vmatmul.mubr.msk.f32.gmra.mxu1 %vm1339_vm2, %v5635_v13 }
 0x3ed   :  { %v1682_v21 = vpop.f32.mrf.mxu0  ;;  %3568 = vmatmul.mubr.msk.f32.gmra.mxu0 %vm1339_vm2, %v5868_v4  ;;  %3069 = vst [vmem:[#allocation2 + $0x208] sm:$0xff] %v2011_v48  ;;  %3743 = vmatprep.mubr.msk.f32.mxu1 %vm1339_vm2, %v5651_v36 }
 0x3ee   :  { %3137 = vst [vmem:[#allocation2 + $0x428] sm:$0xff] %v1682_v21  ;;  %2506 = vmatprep.mubr.f32.mxu0 %v6531_v61  ;;  %v2013_v16 = vpop.f32.mrf.mxu1 }
 0x3ef   :  { %v1684_v12 = vpop.f32.mrf.mxu0  ;;  %3070 = vst [vmem:[#allocation2 + $0x210] sm:$0xff] %v2013_v16 }
 0x3f0   :  { %3138 = vst [vmem:[#allocation2 + $0x430] sm:$0xff] %v1684_v12  ;;  %v2017_v27 = vpop.f32.mrf.mxu1  ;;  %3744 = vmatmul.mubr.msk.f32.gmra.mxu1 %vm1339_vm2, %v5667_v40 }
 0x3f1   :  { %v1688_v13 = vpop.f32.mrf.mxu0  ;;  %3569 = vmatmul.mubr.msk.f32.gmra.mxu0 %vm1339_vm2, %v5879_v24  ;;  %3076 = vst [vmem:[#allocation2 + $0x240] sm:$0xff] %v2017_v27  ;;  %3746 = vmatprep.mubr.msk.f32.mxu1 %vm1339_vm2, %v5678_v6  ;;  %v3856_v27 = vld [vmem:[%s6443_s4 + $0x148] sm:$0xff] }
 0x3f2   :  { %3144 = vst [vmem:[#allocation2 + $0x460] sm:$0xff] %v1688_v13  ;;  %2512 = vmatprep.mubr.f32.mxu0 %v6531_v61  ;;  %v2019_v36 = vpop.f32.mrf.mxu1 }
 0x3f3   :  { %v1690_v39 = vpop.f32.mrf.mxu0  ;;  %3077 = vst [vmem:[#allocation2 + $0x248] sm:$0xff] %v2019_v36 }
 0x3f4   :  { %3145 = vst [vmem:[#allocation2 + $0x468] sm:$0xff] %v1690_v39  ;;  %v2023_v59 = vpop.f32.mrf.mxu1  ;;  %3747 = vmatmul.mubr.msk.f32.gmra.mxu1 %vm1339_vm2, %v5690_v43  ;;  %v3857_v39 = vld [vmem:[%s6443_s4 + $0x150] sm:$0xff] }
 0x3f5   :  { %v1694_v40 = vpop.f32.mrf.mxu0  ;;  %3570 = vmatmul.mubr.msk.f32.gmra.mxu0 %vm1339_vm2, %v5890_v19  ;;  %3083 = vst [vmem:[#allocation2 + $0x278] sm:$0xff] %v2023_v59  ;;  %3749 = vmatprep.mubr.msk.f32.mxu1 %vm1339_vm2, %v5704_v28 }
 0x3f6   :  { %3151 = vst [vmem:[#allocation2 + $0x498] sm:$0xff] %v1694_v40  ;;  %2518 = vmatprep.mubr.f32.mxu0 %v6531_v61  ;;  %v2025_v6 = vpop.f32.mrf.mxu1 }
 0x3f7   :  { %v1696_v54 = vpop.f32.mrf.mxu0  ;;  %3084 = vst [vmem:[#allocation2 + $0x280] sm:$0xff] %v2025_v6  ;;  %v3858_v6 = vld [vmem:[%s6443_s4 + $0x158] sm:$0xff] }
 0x3f8   :  { %3152 = vst [vmem:[#allocation2 + $0x4a0] sm:$0xff] %v1696_v54  ;;  %v2029_v18 = vpop.f32.mrf.mxu1  ;;  %3750 = vmatmul.mubr.msk.f32.gmra.mxu1 %vm1339_vm2, %v5719_v33 }
 0x3f9   :  { %v1700_v43 = vpop.f32.mrf.mxu0  ;;  %3571 = vmatmul.mubr.msk.f32.gmra.mxu0 %vm1339_vm2, %v5901_v49  ;;  %3090 = vst [vmem:[#allocation2 + $0x2b0] sm:$0xff] %v2029_v18  ;;  %3752 = vmatprep.mubr.msk.f32.mxu1 %vm1339_vm2, %v5734_v58 }
 0x3fa   :  { %3158 = vst [vmem:[#allocation2 + $0x4d0] sm:$0xff] %v1700_v43  ;;  %2524 = vmatprep.mubr.f32.mxu0 %v6531_v61  ;;  %v2031_v28 = vpop.f32.mrf.mxu1 }
 0x3fb   :  { %v1702_v20 = vpop.f32.mrf.mxu0  ;;  %3091 = vst [vmem:[#allocation2 + $0x2b8] sm:$0xff] %v2031_v28  ;;  %v3859_v28 = vld [vmem:[%s6443_s4 + $0x160] sm:$0xff] }
 0x3fc   :  { %3159 = vst [vmem:[#allocation2 + $0x4d8] sm:$0xff] %v1702_v20  ;;  %v2035_v52 = vpop.f32.mrf.mxu1  ;;  %3753 = vmatmul.mubr.msk.f32.gmra.mxu1 %vm1339_vm2, %v5747_v34 }
 0x3fd   :  { %v1706_v33 = vpop.f32.mrf.mxu0  ;;  %3572 = vmatmul.mubr.msk.f32.gmra.mxu0 %vm1339_vm2, %v5912_v0  ;;  %3097 = vst [vmem:[#allocation2 + $0x2e8] sm:$0xff] %v2035_v52  ;;  %3755 = vmatprep.mubr.msk.f32.mxu1 %vm1339_vm2, %v5758_v30 }
 0x3fe   :  { %3165 = vst [vmem:[#allocation2 + $0x508] sm:$0xff] %v1706_v33  ;;  %2530 = vmatprep.mubr.f32.mxu0 %v6531_v61  ;;  %v2037_v58 = vpop.f32.mrf.mxu1 }
 0x3ff   :  { %v1708_v44 = vpop.f32.mrf.mxu0  ;;  %3098 = vst [vmem:[#allocation2 + $0x2f0] sm:$0xff] %v2037_v58  ;;  %v3860_v58 = vld [vmem:[%s6443_s4 + $0x168] sm:$0xff] }
 0x400   :  { %3166 = vst [vmem:[#allocation2 + $0x510] sm:$0xff] %v1708_v44  ;;  %v2041_v22 = vpop.f32.mrf.mxu1  ;;  %3756 = vmatmul.mubr.msk.f32.gmra.mxu1 %vm1339_vm2, %v5769_v31 }
 0x401   :  { %v1712_v34 = vpop.f32.mrf.mxu0  ;;  %3573 = vmatmul.mubr.msk.f32.gmra.mxu0 %vm1339_vm2, %v5923_v37  ;;  %3104 = vst [vmem:[#allocation2 + $0x320] sm:$0xff] %v2041_v22  ;;  %3758 = vmatprep.mubr.msk.f32.mxu1 %vm1339_vm2, %v5780_v7  ;;  %v3861_v22 = vld [vmem:[%s6443_s4 + $0x170] sm:$0xff] }
 0x402   :  { %3172 = vst [vmem:[#allocation2 + $0x540] sm:$0xff] %v1712_v34  ;;  %2536 = vmatprep.mubr.f32.mxu0 %v6531_v61  ;;  %v2043_v30 = vpop.f32.mrf.mxu1 }
 0x403   :  { %v1714_v29 = vpop.f32.mrf.mxu0  ;;  %3105 = vst [vmem:[#allocation2 + $0x328] sm:$0xff] %v2043_v30 }
 0x404   :  { %3173 = vst [vmem:[#allocation2 + $0x548] sm:$0xff] %v1714_v29  ;;  %v2047_v46 = vpop.f32.mrf.mxu1  ;;  %3759 = vmatmul.mubr.msk.f32.gmra.mxu1 %vm1339_vm2, %v5791_v50 }
 0x405   :  { %v1718_v31 = vpop.f32.mrf.mxu0  ;;  %3574 = vmatmul.mubr.msk.f32.gmra.mxu0 %vm1339_vm2, %v5934_v47  ;;  %3111 = vst [vmem:[#allocation2 + $0x358] sm:$0xff] %v2047_v46  ;;  %3761 = vmatprep.mubr.msk.f32.mxu1 %vm1339_vm2, %v5802_v42  ;;  %v3862_v46 = vld [vmem:[%s6443_s4 + $0x178] sm:$0xff] }
 0x406   :  { %3179 = vst [vmem:[#allocation2 + $0x578] sm:$0xff] %v1718_v31  ;;  %2542 = vmatprep.mubr.f32.mxu0 %v6531_v61  ;;  %v2049_v7 = vpop.f32.mrf.mxu1 }
 0x407   :  { %v1720_v15 = vpop.f32.mrf.mxu0  ;;  %3112 = vst [vmem:[#allocation2 + $0x360] sm:$0xff] %v2049_v7  ;;  %v3863_v7 = vld [vmem:[%s6443_s4 + $0x180] sm:$0xff] }
 0x408   :  { %3180 = vst [vmem:[#allocation2 + $0x580] sm:$0xff] %v1720_v15  ;;  %v2053_v63 = vpop.f32.mrf.mxu1  ;;  %3762 = vmatmul.mubr.msk.f32.gmra.mxu1 %vm1339_vm2, %v5813_v2 }
 0x409   :  { %v1724_v50 = vpop.f32.mrf.mxu0  ;;  %3575 = vmatmul.mubr.msk.f32.gmra.mxu0 %vm1339_vm2, %v5945_v1  ;;  %3118 = vst [vmem:[#allocation2 + $0x390] sm:$0xff] %v2053_v63  ;;  %3764 = vmatprep.mubr.msk.f32.mxu1 %vm1339_vm2, %v5824_v56 }
 0x40a   :  { %3186 = vst [vmem:[#allocation2 + $0x5b0] sm:$0xff] %v1724_v50  ;;  %2548 = vmatprep.mubr.f32.mxu0 %v6531_v61  ;;  %v2055_v42 = vpop.f32.mrf.mxu1 }
 0x40b   :  { %v1726_v53 = vpop.f32.mrf.mxu0  ;;  %3119 = vst [vmem:[#allocation2 + $0x398] sm:$0xff] %v2055_v42  ;;  %v3864_v42 = vld [vmem:[%s6443_s4 + $0x188] sm:$0xff] }
 0x40c   :  { %3187 = vst [vmem:[#allocation2 + $0x5b8] sm:$0xff] %v1726_v53  ;;  %v2059_v57 = vpop.f32.mrf.mxu1  ;;  %3765 = vmatmul.mubr.msk.f32.gmra.mxu1 %vm1339_vm2, %v5835_v5 }
 0x40d   :  { %v1730_v2 = vpop.f32.mrf.mxu0  ;;  %3576 = vmatmul.mubr.msk.f32.gmra.mxu0 %vm1339_vm2, %v5956_v55  ;;  %3125 = vst [vmem:[#allocation2 + $0x3c8] sm:$0xff] %v2059_v57  ;;  %3767 = vmatprep.mubr.msk.f32.mxu1 %vm1339_vm2, %v5846_v9  ;;  %v3865_v57 = vld [vmem:[%s6443_s4 + $0x190] sm:$0xff] }
 0x40e   :  { %3193 = vst [vmem:[#allocation2 + $0x5e8] sm:$0xff] %v1730_v2  ;;  %2554 = vmatprep.mubr.f32.mxu0 %v6531_v61  ;;  %v2061_v56 = vpop.f32.mrf.mxu1 }
 0x40f   :  { %v1732_v60 = vpop.f32.mrf.mxu0  ;;  %3126 = vst [vmem:[#allocation2 + $0x3d0] sm:$0xff] %v2061_v56 }
 0x410   :  { %3194 = vst [vmem:[#allocation2 + $0x5f0] sm:$0xff] %v1732_v60  ;;  %v2065_v23 = vpop.f32.mrf.mxu1  ;;  %3768 = vmatmul.mubr.msk.f32.gmra.mxu1 %vm1339_vm2, %v5857_v51 }
 0x411   :  { %v1736_v5 = vpop.f32.mrf.mxu0  ;;  %3577 = vmatmul.mubr.msk.f32.gmra.mxu0 %vm1339_vm2, %v5967_v26  ;;  %3132 = vst [vmem:[#allocation2 + $0x400] sm:$0xff] %v2065_v23  ;;  %3770 = vmatprep.mubr.msk.f32.mxu1 %vm1339_vm2, %v5868_v4  ;;  %v3866_v23 = vld [vmem:[%s6443_s4 + $0x198] sm:$0xff] }
 0x412   :  { %3200 = vst [vmem:[#allocation2 + $0x620] sm:$0xff] %v1736_v5  ;;  %2560 = vmatprep.mubr.f32.mxu0 %v6531_v61  ;;  %v2067_v9 = vpop.f32.mrf.mxu1 }
 0x413   :  { %v1738_v10 = vpop.f32.mrf.mxu0  ;;  %3133 = vst [vmem:[#allocation2 + $0x408] sm:$0xff] %v2067_v9  ;;  %v3867_v9 = vld [vmem:[%s6443_s4 + $0x1a0] sm:$0xff] }
 0x414   :  { %3201 = vst [vmem:[#allocation2 + $0x628] sm:$0xff] %v1738_v10  ;;  %v2071_v3 = vpop.f32.mrf.mxu1  ;;  %3771 = vmatmul.mubr.msk.f32.gmra.mxu1 %vm1339_vm2, %v5879_v24 }
 0x415   :  { %v1742_v51 = vpop.f32.mrf.mxu0  ;;  %3578 = vmatmul.mubr.msk.f32.gmra.mxu0 %vm1339_vm2, %v5978_v14  ;;  %3139 = vst [vmem:[#allocation2 + $0x438] sm:$0xff] %v2071_v3  ;;  %3773 = vmatprep.mubr.msk.f32.mxu1 %vm1339_vm2, %v5890_v19 }
 0x416   :  { %3207 = vst [vmem:[#allocation2 + $0x658] sm:$0xff] %v1742_v51  ;;  %2566 = vmatprep.mubr.f32.mxu0 %v6531_v61  ;;  %v2073_v4 = vpop.f32.mrf.mxu1 }
 0x417   :  { %v1744_v32 = vpop.f32.mrf.mxu0  ;;  %3140 = vst [vmem:[#allocation2 + $0x440] sm:$0xff] %v2073_v4  ;;  %v3868_v4 = vld [vmem:[%s6443_s4 + $0x1a8] sm:$0xff]  ;;  %s3893_s4 = smov [#allocation2]  }
 0x418   :  { %3208 = vst [vmem:[#allocation2 + $0x660] sm:$0xff] %v1744_v32  ;;  %v2077_v35 = vpop.f32.mrf.mxu1  ;;  %3774 = vmatmul.mubr.msk.f32.gmra.mxu1 %vm1339_vm2, %v5901_v49  ;;  %s3387_s22 = sshll.u32 %s3893_s4, 4  ;;  %s3388_s22 = int_to_ptr.vmem [resolvable:$true] %s3387_s22 }
 0x419   :  { %v1748_v24 = vpop.f32.mrf.mxu0  ;;  %3579 = vmatmul.mubr.msk.f32.gmra.mxu0 %vm1339_vm2, %v5989_v8  ;;  %3146 = vst [vmem:[#allocation2 + $0x470] sm:$0xff] %v2077_v35  ;;  %3776 = vmatprep.mubr.msk.f32.mxu1 %vm1339_vm2, %v5912_v0  ;;  %s3869_s0 = scalar_lea.vmem %s3388_s22, 48384  ;;  %p3874_p1 = scmp.lt.s32.totalorder %s3388_s22, %s3388_s22 }
 0x41a   :  { %3214 = vst [vmem:[#allocation2 + $0x690] sm:$0xff] %v1748_v24  ;;  %2572 = vmatprep.mubr.f32.mxu0 %v6531_v61  ;;  %v2079_v19 = vpop.f32.mrf.mxu1  ;;  %p3870_p0 = scmp.ne.s32.totalorder %s3388_s22, %s3869_s0  ;;  %p3875_p2 = scmp.lt.s32.totalorder %s3869_s0, %s3869_s0 }
 0x41b   :  { %v1750_v41 = vpop.f32.mrf.mxu0  ;;  %3147 = vst [vmem:[#allocation2 + $0x478] sm:$0xff] %v2079_v19 }
 0x41c   :  { %3215 = vst [vmem:[#allocation2 + $0x698] sm:$0xff] %v1750_v41  ;;  %v2083_v62 = vpop.f32.mrf.mxu1  ;;  %3777 = vmatmul.mubr.msk.f32.gmra.mxu1 %vm1339_vm2, %v5923_v37  ;;  %p3876_p3 = por %p3875_p2, %p3874_p1 }
 0x41d   :  { %v1754_v49 = vpop.f32.mrf.mxu0  ;;  %3580 = vmatmul.mubr.msk.f32.gmra.mxu0 %vm1339_vm2, %v6000_v45  ;;  %3153 = vst [vmem:[#allocation2 + $0x4a8] sm:$0xff] %v2083_v62  ;;  %3779 = vmatprep.mubr.msk.f32.mxu1 %vm1339_vm2, %v5934_v47 }
 0x41e   :  { %3221 = vst [vmem:[#allocation2 + $0x6c8] sm:$0xff] %v1754_v49  ;;  %2578 = vmatprep.mubr.f32.mxu0 %v6531_v61  ;;  %v2085_v0 = vpop.f32.mrf.mxu1  ;;  %p3877_p4 = pnand %p3876_p3, %p3870_p0 }
 0x41f   :  { %v1756_v17 = vpop.f32.mrf.mxu0  ;;  %3154 = vst [vmem:[#allocation2 + $0x4b0] sm:$0xff] %v2085_v0 }
 0x420   :  { %3222 = vst [vmem:[#allocation2 + $0x6d0] sm:$0xff] %v1756_v17  ;;  %v2089_v25 = vpop.f32.mrf.mxu1  ;;  %3780 = vmatmul.mubr.msk.f32.gmra.mxu1 %vm1339_vm2, %v5945_v1 }
 0x421   :  { %v1760_v37 = vpop.f32.mrf.mxu0  ;;  %3581 = vmatmul.mubr.msk.f32.gmra.mxu0 %vm1339_vm2, %v6011_v11  ;;  %3160 = vst [vmem:[#allocation2 + $0x4e0] sm:$0xff] %v2089_v25  ;;  %3782 = vmatprep.mubr.msk.f32.mxu1 %vm1339_vm2, %v5956_v55 }
 0x422   :  { %3228 = vst [vmem:[#allocation2 + $0x700] sm:$0xff] %v1760_v37  ;;  %2584 = vmatprep.mubr.f32.mxu0 %v6531_v61  ;;  %v2091_v47 = vpop.f32.mrf.mxu1 }
 0x423   :  { %v1762_v48 = vpop.f32.mrf.mxu0  ;;  %3161 = vst [vmem:[#allocation2 + $0x4e8] sm:$0xff] %v2091_v47 }
 0x424   :  { %3229 = vst [vmem:[#allocation2 + $0x708] sm:$0xff] %v1762_v48  ;;  %v2095_v21 = vpop.f32.mrf.mxu1  ;;  %3783 = vmatmul.mubr.msk.f32.gmra.mxu1 %vm1339_vm2, %v5967_v26 }
 0x425   :  { %v1766_v1 = vpop.f32.mrf.mxu0  ;;  %3582 = vmatmul.mubr.msk.f32.gmra.mxu0 %vm1339_vm2, %v6022_v38  ;;  %3167 = vst [vmem:[#allocation2 + $0x518] sm:$0xff] %v2095_v21  ;;  %3785 = vmatprep.mubr.msk.f32.mxu1 %vm1339_vm2, %v5978_v14 }
 0x426   :  { %3235 = vst [vmem:[#allocation2 + $0x738] sm:$0xff] %v1766_v1  ;;  %2590 = vmatprep.mubr.f32.mxu0 %v6531_v61  ;;  %v2097_v55 = vpop.f32.mrf.mxu1 }
 0x427   :  { %v1768_v16 = vpop.f32.mrf.mxu0  ;;  %3168 = vst [vmem:[#allocation2 + $0x520] sm:$0xff] %v2097_v55 }
 0x428   :  { %3236 = vst [vmem:[#allocation2 + $0x740] sm:$0xff] %v1768_v16  ;;  %v2101_v12 = vpop.f32.mrf.mxu1  ;;  %3786 = vmatmul.mubr.msk.f32.gmra.mxu1 %vm1339_vm2, %v5989_v8 }
 0x429   :  { %v1772_v26 = vpop.f32.mrf.mxu0  ;;  %3583 = vmatmul.mubr.msk.f32.gmra.mxu0 %vm1339_vm2, %v3856_v27  ;;  %3174 = vst [vmem:[#allocation2 + $0x550] sm:$0xff] %v2101_v12  ;;  %3788 = vmatprep.mubr.msk.f32.mxu1 %vm1339_vm2, %v6000_v45 }
 0x42a   :  { %3242 = vst [vmem:[#allocation2 + $0x770] sm:$0xff] %v1772_v26  ;;  %2596 = vmatprep.mubr.f32.mxu0 %v6531_v61  ;;  %v2103_v14 = vpop.f32.mrf.mxu1 }
 0x42b   :  { %v1774_v13 = vpop.f32.mrf.mxu0  ;;  %3175 = vst [vmem:[#allocation2 + $0x558] sm:$0xff] %v2103_v14 }
 0x42c   :  { %3243 = vst [vmem:[#allocation2 + $0x778] sm:$0xff] %v1774_v13  ;;  %v2107_v36 = vpop.f32.mrf.mxu1  ;;  %3789 = vmatmul.mubr.msk.f32.gmra.mxu1 %vm1339_vm2, %v6011_v11 }
 0x42d   :  { %v1778_v8 = vpop.f32.mrf.mxu0  ;;  %3584 = vmatmul.mubr.msk.f32.gmra.mxu0 %vm1339_vm2, %v3857_v39  ;;  %3181 = vst [vmem:[#allocation2 + $0x588] sm:$0xff] %v2107_v36  ;;  %3791 = vmatprep.mubr.msk.f32.mxu1 %vm1339_vm2, %v6022_v38 }
 0x42e   :  { %3249 = vst [vmem:[#allocation2 + $0x7a8] sm:$0xff] %v1778_v8  ;;  %2602 = vmatprep.mubr.f32.mxu0 %v6531_v61  ;;  %v2109_v45 = vpop.f32.mrf.mxu1 }
 0x42f   :  { %v1780_v59 = vpop.f32.mrf.mxu0  ;;  %3182 = vst [vmem:[#allocation2 + $0x590] sm:$0xff] %v2109_v45 }
 0x430   :  { %3250 = vst [vmem:[#allocation2 + $0x7b0] sm:$0xff] %v1780_v59  ;;  %v2113_v40 = vpop.f32.mrf.mxu1  ;;  %3792 = vmatmul.mubr.msk.f32.gmra.mxu1 %vm1339_vm2, %v3856_v27 }
 0x431   :  { %v1784_v11 = vpop.f32.mrf.mxu0  ;;  %3585 = vmatmul.mubr.msk.f32.gmra.mxu0 %vm1339_vm2, %v3858_v6  ;;  %3188 = vst [vmem:[#allocation2 + $0x5c0] sm:$0xff] %v2113_v40  ;;  %3794 = vmatprep.mubr.msk.f32.mxu1 %vm1339_vm2, %v3857_v39 }
 0x432   :  { %3256 = vst [vmem:[#allocation2 + $0x7e0] sm:$0xff] %v1784_v11  ;;  %2608 = vmatprep.mubr.f32.mxu0 %v6531_v61  ;;  %v2115_v38 = vpop.f32.mrf.mxu1 }
 0x433   :  { %v1786_v54 = vpop.f32.mrf.mxu0  ;;  %3189 = vst [vmem:[#allocation2 + $0x5c8] sm:$0xff] %v2115_v38 }
 0x434   :  { %3257 = vst [vmem:[#allocation2 + $0x7e8] sm:$0xff] %v1786_v54  ;;  %v2119_v18 = vpop.f32.mrf.mxu1  ;;  %3795 = vmatmul.mubr.msk.f32.gmra.mxu1 %vm1339_vm2, %v3858_v6 }
 0x435   :  { %v1790_v43 = vpop.f32.mrf.mxu0  ;;  %3586 = vmatmul.mubr.msk.f32.gmra.mxu0 %vm1339_vm2, %v3859_v28  ;;  %3195 = vst [vmem:[#allocation2 + $0x5f8] sm:$0xff] %v2119_v18  ;;  %3797 = vmatprep.mubr.msk.f32.mxu1 %vm1339_vm2, %v3859_v28 }
 0x436   :  { %3263 = vst [vmem:[#allocation2 + $0x818] sm:$0xff] %v1790_v43  ;;  %2614 = vmatprep.mubr.f32.mxu0 %v6531_v61  ;;  %v2121_v20 = vpop.f32.mrf.mxu1 }
 0x437   :  { %v1792_v52 = vpop.f32.mrf.mxu0  ;;  %3196 = vst [vmem:[#allocation2 + $0x600] sm:$0xff] %v2121_v20 }
 0x438   :  { %3264 = vst [vmem:[#allocation2 + $0x820] sm:$0xff] %v1792_v52  ;;  %v2125_v33 = vpop.f32.mrf.mxu1  ;;  %3798 = vmatmul.mubr.msk.f32.gmra.mxu1 %vm1339_vm2, %v3860_v58 }
 0x439   :  { %v1796_v44 = vpop.f32.mrf.mxu0  ;;  %3587 = vmatmul.mubr.msk.f32.gmra.mxu0 %vm1339_vm2, %v3860_v58  ;;  %3202 = vst [vmem:[#allocation2 + $0x630] sm:$0xff] %v2125_v33  ;;  %3800 = vmatprep.mubr.msk.f32.mxu1 %vm1339_vm2, %v3861_v22 }
 0x43a   :  { %3270 = vst [vmem:[#allocation2 + $0x850] sm:$0xff] %v1796_v44  ;;  %2620 = vmatprep.mubr.f32.mxu0 %v6531_v61  ;;  %v2127_v34 = vpop.f32.mrf.mxu1 }
 0x43b   :  { %v1798_v30 = vpop.f32.mrf.mxu0  ;;  %3203 = vst [vmem:[#allocation2 + $0x638] sm:$0xff] %v2127_v34 }
 0x43c   :  { %3271 = vst [vmem:[#allocation2 + $0x858] sm:$0xff] %v1798_v30  ;;  %v2131_v29 = vpop.f32.mrf.mxu1  ;;  %3801 = vmatmul.mubr.msk.f32.gmra.mxu1 %vm1339_vm2, %v3862_v46 }
 0x43d   :  { %v1802_v31 = vpop.f32.mrf.mxu0  ;;  %3588 = vmatmul.mubr.msk.f32.gmra.mxu0 %vm1339_vm2, %v3861_v22  ;;  %3209 = vst [vmem:[#allocation2 + $0x668] sm:$0xff] %v2131_v29  ;;  %3803 = vmatprep.mubr.msk.f32.mxu1 %vm1339_vm2, %v3863_v7 }
 0x43e   :  { %3277 = vst [vmem:[#allocation2 + $0x888] sm:$0xff] %v1802_v31  ;;  %2626 = vmatprep.mubr.f32.mxu0 %v6531_v61  ;;  %v2133_v15 = vpop.f32.mrf.mxu1 }
 0x43f   :  { %v1804_v63 = vpop.f32.mrf.mxu0  ;;  %3210 = vst [vmem:[#allocation2 + $0x670] sm:$0xff] %v2133_v15 }
 0x440   :  { %3278 = vst [vmem:[#allocation2 + $0x890] sm:$0xff] %v1804_v63  ;;  %v2137_v50 = vpop.f32.mrf.mxu1  ;;  %3804 = vmatmul.mubr.msk.f32.gmra.mxu1 %vm1339_vm2, %v3864_v42 }
 0x441   :  { %v1808_v53 = vpop.f32.mrf.mxu0  ;;  %3589 = vmatmul.mubr.msk.f32.gmra.mxu0 %vm1339_vm2, %v3862_v46  ;;  %3216 = vst [vmem:[#allocation2 + $0x6a0] sm:$0xff] %v2137_v50  ;;  %3806 = vmatprep.mubr.msk.f32.mxu1 %vm1339_vm2, %v3865_v57 }
 0x442   :  { %3284 = vst [vmem:[#allocation2 + $0x8c0] sm:$0xff] %v1808_v53  ;;  %2632 = vmatprep.mubr.f32.mxu0 %v6531_v61  ;;  %v2139_v2 = vpop.f32.mrf.mxu1 }
 0x443   :  { %v1810_v56 = vpop.f32.mrf.mxu0  ;;  %3217 = vst [vmem:[#allocation2 + $0x6a8] sm:$0xff] %v2139_v2 }
 0x444   :  { %3285 = vst [vmem:[#allocation2 + $0x8c8] sm:$0xff] %v1810_v56  ;;  %v2143_v60 = vpop.f32.mrf.mxu1  ;;  %3807 = vmatmul.mubr.msk.f32.gmra.mxu1 %vm1339_vm2, %v3866_v23 }
 0x445   :  { %v2346_v5 = vpop.f32.mrf.mxu0  ;;  %3590 = vmatmul.mubr.msk.f32.gmra.mxu0 %vm1339_vm2, %v3863_v7  ;;  %3223 = vst [vmem:[#allocation2 + $0x6d8] sm:$0xff] %v2143_v60  ;;  %3809 = vmatprep.mubr.msk.f32.mxu1 %vm1339_vm2, %v3867_v9 }
 0x446   :  { %3008 = vst [vmem:[#allocation2 + $0x20] sm:$0xff] %v2346_v5  ;;  %2638 = vmatprep.mubr.f32.mxu0 %v6531_v61  ;;  %v2145_v10 = vpop.f32.mrf.mxu1 }
 0x447   :  { %v2348_v3 = vpop.f32.mrf.mxu0  ;;  %3224 = vst [vmem:[#allocation2 + $0x6e0] sm:$0xff] %v2145_v10 }
 0x448   :  { %3009 = vst [vmem:[#allocation2 + $0x28] sm:$0xff] %v2348_v3  ;;  %v2149_v51 = vpop.f32.mrf.mxu1  ;;  %3810 = vmatmul.mubr.msk.f32.gmra.mxu1 %vm1339_vm2, %v3868_v4 }
 0x449   :  { %v2352_v32 = vpop.f32.mrf.mxu0  ;;  %3591 = vmatmul.mubr.msk.f32.gmra.mxu0 %vm1339_vm2, %v3864_v42  ;;  %3230 = vst [vmem:[#allocation2 + $0x710] sm:$0xff] %v2149_v51 }
 0x44a   :  { %3015 = vst [vmem:[#allocation2 + $0x58] sm:$0xff] %v2352_v32  ;;  %2644 = vmatprep.mubr.f32.mxu0 %v6531_v61  ;;  %v2151_v35 = vpop.f32.mrf.mxu1 }
 0x44b   :  { %v2354_v24 = vpop.f32.mrf.mxu0  ;;  %3231 = vst [vmem:[#allocation2 + $0x718] sm:$0xff] %v2151_v35 }
 0x44c   :  { %3016 = vst [vmem:[#allocation2 + $0x60] sm:$0xff] %v2354_v24  ;;  %v2155_v19 = vpop.f32.mrf.mxu1 }
 0x44d   :  { %v2358_v41 = vpop.f32.mrf.mxu0  ;;  %3592 = vmatmul.mubr.msk.f32.gmra.mxu0 %vm1339_vm2, %v3865_v57  ;;  %3237 = vst [vmem:[#allocation2 + $0x748] sm:$0xff] %v2155_v19 }
 0x44e   :  { %3022 = vst [vmem:[#allocation2 + $0x90] sm:$0xff] %v2358_v41  ;;  %2650 = vmatprep.mubr.f32.mxu0 %v6531_v61  ;;  %v2157_v62 = vpop.f32.mrf.mxu1 }
 0x44f   :  { %v2360_v49 = vpop.f32.mrf.mxu0  ;;  %3238 = vst [vmem:[#allocation2 + $0x750] sm:$0xff] %v2157_v62 }
 0x450   :  { %3023 = vst [vmem:[#allocation2 + $0x98] sm:$0xff] %v2360_v49  ;;  %v2161_v0 = vpop.f32.mrf.mxu1 }
 0x451   :  { %v2364_v17 = vpop.f32.mrf.mxu0  ;;  %3593 = vmatmul.mubr.msk.f32.gmra.mxu0 %vm1339_vm2, %v3866_v23  ;;  %3244 = vst [vmem:[#allocation2 + $0x780] sm:$0xff] %v2161_v0 }
 0x452   :  { %3029 = vst [vmem:[#allocation2 + $0xc8] sm:$0xff] %v2364_v17  ;;  %2656 = vmatprep.mubr.f32.mxu0 %v6531_v61  ;;  %v2163_v25 = vpop.f32.mrf.mxu1 }
 0x453   :  { %v2366_v37 = vpop.f32.mrf.mxu0  ;;  %3245 = vst [vmem:[#allocation2 + $0x788] sm:$0xff] %v2163_v25 }
 0x454   :  { %3030 = vst [vmem:[#allocation2 + $0xd0] sm:$0xff] %v2366_v37  ;;  %v2167_v47 = vpop.f32.mrf.mxu1 }
 0x455   :  { %v2370_v48 = vpop.f32.mrf.mxu0  ;;  %3594 = vmatmul.mubr.msk.f32.gmra.mxu0 %vm1339_vm2, %v3867_v9  ;;  %3251 = vst [vmem:[#allocation2 + $0x7b8] sm:$0xff] %v2167_v47 }
 0x456   :  { %3036 = vst [vmem:[#allocation2 + $0x100] sm:$0xff] %v2370_v48  ;;  %2662 = vmatprep.mubr.f32.mxu0 %v6531_v61  ;;  %v2169_v21 = vpop.f32.mrf.mxu1 }
 0x457   :  { %v2372_v1 = vpop.f32.mrf.mxu0  ;;  %3252 = vst [vmem:[#allocation2 + $0x7c0] sm:$0xff] %v2169_v21 }
 0x458   :  { %3037 = vst [vmem:[#allocation2 + $0x108] sm:$0xff] %v2372_v1  ;;  %v2173_v55 = vpop.f32.mrf.mxu1 }
 0x459   :  { %v2376_v16 = vpop.f32.mrf.mxu0  ;;  %3595 = vmatmul.mubr.msk.f32.gmra.mxu0 %vm1339_vm2, %v3868_v4  ;;  %3258 = vst [vmem:[#allocation2 + $0x7f0] sm:$0xff] %v2173_v55 }
 0x45a   :  { %3043 = vst [vmem:[#allocation2 + $0x138] sm:$0xff] %v2376_v16  ;;  %v2175_v12 = vpop.f32.mrf.mxu1 }
 0x45b   :  { %v2378_v26 = vpop.f32.mrf.mxu0  ;;  %3259 = vst [vmem:[#allocation2 + $0x7f8] sm:$0xff] %v2175_v12 }
 0x45c   :  { %3044 = vst [vmem:[#allocation2 + $0x140] sm:$0xff] %v2378_v26  ;;  %v2179_v27 = vpop.f32.mrf.mxu1 }
 0x45d   :  { %v2382_v14 = vpop.f32.mrf.mxu0  ;;  %3265 = vst [vmem:[#allocation2 + $0x828] sm:$0xff] %v2179_v27 }
 0x45e   :  { %3050 = vst [vmem:[#allocation2 + $0x170] sm:$0xff] %v2382_v14  ;;  %v2181_v13 = vpop.f32.mrf.mxu1 }
 0x45f   :  { %v2384_v61 = vpop.f32.mrf.mxu0  ;;  %3266 = vst [vmem:[#allocation2 + $0x830] sm:$0xff] %v2181_v13 }
 0x460   :  { %3051 = vst [vmem:[#allocation2 + $0x178] sm:$0xff] %v2384_v61  ;;  %v2185_v36 = vpop.f32.mrf.mxu1 }
 0x461   :  { %v2388_v8 = vpop.f32.mrf.mxu0  ;;  %3272 = vst [vmem:[#allocation2 + $0x860] sm:$0xff] %v2185_v36 }
 0x462   :  { %3057 = vst [vmem:[#allocation2 + $0x1a8] sm:$0xff] %v2388_v8  ;;  %v2187_v39 = vpop.f32.mrf.mxu1 }
 0x463   :  { %v2390_v45 = vpop.f32.mrf.mxu0  ;;  %3273 = vst [vmem:[#allocation2 + $0x868] sm:$0xff] %v2187_v39 }
 0x464   :  { %3058 = vst [vmem:[#allocation2 + $0x1b0] sm:$0xff] %v2390_v45  ;;  %v2191_v59 = vpop.f32.mrf.mxu1 }
 0x465   :  { %v2394_v40 = vpop.f32.mrf.mxu0  ;;  %3279 = vst [vmem:[#allocation2 + $0x898] sm:$0xff] %v2191_v59 }
 0x466   :  { %3064 = vst [vmem:[#allocation2 + $0x1e0] sm:$0xff] %v2394_v40  ;;  %v2193_v11 = vpop.f32.mrf.mxu1 }
 0x467   :  { %v2396_v6 = vpop.f32.mrf.mxu0  ;;  %3280 = vst [vmem:[#allocation2 + $0x8a0] sm:$0xff] %v2193_v11 }
 0x468   :  { %3065 = vst [vmem:[#allocation2 + $0x1e8] sm:$0xff] %v2396_v6  ;;  %v2197_v38 = vpop.f32.mrf.mxu1 }
 0x469   :  { %v2400_v54 = vpop.f32.mrf.mxu0  ;;  %3286 = vst [vmem:[#allocation2 + $0x8d0] sm:$0xff] %v2197_v38 }
 0x46a   :  { %3071 = vst [vmem:[#allocation2 + $0x218] sm:$0xff] %v2400_v54  ;;  %v2199_v18 = vpop.f32.mrf.mxu1 }
 0x46b   :  { %v2402_v43 = vpop.f32.mrf.mxu0  ;;  %3287 = vst [vmem:[#allocation2 + $0x8d8] sm:$0xff] %v2199_v18 }
 0x46c   :  { %3072 = vst [vmem:[#allocation2 + $0x220] sm:$0xff] %v2402_v43  ;;  %v2203_v28 = vpop.f32.mrf.mxu1 }
 0x46d   :  { %v2406_v20 = vpop.f32.mrf.mxu0  ;;  %3293 = vst [vmem:[#allocation2 + $0x908] sm:$0xff] %v2203_v28 }
 0x46e   :  { %3078 = vst [vmem:[#allocation2 + $0x250] sm:$0xff] %v2406_v20  ;;  %v2205_v52 = vpop.f32.mrf.mxu1 }
 0x46f   :  { %v2408_v33 = vpop.f32.mrf.mxu0  ;;  %3294 = vst [vmem:[#allocation2 + $0x910] sm:$0xff] %v2205_v52 }
 0x470   :  { %3079 = vst [vmem:[#allocation2 + $0x258] sm:$0xff] %v2408_v33  ;;  %v2209_v58 = vpop.f32.mrf.mxu1 }
 0x471   :  { %v2412_v44 = vpop.f32.mrf.mxu0  ;;  %3300 = vst [vmem:[#allocation2 + $0x940] sm:$0xff] %v2209_v58 }
 0x472   :  { %3085 = vst [vmem:[#allocation2 + $0x288] sm:$0xff] %v2412_v44  ;;  %v2211_v22 = vpop.f32.mrf.mxu1 }
 0x473   :  { %v2414_v34 = vpop.f32.mrf.mxu0  ;;  %3301 = vst [vmem:[#allocation2 + $0x948] sm:$0xff] %v2211_v22 }
 0x474   :  { %3086 = vst [vmem:[#allocation2 + $0x290] sm:$0xff] %v2414_v34  ;;  %v2215_v30 = vpop.f32.mrf.mxu1 }
 0x475   :  { %v2418_v29 = vpop.f32.mrf.mxu0  ;;  %3307 = vst [vmem:[#allocation2 + $0x978] sm:$0xff] %v2215_v30 }
 0x476   :  { %3092 = vst [vmem:[#allocation2 + $0x2c0] sm:$0xff] %v2418_v29  ;;  %v2217_v46 = vpop.f32.mrf.mxu1 }
 0x477   :  { %v2420_v31 = vpop.f32.mrf.mxu0  ;;  %3308 = vst [vmem:[#allocation2 + $0x980] sm:$0xff] %v2217_v46 }
 0x478   :  { %3093 = vst [vmem:[#allocation2 + $0x2c8] sm:$0xff] %v2420_v31  ;;  %v2221_v7 = vpop.f32.mrf.mxu1 }
 0x479   :  { %v2424_v15 = vpop.f32.mrf.mxu0  ;;  %3314 = vst [vmem:[#allocation2 + $0x9b0] sm:$0xff] %v2221_v7 }
 0x47a   :  { %3099 = vst [vmem:[#allocation2 + $0x2f8] sm:$0xff] %v2424_v15  ;;  %v2223_v63 = vpop.f32.mrf.mxu1 }
 0x47b   :  { %v2426_v50 = vpop.f32.mrf.mxu0  ;;  %3315 = vst [vmem:[#allocation2 + $0x9b8] sm:$0xff] %v2223_v63 }
 0x47c   :  { %3100 = vst [vmem:[#allocation2 + $0x300] sm:$0xff] %v2426_v50  ;;  %v2227_v42 = vpop.f32.mrf.mxu1 }
 0x47d   :  { %v2430_v53 = vpop.f32.mrf.mxu0  ;;  %3321 = vst [vmem:[#allocation2 + $0x9e8] sm:$0xff] %v2227_v42 }
 0x47e   :  { %3106 = vst [vmem:[#allocation2 + $0x330] sm:$0xff] %v2430_v53  ;;  %v2229_v57 = vpop.f32.mrf.mxu1 }
 0x47f   :  { %v2432_v2 = vpop.f32.mrf.mxu0  ;;  %3322 = vst [vmem:[#allocation2 + $0x9f0] sm:$0xff] %v2229_v57 }
 0x480   :  { %3107 = vst [vmem:[#allocation2 + $0x338] sm:$0xff] %v2432_v2  ;;  %v2233_v56 = vpop.f32.mrf.mxu1 }
 0x481   :  { %v2436_v60 = vpop.f32.mrf.mxu0  ;;  %3328 = vst [vmem:[#allocation2 + $0xa20] sm:$0xff] %v2233_v56 }
 0x482   :  { %3113 = vst [vmem:[#allocation2 + $0x368] sm:$0xff] %v2436_v60  ;;  %v2235_v23 = vpop.f32.mrf.mxu1 }
 0x483   :  { %v2438_v5 = vpop.f32.mrf.mxu0  ;;  %3329 = vst [vmem:[#allocation2 + $0xa28] sm:$0xff] %v2235_v23 }
 0x484   :  { %3114 = vst [vmem:[#allocation2 + $0x370] sm:$0xff] %v2438_v5  ;;  %v2239_v9 = vpop.f32.mrf.mxu1 }
 0x485   :  { %v2442_v10 = vpop.f32.mrf.mxu0  ;;  %3335 = vst [vmem:[#allocation2 + $0xa58] sm:$0xff] %v2239_v9 }
 0x486   :  { %3120 = vst [vmem:[#allocation2 + $0x3a0] sm:$0xff] %v2442_v10  ;;  %v2241_v3 = vpop.f32.mrf.mxu1 }
 0x487   :  { %v2444_v51 = vpop.f32.mrf.mxu0  ;;  %3336 = vst [vmem:[#allocation2 + $0xa60] sm:$0xff] %v2241_v3 }
 0x488   :  { %3121 = vst [vmem:[#allocation2 + $0x3a8] sm:$0xff] %v2444_v51  ;;  %v2245_v4 = vpop.f32.mrf.mxu1 }
 0x489   :  { %v2448_v32 = vpop.f32.mrf.mxu0  ;;  %3342 = vst [vmem:[#allocation2 + $0xa90] sm:$0xff] %v2245_v4 }
 0x48a   :  { %3127 = vst [vmem:[#allocation2 + $0x3d8] sm:$0xff] %v2448_v32  ;;  %v2247_v35 = vpop.f32.mrf.mxu1 }
 0x48b   :  { %v2450_v24 = vpop.f32.mrf.mxu0  ;;  %3343 = vst [vmem:[#allocation2 + $0xa98] sm:$0xff] %v2247_v35 }
 0x48c   :  { %3128 = vst [vmem:[#allocation2 + $0x3e0] sm:$0xff] %v2450_v24  ;;  %v2251_v19 = vpop.f32.mrf.mxu1 }
 0x48d   :  { %v2454_v41 = vpop.f32.mrf.mxu0  ;;  %3349 = vst [vmem:[#allocation2 + $0xac8] sm:$0xff] %v2251_v19 }
 0x48e   :  { %3134 = vst [vmem:[#allocation2 + $0x410] sm:$0xff] %v2454_v41  ;;  %v2253_v62 = vpop.f32.mrf.mxu1 }
 0x48f   :  { %v2456_v49 = vpop.f32.mrf.mxu0  ;;  %3350 = vst [vmem:[#allocation2 + $0xad0] sm:$0xff] %v2253_v62 }
 0x490   :  { %3135 = vst [vmem:[#allocation2 + $0x418] sm:$0xff] %v2456_v49  ;;  %v2257_v0 = vpop.f32.mrf.mxu1 }
 0x491   :  { %v2460_v17 = vpop.f32.mrf.mxu0  ;;  %3356 = vst [vmem:[#allocation2 + $0xb00] sm:$0xff] %v2257_v0 }
 0x492   :  { %3141 = vst [vmem:[#allocation2 + $0x448] sm:$0xff] %v2460_v17  ;;  %v2259_v25 = vpop.f32.mrf.mxu1 }
 0x493   :  { %v2462_v37 = vpop.f32.mrf.mxu0  ;;  %3357 = vst [vmem:[#allocation2 + $0xb08] sm:$0xff] %v2259_v25 }
 0x494   :  { %3142 = vst [vmem:[#allocation2 + $0x450] sm:$0xff] %v2462_v37  ;;  %v2263_v47 = vpop.f32.mrf.mxu1 }
 0x495   :  { %v2466_v48 = vpop.f32.mrf.mxu0  ;;  %3363 = vst [vmem:[#allocation2 + $0xb38] sm:$0xff] %v2263_v47 }
 0x496   :  { %3148 = vst [vmem:[#allocation2 + $0x480] sm:$0xff] %v2466_v48  ;;  %v2265_v21 = vpop.f32.mrf.mxu1 }
 0x497   :  { %v2468_v1 = vpop.f32.mrf.mxu0  ;;  %3364 = vst [vmem:[#allocation2 + $0xb40] sm:$0xff] %v2265_v21 }
 0x498   :  { %3149 = vst [vmem:[#allocation2 + $0x488] sm:$0xff] %v2468_v1  ;;  %v2269_v55 = vpop.f32.mrf.mxu1 }
 0x499   :  { %v2472_v16 = vpop.f32.mrf.mxu0  ;;  %3370 = vst [vmem:[#allocation2 + $0xb70] sm:$0xff] %v2269_v55 }
 0x49a   :  { %3155 = vst [vmem:[#allocation2 + $0x4b8] sm:$0xff] %v2472_v16  ;;  %v2271_v12 = vpop.f32.mrf.mxu1 }
 0x49b   :  { %v2474_v26 = vpop.f32.mrf.mxu0  ;;  %3371 = vst [vmem:[#allocation2 + $0xb78] sm:$0xff] %v2271_v12 }
 0x49c   :  { %3156 = vst [vmem:[#allocation2 + $0x4c0] sm:$0xff] %v2474_v26  ;;  %v2275_v27 = vpop.f32.mrf.mxu1 }
 0x49d   :  { %v2478_v14 = vpop.f32.mrf.mxu0  ;;  %3377 = vst [vmem:[#allocation2 + $0xba8] sm:$0xff] %v2275_v27 }
 0x49e   :  { %3162 = vst [vmem:[#allocation2 + $0x4f0] sm:$0xff] %v2478_v14  ;;  %v2277_v13 = vpop.f32.mrf.mxu1 }
 0x49f   :  { %v2480_v61 = vpop.f32.mrf.mxu0  ;;  %3378 = vst [vmem:[#allocation2 + $0xbb0] sm:$0xff] %v2277_v13 }
 0x4a0   :  { %3163 = vst [vmem:[#allocation2 + $0x4f8] sm:$0xff] %v2480_v61  ;;  %v3733_v36 = vpop.f32.mrf.mxu1 }
 0x4a1   :  { %v2484_v8 = vpop.f32.mrf.mxu0  ;;  %3017 = vst.msk [vmem:[#allocation2 + $0x68] sm:$0xff] %vm749_vm1, %v3733_v36 }
 0x4a2   :  { %3169 = vst [vmem:[#allocation2 + $0x528] sm:$0xff] %v2484_v8  ;;  %v2735_v39 = vpop.f32.mrf.mxu1 }
 0x4a3   :  { %v2486_v45 = vpop.f32.mrf.mxu0  ;;  %3010 = vst.msk [vmem:[#allocation2 + $0x30] sm:$0xff] %vm749_vm1, %v2735_v39 }
 0x4a4   :  { %3170 = vst [vmem:[#allocation2 + $0x530] sm:$0xff] %v2486_v45  ;;  %v3736_v59 = vpop.f32.mrf.mxu1 }
 0x4a5   :  { %v2490_v40 = vpop.f32.mrf.mxu0  ;;  %3031 = vst.msk [vmem:[#allocation2 + $0xd8] sm:$0xff] %vm749_vm1, %v3736_v59 }
 0x4a6   :  { %3176 = vst [vmem:[#allocation2 + $0x560] sm:$0xff] %v2490_v40  ;;  %v2745_v11 = vpop.f32.mrf.mxu1 }
 0x4a7   :  { %v2492_v6 = vpop.f32.mrf.mxu0  ;;  %3024 = vst.msk [vmem:[#allocation2 + $0xa0] sm:$0xff] %vm749_vm1, %v2745_v11 }
 0x4a8   :  { %3177 = vst [vmem:[#allocation2 + $0x568] sm:$0xff] %v2492_v6  ;;  %v3739_v38 = vpop.f32.mrf.mxu1 }
 0x4a9   :  { %v2496_v54 = vpop.f32.mrf.mxu0  ;;  %3045 = vst.msk [vmem:[#allocation2 + $0x148] sm:$0xff] %vm749_vm1, %v3739_v38 }
 0x4aa   :  { %3183 = vst [vmem:[#allocation2 + $0x598] sm:$0xff] %v2496_v54  ;;  %v2755_v18 = vpop.f32.mrf.mxu1 }
 0x4ab   :  { %v2498_v43 = vpop.f32.mrf.mxu0  ;;  %3038 = vst.msk [vmem:[#allocation2 + $0x110] sm:$0xff] %vm749_vm1, %v2755_v18 }
 0x4ac   :  { %3184 = vst [vmem:[#allocation2 + $0x5a0] sm:$0xff] %v2498_v43  ;;  %v3742_v28 = vpop.f32.mrf.mxu1 }
 0x4ad   :  { %v2502_v20 = vpop.f32.mrf.mxu0  ;;  %3059 = vst.msk [vmem:[#allocation2 + $0x1b8] sm:$0xff] %vm749_vm1, %v3742_v28 }
 0x4ae   :  { %3190 = vst [vmem:[#allocation2 + $0x5d0] sm:$0xff] %v2502_v20  ;;  %v2765_v52 = vpop.f32.mrf.mxu1 }
 0x4af   :  { %v2504_v33 = vpop.f32.mrf.mxu0  ;;  %3052 = vst.msk [vmem:[#allocation2 + $0x180] sm:$0xff] %vm749_vm1, %v2765_v52 }
 0x4b0   :  { %3191 = vst [vmem:[#allocation2 + $0x5d8] sm:$0xff] %v2504_v33  ;;  %v3745_v58 = vpop.f32.mrf.mxu1 }
 0x4b1   :  { %v2508_v44 = vpop.f32.mrf.mxu0  ;;  %3073 = vst.msk [vmem:[#allocation2 + $0x228] sm:$0xff] %vm749_vm1, %v3745_v58 }
 0x4b2   :  { %3197 = vst [vmem:[#allocation2 + $0x608] sm:$0xff] %v2508_v44  ;;  %v2775_v22 = vpop.f32.mrf.mxu1 }
 0x4b3   :  { %v2510_v34 = vpop.f32.mrf.mxu0  ;;  %3066 = vst.msk [vmem:[#allocation2 + $0x1f0] sm:$0xff] %vm749_vm1, %v2775_v22 }
 0x4b4   :  { %3198 = vst [vmem:[#allocation2 + $0x610] sm:$0xff] %v2510_v34  ;;  %v3748_v30 = vpop.f32.mrf.mxu1 }
 0x4b5   :  { %v2514_v29 = vpop.f32.mrf.mxu0  ;;  %3087 = vst.msk [vmem:[#allocation2 + $0x298] sm:$0xff] %vm749_vm1, %v3748_v30 }
 0x4b6   :  { %3204 = vst [vmem:[#allocation2 + $0x640] sm:$0xff] %v2514_v29  ;;  %v2785_v46 = vpop.f32.mrf.mxu1 }
 0x4b7   :  { %v2516_v31 = vpop.f32.mrf.mxu0  ;;  %3080 = vst.msk [vmem:[#allocation2 + $0x260] sm:$0xff] %vm749_vm1, %v2785_v46 }
 0x4b8   :  { %3205 = vst [vmem:[#allocation2 + $0x648] sm:$0xff] %v2516_v31  ;;  %v3751_v7 = vpop.f32.mrf.mxu1 }
 0x4b9   :  { %v2520_v15 = vpop.f32.mrf.mxu0  ;;  %3101 = vst.msk [vmem:[#allocation2 + $0x308] sm:$0xff] %vm749_vm1, %v3751_v7 }
 0x4ba   :  { %3211 = vst [vmem:[#allocation2 + $0x678] sm:$0xff] %v2520_v15  ;;  %v2795_v63 = vpop.f32.mrf.mxu1 }
 0x4bb   :  { %v2522_v50 = vpop.f32.mrf.mxu0  ;;  %3094 = vst.msk [vmem:[#allocation2 + $0x2d0] sm:$0xff] %vm749_vm1, %v2795_v63 }
 0x4bc   :  { %3212 = vst [vmem:[#allocation2 + $0x680] sm:$0xff] %v2522_v50  ;;  %v3754_v42 = vpop.f32.mrf.mxu1 }
 0x4bd   :  { %v2526_v53 = vpop.f32.mrf.mxu0  ;;  %3115 = vst.msk [vmem:[#allocation2 + $0x378] sm:$0xff] %vm749_vm1, %v3754_v42 }
 0x4be   :  { %3218 = vst [vmem:[#allocation2 + $0x6b0] sm:$0xff] %v2526_v53  ;;  %v2805_v57 = vpop.f32.mrf.mxu1 }
 0x4bf   :  { %v2528_v2 = vpop.f32.mrf.mxu0  ;;  %3108 = vst.msk [vmem:[#allocation2 + $0x340] sm:$0xff] %vm749_vm1, %v2805_v57 }
 0x4c0   :  { %3219 = vst [vmem:[#allocation2 + $0x6b8] sm:$0xff] %v2528_v2  ;;  %v3757_v56 = vpop.f32.mrf.mxu1 }
 0x4c1   :  { %v2532_v60 = vpop.f32.mrf.mxu0  ;;  %3129 = vst.msk [vmem:[#allocation2 + $0x3e8] sm:$0xff] %vm749_vm1, %v3757_v56 }
 0x4c2   :  { %3225 = vst [vmem:[#allocation2 + $0x6e8] sm:$0xff] %v2532_v60  ;;  %v2815_v23 = vpop.f32.mrf.mxu1 }
 0x4c3   :  { %v2534_v5 = vpop.f32.mrf.mxu0  ;;  %3122 = vst.msk [vmem:[#allocation2 + $0x3b0] sm:$0xff] %vm749_vm1, %v2815_v23 }
 0x4c4   :  { %3226 = vst [vmem:[#allocation2 + $0x6f0] sm:$0xff] %v2534_v5  ;;  %v3760_v9 = vpop.f32.mrf.mxu1 }
 0x4c5   :  { %v2538_v10 = vpop.f32.mrf.mxu0  ;;  %3143 = vst.msk [vmem:[#allocation2 + $0x458] sm:$0xff] %vm749_vm1, %v3760_v9 }
 0x4c6   :  { %3232 = vst [vmem:[#allocation2 + $0x720] sm:$0xff] %v2538_v10  ;;  %v2825_v3 = vpop.f32.mrf.mxu1 }
 0x4c7   :  { %v2540_v51 = vpop.f32.mrf.mxu0  ;;  %3136 = vst.msk [vmem:[#allocation2 + $0x420] sm:$0xff] %vm749_vm1, %v2825_v3 }
 0x4c8   :  { %3233 = vst [vmem:[#allocation2 + $0x728] sm:$0xff] %v2540_v51  ;;  %v3763_v4 = vpop.f32.mrf.mxu1 }
 0x4c9   :  { %v2544_v32 = vpop.f32.mrf.mxu0  ;;  %3157 = vst.msk [vmem:[#allocation2 + $0x4c8] sm:$0xff] %vm749_vm1, %v3763_v4 }
 0x4ca   :  { %3239 = vst [vmem:[#allocation2 + $0x758] sm:$0xff] %v2544_v32  ;;  %v2835_v35 = vpop.f32.mrf.mxu1 }
 0x4cb   :  { %v2546_v24 = vpop.f32.mrf.mxu0  ;;  %3150 = vst.msk [vmem:[#allocation2 + $0x490] sm:$0xff] %vm749_vm1, %v2835_v35 }
 0x4cc   :  { %3240 = vst [vmem:[#allocation2 + $0x760] sm:$0xff] %v2546_v24  ;;  %v3766_v19 = vpop.f32.mrf.mxu1 }
 0x4cd   :  { %v2550_v41 = vpop.f32.mrf.mxu0  ;;  %3171 = vst.msk [vmem:[#allocation2 + $0x538] sm:$0xff] %vm749_vm1, %v3766_v19 }
 0x4ce   :  { %3246 = vst [vmem:[#allocation2 + $0x790] sm:$0xff] %v2550_v41  ;;  %v2845_v62 = vpop.f32.mrf.mxu1 }
 0x4cf   :  { %v2552_v49 = vpop.f32.mrf.mxu0  ;;  %3164 = vst.msk [vmem:[#allocation2 + $0x500] sm:$0xff] %vm749_vm1, %v2845_v62 }
 0x4d0   :  { %3247 = vst [vmem:[#allocation2 + $0x798] sm:$0xff] %v2552_v49  ;;  %v3769_v0 = vpop.f32.mrf.mxu1 }
 0x4d1   :  { %v2556_v17 = vpop.f32.mrf.mxu0  ;;  %3185 = vst.msk [vmem:[#allocation2 + $0x5a8] sm:$0xff] %vm749_vm1, %v3769_v0 }
 0x4d2   :  { %3253 = vst [vmem:[#allocation2 + $0x7c8] sm:$0xff] %v2556_v17  ;;  %v2855_v25 = vpop.f32.mrf.mxu1 }
 0x4d3   :  { %v2558_v37 = vpop.f32.mrf.mxu0  ;;  %3178 = vst.msk [vmem:[#allocation2 + $0x570] sm:$0xff] %vm749_vm1, %v2855_v25 }
 0x4d4   :  { %3254 = vst [vmem:[#allocation2 + $0x7d0] sm:$0xff] %v2558_v37  ;;  %v3772_v47 = vpop.f32.mrf.mxu1 }
 0x4d5   :  { %v2562_v48 = vpop.f32.mrf.mxu0  ;;  %3199 = vst.msk [vmem:[#allocation2 + $0x618] sm:$0xff] %vm749_vm1, %v3772_v47 }
 0x4d6   :  { %3260 = vst [vmem:[#allocation2 + $0x800] sm:$0xff] %v2562_v48  ;;  %v2865_v21 = vpop.f32.mrf.mxu1 }
 0x4d7   :  { %v2564_v1 = vpop.f32.mrf.mxu0  ;;  %3192 = vst.msk [vmem:[#allocation2 + $0x5e0] sm:$0xff] %vm749_vm1, %v2865_v21 }
 0x4d8   :  { %3261 = vst [vmem:[#allocation2 + $0x808] sm:$0xff] %v2564_v1  ;;  %v3775_v55 = vpop.f32.mrf.mxu1 }
 0x4d9   :  { %v2568_v16 = vpop.f32.mrf.mxu0  ;;  %3213 = vst.msk [vmem:[#allocation2 + $0x688] sm:$0xff] %vm749_vm1, %v3775_v55 }
 0x4da   :  { %3267 = vst [vmem:[#allocation2 + $0x838] sm:$0xff] %v2568_v16  ;;  %v2875_v12 = vpop.f32.mrf.mxu1 }
 0x4db   :  { %v2570_v26 = vpop.f32.mrf.mxu0  ;;  %3206 = vst.msk [vmem:[#allocation2 + $0x650] sm:$0xff] %vm749_vm1, %v2875_v12 }
 0x4dc   :  { %3268 = vst [vmem:[#allocation2 + $0x840] sm:$0xff] %v2570_v26  ;;  %v3778_v27 = vpop.f32.mrf.mxu1 }
 0x4dd   :  { %v2574_v14 = vpop.f32.mrf.mxu0  ;;  %3227 = vst.msk [vmem:[#allocation2 + $0x6f8] sm:$0xff] %vm749_vm1, %v3778_v27 }
 0x4de   :  { %3274 = vst [vmem:[#allocation2 + $0x870] sm:$0xff] %v2574_v14  ;;  %v2885_v13 = vpop.f32.mrf.mxu1 }
 0x4df   :  { %v2576_v61 = vpop.f32.mrf.mxu0  ;;  %3220 = vst.msk [vmem:[#allocation2 + $0x6c0] sm:$0xff] %vm749_vm1, %v2885_v13 }
 0x4e0   :  { %3275 = vst [vmem:[#allocation2 + $0x878] sm:$0xff] %v2576_v61  ;;  %v3781_v36 = vpop.f32.mrf.mxu1 }
 0x4e1   :  { %v2580_v8 = vpop.f32.mrf.mxu0  ;;  %3241 = vst.msk [vmem:[#allocation2 + $0x768] sm:$0xff] %vm749_vm1, %v3781_v36 }
 0x4e2   :  { %3281 = vst [vmem:[#allocation2 + $0x8a8] sm:$0xff] %v2580_v8  ;;  %v2895_v39 = vpop.f32.mrf.mxu1 }
 0x4e3   :  { %v2582_v45 = vpop.f32.mrf.mxu0  ;;  %3234 = vst.msk [vmem:[#allocation2 + $0x730] sm:$0xff] %vm749_vm1, %v2895_v39 }
 0x4e4   :  { %3282 = vst [vmem:[#allocation2 + $0x8b0] sm:$0xff] %v2582_v45  ;;  %v3784_v59 = vpop.f32.mrf.mxu1 }
 0x4e5   :  { %v2586_v40 = vpop.f32.mrf.mxu0  ;;  %3255 = vst.msk [vmem:[#allocation2 + $0x7d8] sm:$0xff] %vm749_vm1, %v3784_v59 }
 0x4e6   :  { %3288 = vst [vmem:[#allocation2 + $0x8e0] sm:$0xff] %v2586_v40  ;;  %v2905_v11 = vpop.f32.mrf.mxu1 }
 0x4e7   :  { %v2588_v6 = vpop.f32.mrf.mxu0  ;;  %3248 = vst.msk [vmem:[#allocation2 + $0x7a0] sm:$0xff] %vm749_vm1, %v2905_v11 }
 0x4e8   :  { %3289 = vst [vmem:[#allocation2 + $0x8e8] sm:$0xff] %v2588_v6  ;;  %v3787_v38 = vpop.f32.mrf.mxu1 }
 0x4e9   :  { %v2592_v54 = vpop.f32.mrf.mxu0  ;;  %3269 = vst.msk [vmem:[#allocation2 + $0x848] sm:$0xff] %vm749_vm1, %v3787_v38 }
 0x4ea   :  { %3295 = vst [vmem:[#allocation2 + $0x918] sm:$0xff] %v2592_v54  ;;  %v2915_v18 = vpop.f32.mrf.mxu1 }
 0x4eb   :  { %v2594_v43 = vpop.f32.mrf.mxu0  ;;  %3262 = vst.msk [vmem:[#allocation2 + $0x810] sm:$0xff] %vm749_vm1, %v2915_v18 }
 0x4ec   :  { %3296 = vst [vmem:[#allocation2 + $0x920] sm:$0xff] %v2594_v43  ;;  %v3790_v28 = vpop.f32.mrf.mxu1 }
 0x4ed   :  { %v2598_v20 = vpop.f32.mrf.mxu0  ;;  %3283 = vst.msk [vmem:[#allocation2 + $0x8b8] sm:$0xff] %vm749_vm1, %v3790_v28 }
 0x4ee   :  { %3302 = vst [vmem:[#allocation2 + $0x950] sm:$0xff] %v2598_v20  ;;  %v2925_v52 = vpop.f32.mrf.mxu1 }
 0x4ef   :  { %v2600_v33 = vpop.f32.mrf.mxu0  ;;  %3276 = vst.msk [vmem:[#allocation2 + $0x880] sm:$0xff] %vm749_vm1, %v2925_v52 }
 0x4f0   :  { %3303 = vst [vmem:[#allocation2 + $0x958] sm:$0xff] %v2600_v33  ;;  %v3793_v58 = vpop.f32.mrf.mxu1 }
 0x4f1   :  { %v2604_v44 = vpop.f32.mrf.mxu0  ;;  %3297 = vst.msk [vmem:[#allocation2 + $0x928] sm:$0xff] %vm749_vm1, %v3793_v58 }
 0x4f2   :  { %3309 = vst [vmem:[#allocation2 + $0x988] sm:$0xff] %v2604_v44  ;;  %v2935_v22 = vpop.f32.mrf.mxu1 }
 0x4f3   :  { %v2606_v34 = vpop.f32.mrf.mxu0  ;;  %3290 = vst.msk [vmem:[#allocation2 + $0x8f0] sm:$0xff] %vm749_vm1, %v2935_v22 }
 0x4f4   :  { %3310 = vst [vmem:[#allocation2 + $0x990] sm:$0xff] %v2606_v34  ;;  %v3796_v30 = vpop.f32.mrf.mxu1 }
 0x4f5   :  { %v2610_v29 = vpop.f32.mrf.mxu0  ;;  %3311 = vst.msk [vmem:[#allocation2 + $0x998] sm:$0xff] %vm749_vm1, %v3796_v30 }
 0x4f6   :  { %3316 = vst [vmem:[#allocation2 + $0x9c0] sm:$0xff] %v2610_v29  ;;  %v2945_v46 = vpop.f32.mrf.mxu1 }
 0x4f7   :  { %v2612_v31 = vpop.f32.mrf.mxu0  ;;  %3304 = vst.msk [vmem:[#allocation2 + $0x960] sm:$0xff] %vm749_vm1, %v2945_v46 }
 0x4f8   :  { %3317 = vst [vmem:[#allocation2 + $0x9c8] sm:$0xff] %v2612_v31  ;;  %v3799_v7 = vpop.f32.mrf.mxu1 }
 0x4f9   :  { %v2616_v15 = vpop.f32.mrf.mxu0  ;;  %3325 = vst.msk [vmem:[#allocation2 + $0xa08] sm:$0xff] %vm749_vm1, %v3799_v7 }
 0x4fa   :  { %3323 = vst [vmem:[#allocation2 + $0x9f8] sm:$0xff] %v2616_v15  ;;  %v2955_v63 = vpop.f32.mrf.mxu1 }
 0x4fb   :  { %v2618_v50 = vpop.f32.mrf.mxu0  ;;  %3318 = vst.msk [vmem:[#allocation2 + $0x9d0] sm:$0xff] %vm749_vm1, %v2955_v63 }
 0x4fc   :  { %3324 = vst [vmem:[#allocation2 + $0xa00] sm:$0xff] %v2618_v50  ;;  %v3802_v42 = vpop.f32.mrf.mxu1 }
 0x4fd   :  { %v2622_v53 = vpop.f32.mrf.mxu0  ;;  %3339 = vst.msk [vmem:[#allocation2 + $0xa78] sm:$0xff] %vm749_vm1, %v3802_v42 }
 0x4fe   :  { %3330 = vst [vmem:[#allocation2 + $0xa30] sm:$0xff] %v2622_v53  ;;  %v2965_v57 = vpop.f32.mrf.mxu1 }
 0x4ff   :  { %v2624_v2 = vpop.f32.mrf.mxu0  ;;  %3332 = vst.msk [vmem:[#allocation2 + $0xa40] sm:$0xff] %vm749_vm1, %v2965_v57 }
 0x500   :  { %3331 = vst [vmem:[#allocation2 + $0xa38] sm:$0xff] %v2624_v2  ;;  %v3805_v56 = vpop.f32.mrf.mxu1 }
 0x501   :  { %v2628_v60 = vpop.f32.mrf.mxu0  ;;  %3353 = vst.msk [vmem:[#allocation2 + $0xae8] sm:$0xff] %vm749_vm1, %v3805_v56 }
 0x502   :  { %3337 = vst [vmem:[#allocation2 + $0xa68] sm:$0xff] %v2628_v60  ;;  %v2975_v23 = vpop.f32.mrf.mxu1 }
 0x503   :  { %v2630_v5 = vpop.f32.mrf.mxu0  ;;  %3346 = vst.msk [vmem:[#allocation2 + $0xab0] sm:$0xff] %vm749_vm1, %v2975_v23 }
 0x504   :  { %3338 = vst [vmem:[#allocation2 + $0xa70] sm:$0xff] %v2630_v5  ;;  %v3808_v9 = vpop.f32.mrf.mxu1 }
 0x505   :  { %v2634_v10 = vpop.f32.mrf.mxu0  ;;  %3367 = vst.msk [vmem:[#allocation2 + $0xb58] sm:$0xff] %vm749_vm1, %v3808_v9 }
 0x506   :  { %3344 = vst [vmem:[#allocation2 + $0xaa0] sm:$0xff] %v2634_v10  ;;  %v2985_v3 = vpop.f32.mrf.mxu1 }
 0x507   :  { %v2636_v51 = vpop.f32.mrf.mxu0  ;;  %3360 = vst.msk [vmem:[#allocation2 + $0xb20] sm:$0xff] %vm749_vm1, %v2985_v3 }
 0x508   :  { %3345 = vst [vmem:[#allocation2 + $0xaa8] sm:$0xff] %v2636_v51  ;;  %v3811_v4 = vpop.f32.mrf.mxu1 }
 0x509   :  { %v2640_v32 = vpop.f32.mrf.mxu0  ;;  %3381 = vst.msk [vmem:[#allocation2 + $0xbc8] sm:$0xff] %vm749_vm1, %v3811_v4 }
 0x50a   :  { %3351 = vst [vmem:[#allocation2 + $0xad8] sm:$0xff] %v2640_v32  ;;  %v2995_v35 = vpop.f32.mrf.mxu1 }
 0x50b   :  { %v2642_v24 = vpop.f32.mrf.mxu0  ;;  %3374 = vst.msk [vmem:[#allocation2 + $0xb90] sm:$0xff] %vm749_vm1, %v2995_v35 }
 0x50c   :  { %3352 = vst [vmem:[#allocation2 + $0xae0] sm:$0xff] %v2642_v24 }
 0x50d   :  { %v2646_v19 = vpop.f32.mrf.mxu0 }
 0x50e   :  { %3358 = vst [vmem:[#allocation2 + $0xb10] sm:$0xff] %v2646_v19 }
 0x50f   :  { %v2648_v41 = vpop.f32.mrf.mxu0 }
 0x510   :  { %3359 = vst [vmem:[#allocation2 + $0xb18] sm:$0xff] %v2648_v41 }
 0x511   :  { %v2652_v62 = vpop.f32.mrf.mxu0 }
 0x512   :  { %3365 = vst [vmem:[#allocation2 + $0xb48] sm:$0xff] %v2652_v62 }
 0x513   :  { %v2654_v49 = vpop.f32.mrf.mxu0 }
 0x514   :  { %3366 = vst [vmem:[#allocation2 + $0xb50] sm:$0xff] %v2654_v49 }
 0x515   :  { %v2658_v0 = vpop.f32.mrf.mxu0 }
 0x516   :  { %3372 = vst [vmem:[#allocation2 + $0xb80] sm:$0xff] %v2658_v0 }
 0x517   :  { %v2660_v17 = vpop.f32.mrf.mxu0 }
 0x518   :  { %3373 = vst [vmem:[#allocation2 + $0xb88] sm:$0xff] %v2660_v17 }
 0x519   :  { %v2664_v25 = vpop.f32.mrf.mxu0 }
 0x51a   :  { %3379 = vst [vmem:[#allocation2 + $0xbb8] sm:$0xff] %v2664_v25 }
 0x51b   :  { %v2666_v37 = vpop.f32.mrf.mxu0 }
 0x51c   :  { %3380 = vst [vmem:[#allocation2 + $0xbc0] sm:$0xff] %v2666_v37 }
 0x51d   :  { %3880 = shalt.err (!%p3877_p4)
}
 0x51e   :  { %s3894_s23 = smov 896   ;;  %s3895_s24 = smov 56  }
 0x51f   :  { %3393 = dma.vmem_to_hbm [thread:$0]  %s3388_s22, 48384, %s6444_s5, [#allocation3], %s3894_s23, %s3894_s23, %s3895_s24  }
 0x520   :  { %3889 = dma.done.wait [#allocation3], 48384  }
 0x521   :  { %3890 = vsyncadd [#allocation3], 4294918912 }
 0x522   :  { %3397 = vsyncpa [#allocation3], 1 }

</bundles_post_ra>
